<compile_context>
chip_gen: v7x
topology: tpu7x:2x2x1
jax: 0.10.0
libtpu: 0.0.40
codegen_flags: <defaults>
</compile_context>

<pallas_src>
import jax
import jax.numpy as jnp
from jax import lax
from jax.experimental import pallas as pl
from jax.experimental.pallas import tpu as pltpu

BN_EPS = 1e-5
_VMEM_LIMIT = 32 * 1024 * 1024  # per-step tiles are small; fits v5e scoped / v7x physical


def _elu(x):
    # ELU(alpha=1) via expm1 (accurate for small negative x, one fewer VALU op).
    return jnp.where(x > 0, x, jnp.expm1(x))


# --------------------------------------------------------------------------------------
# Banded ("Toeplitz") weight construction: folds the kw taps and the W zero padding of a
# padding=1 conv into the matmul contraction dimension.  Built once per call (wrapper).
# TODO(synk): for large W the (3,3,W*Ci,W*Co) band should be tiled along W to bound VMEM.
# --------------------------------------------------------------------------------------
def _band_conv_weight(w_oidhw, w_out):
    """(Co, Ci, 3, 3, 3) torch layout -> (3, 3, w_out*Ci, w_out*Co) bf16 banded weight."""
    ci, co = w_oidhw.shape[1], w_oidhw.shape[0]
    wt = jnp.transpose(w_oidhw, (2, 3, 4, 1, 0)).astype(jnp.float32)   # (kd, kh, kw, Ci, Co)
    pos = jnp.arange(w_out)
    # sel[kw, w, p] = 1 iff p == w + kw - 1 ; out-of-range taps vanish => W zero padding.
    sel = (pos[None, None, :] == pos[None, :, None] + jnp.arange(3)[:, None, None] - 1)
    band = jnp.einsum("kwp,dhkco->dhpcwo", sel.astype(jnp.float32), wt)
    return band.reshape(3, 3, w_out * ci, w_out * co).astype(jnp.bfloat16)


def _band_up_weight(w_up, w_in):
    """ConvTranspose3d weight (Ci, Co, 2, 2, 2) -> block-diagonal (w_in*Ci, w_in*8*Co) bf16."""
    ci, co = w_up.shape[0], w_up.shape[1]
    wflat = jnp.transpose(w_up, (0, 2, 3, 4, 1)).reshape(ci, 8 * co).astype(jnp.float32)
    band = jnp.einsum("uv,cm->ucvm", jnp.eye(w_in, dtype=jnp.float32), wflat)
    return band.reshape(w_in * ci, w_in * 8 * co).astype(jnp.bfloat16)


def _pick_row_block(rows, bytes_per_row, cap_bytes=4 << 20):
    """Largest row tile that divides `rows`, is a multiple of 8 and fits the byte cap."""
    cap = max(8, cap_bytes // max(bytes_per_row, 1))
    if rows <= cap:
        return rows
    if rows % 8:
        return rows          # not sublane-divisible: fall back to one full-dim block
    b = (cap // 8) * 8
    while b >= 8:
        if rows % b == 0:
            return b
        b -= 8
    return rows


# --------------------------------------------------------------------------------------
# Kernels
# --------------------------------------------------------------------------------------
def _upsample_kernel(x_ref, w_ref, o_ref, stat_ref):
    """ConvTranspose3d(k=2, s=2) as one lane-dense MXU matmul per row tile.

    x_ref: (R, W*Ci) bf16 ; w_ref: (W*Ci, W*8*Co) bf16 block-diagonal
    o_ref: (R, W*8*Co) raw output ; stat_ref: (1, 2, W*8*Co) f32 [sum, sumsq] partials
    """
    y = jnp.dot(x_ref[...], w_ref[...], preferred_element_type=jnp.float32)
    o_ref[...] = y.astype(o_ref.dtype)
    stat_ref[0, 0:1, :] = jnp.sum(y, axis=0, keepdims=True)
    stat_ref[0, 1:2, :] = jnp.sum(y * y, axis=0, keepdims=True)


def _conv3x3x3_kernel(pm_ref, p0_ref, pp_ref, w_ref, o_ref, stat_ref):
    """3x3x3 padding=1 conv: one output depth plane for the whole batch per grid step.

    pm/p0/pp: (N,1,Hp,W*Ci) bf16 -- planes d, d+1, d+2 of the (D,H)-padded input
    w_ref:    (3,3,W*Ci,W*Co) bf16 banded weights (kw taps + W padding folded into K)
    o_ref:    (N,1,Ho,W*Co) raw conv output (bf16 or f32)
    stat_ref: (1,2,W*Co) f32 per-step [sum, sum-of-squares] partials for BatchNorm
    """
    n, _, ho, lanes = o_ref.shape
    planes = (pm_ref, p0_ref, pp_ref)
    s1 = jnp.zeros((1, lanes), jnp.float32)
    s2 = jnp.zeros((1, lanes), jnp.float32)
    for b in range(n):                                  # batch is a small static constant
        acc = jnp.zeros((ho, lanes), jnp.float32)
        for kd in range(3):
            for kh in range(3):
                rows = planes[kd][b, 0, kh:kh + ho, :]  # sublane shift only, no relayout
                acc = acc + jnp.dot(rows, w_ref[kd, kh],
                                    preferred_element_type=jnp.float32)
        o_ref[b, 0] = acc.astype(o_ref.dtype)
        s1 = s1 + jnp.sum(acc, axis=0, keepdims=True)
        s2 = s2 + jnp.sum(acc * acc, axis=0, keepdims=True)
    stat_ref[0, 0:1, :] = s1
    stat_ref[0, 1:2, :] = s2


# --------------------------------------------------------------------------------------
# pallas_call wrappers
# --------------------------------------------------------------------------------------
def _upsample_call(x2d, w_band, out_dtype):
    rows, wci = x2d.shape
    lanes = w_band.shape[1]
    tr = _pick_row_block(rows, (wci + 3 * lanes) * 2)   # in + out + f32 acc, per row
    nb = rows // tr
    return pl.pallas_call(
        _upsample_kernel,
        grid=(nb,),
        in_specs=[
            pl.BlockSpec((tr, wci), lambda i: (i, 0)),
            pl.BlockSpec(w_band.shape, lambda i: (0, 0)),
        ],
        out_specs=(
            pl.BlockSpec((tr, lanes), lambda i: (i, 0)),
            pl.BlockSpec((1, 2, lanes), lambda i: (i, 0, 0)),
        ),
        out_shape=(
            jax.ShapeDtypeStruct((rows, lanes), out_dtype),
            jax.ShapeDtypeStruct((nb, 2, lanes), jnp.float32),
        ),
        compiler_params=pltpu.CompilerParams(
            dimension_semantics=("parallel",),
            vmem_limit_bytes=_VMEM_LIMIT),
    )(x2d, w_band)


def _conv3x3x3_call(xpad_flat, w_band, out_dtype):
    n, dp, hp, wci = xpad_flat.shape
    do, ho = dp - 2, hp - 2
    lanes = w_band.shape[3]
    plane = (n, 1, hp, wci)
    return pl.pallas_call(
        _conv3x3x3_kernel,
        grid=(do,),
        in_specs=[
            pl.BlockSpec(plane, lambda j: (0, j, 0, 0)),
            pl.BlockSpec(plane, lambda j: (0, j + 1, 0, 0)),
            pl.BlockSpec(plane, lambda j: (0, j + 2, 0, 0)),
            pl.BlockSpec(w_band.shape, lambda j: (0, 0, 0, 0)),   # constant -> VMEM-resident
        ],
        out_specs=(
            pl.BlockSpec((n, 1, ho, lanes), lambda j: (0, j, 0, 0)),
            pl.BlockSpec((1, 2, lanes), lambda j: (j, 0, 0)),
        ),
        out_shape=(
            jax.ShapeDtypeStruct((n, do, ho, lanes), out_dtype),
            jax.ShapeDtypeStruct((do, 2, lanes), jnp.float32),
        ),
        compiler_params=pltpu.CompilerParams(
            dimension_semantics=("parallel",),
            vmem_limit_bytes=_VMEM_LIMIT),
    )(xpad_flat, xpad_flat, xpad_flat, w_band)


def _bn_affine(sums, count, gamma, beta):
    mean = sums[0] / count
    var = sums[1] / count - mean * mean          # biased variance (PyTorch train-mode BN)
    scale = gamma * lax.rsqrt(var + BN_EPS)
    return scale, beta - mean * scale


# --------------------------------------------------------------------------------------
# Full forward
# --------------------------------------------------------------------------------------
def decoding_conv_block_elu(x, enc, w_up, g_up, b_up, w1, g1, b1, w2, g2, b2):
    """x: (N, Cin, D, H, W); enc: (N, Cin-Cout, 2D, 2H, 2W);
    w_up: (Cin, Cout, 2,2,2); w1: (Cout, Cin, 3,3,3); w2: (Cout, Cout, 3,3,3)."""
    n, ci, d, h, w = x.shape
    co = w_up.shape[1]
    do, ho, wo = 2 * d, 2 * h, 2 * w
    c_cat = co + enc.shape[1]
    count = n * do * ho * wo

    # ---- stage 1: ConvTranspose3d(k=2, s=2) as one flat row-tiled matmul ----
    x2d = jnp.transpose(x, (0, 2, 3, 4, 1)).reshape(n * d * h, w * ci).astype(jnp.bfloat16)
    up_flat, up_stats = _upsample_call(x2d, _band_up_weight(w_up, w), jnp.bfloat16)
    sums_up = up_stats.sum(axis=0).reshape(2, w, 8, co).sum(axis=(1, 2))
    scale_up, shift_up = _bn_affine(sums_up, count, g_up, b_up)

    # BN_up + ELU + pixel-shuffle + concat(encoder) + D/H pad: XLA-fused wrapper glue.
    # Train-mode BN needs the global stats above before normalization can be applied.
    # TODO(synk): fold this affine+ELU into the conv1 kernel (needs in-kernel halo masking).
    up = up_flat.reshape(n, d, h, w, 2, 2, 2, co)
    up = jnp.transpose(up, (0, 1, 4, 2, 5, 3, 6, 7)).reshape(n, do, ho, wo, co)
    up = _elu(up.astype(jnp.float32) * scale_up + shift_up).astype(jnp.bfloat16)
    enc_cl = jnp.transpose(enc, (0, 2, 3, 4, 1)).astype(jnp.bfloat16)
    cat = jnp.concatenate([up, enc_cl], axis=-1)
    cat = jnp.pad(cat, ((0, 0), (1, 1), (1, 1), (0, 0), (0, 0)))
    cat = cat.reshape(n, do + 2, ho + 2, wo * c_cat)

    # ---- stage 2: conv1 (3x3x3, padding=1) ----
    h1, st1 = _conv3x3x3_call(cat, _band_conv_weight(w1, wo), jnp.bfloat16)
    sums1 = st1.sum(axis=0).reshape(2, wo, co).sum(axis=1)
    scale1, shift1 = _bn_affine(sums1, count, g1, b1)

    h1 = _elu(h1.reshape(n, do, ho, wo, co).astype(jnp.float32) * scale1 + shift1)
    h1 = jnp.pad(h1.astype(jnp.bfloat16), ((0, 0), (1, 1), (1, 1), (0, 0), (0, 0)))
    h1 = h1.reshape(n, do + 2, ho + 2, wo * co)

    # ---- stage 3: conv2 (3x3x3, padding=1) ----
    h2, st2 = _conv3x3x3_call(h1, _band_conv_weight(w2, wo), jnp.float32)
    sums2 = st2.sum(axis=0).reshape(2, wo, co).sum(axis=1)
    scale2, shift2 = _bn_affine(sums2, count, g2, b2)

    out = _elu(h2.reshape(n, do, ho, wo, co) * scale2 + shift2)
    return jnp.transpose(out, (0, 4, 1, 2, 3))          # back to NCDHW


# ---------------- pure-JAX reference (mirrors the PyTorch forward, f32) ----------------
def _reference(x, enc, w_up, g_up, b_up, w1, g1, b1, w2, g2, b2):
    dn = ("NCDHW", "OIDHW", "NCDHW")

    def bn_elu(y, g, b):
        mean = jnp.mean(y, axis=(0, 2, 3, 4), keepdims=True)
        var = jnp.mean((y - mean) ** 2, axis=(0, 2, 3, 4), keepdims=True)
        y = (y - mean) * lax.rsqrt(var + BN_EPS)
        y = y * g.reshape(1, -1, 1, 1, 1) + b.reshape(1, -1, 1, 1, 1)
        return jnp.where(y > 0, y, jnp.expm1(y))

    n, _, d, h, w = x.shape
    co = w_up.shape[1]
    up = jnp.einsum("ncdhw,coijk->nodihjwk", x, w_up).reshape(n, co, 2 * d, 2 * h, 2 * w)
    up = bn_elu(up, g_up, b_up)
    cat = jnp.concatenate([up, enc], axis=1)
    y = lax.conv_general_dilated(cat, w1, (1, 1, 1), [(1, 1)] * 3, dimension_numbers=dn)
    y = bn_elu(y, g1, b1)
    y = lax.conv_general_dilated(y, w2, (1, 1, 1), [(1, 1)] * 3, dimension_numbers=dn)
    return bn_elu(y, g2, b2)


if __name__ == "__main__":
    N, C_IN, C_OUT = 2, 8, 4
    D = H = W = 8                       # decoder input; upsampled to 16^3
    C_ENC = C_IN - C_OUT

    keys = jax.random.split(jax.random.PRNGKey(0), 11)
    x = jax.random.normal(keys[0], (N, C_IN, D, H, W), jnp.float32)
    enc = jax.random.normal(keys[1], (N, C_ENC, 2 * D, 2 * H, 2 * W), jnp.float32)
    w_up = 0.25 * jax.random.normal(keys[2], (C_IN, C_OUT, 2, 2, 2), jnp.float32)
    w1 = 0.15 * jax.random.normal(keys[3], (C_OUT, C_IN, 3, 3, 3), jnp.float32)
    w2 = 0.15 * jax.random.normal(keys[4], (C_OUT, C_OUT, 3, 3, 3), jnp.float32)
    g_up = 1.0 + 0.1 * jax.random.normal(keys[5], (C_OUT,), jnp.float32)
    b_up = 0.1 * jax.random.normal(keys[6], (C_OUT,), jnp.float32)
    g1 = 1.0 + 0.1 * jax.random.normal(keys[7], (C_OUT,), jnp.float32)
    b1 = 0.1 * jax.random.normal(keys[8], (C_OUT,), jnp.float32)
    g2 = 1.0 + 0.1 * jax.random.normal(keys[9], (C_OUT,), jnp.float32)
    b2 = 0.1 * jax.random.normal(keys[10], (C_OUT,), jnp.float32)

    fwd = jax.jit(decoding_conv_block_elu)
    out = jax.block_until_ready(fwd(x, enc, w_up, g_up, b_up, w1, g1, b1, w2, g2, b2))
    ref = jax.block_until_ready(_reference(x, enc, w_up, g_up, b_up, w1, g1, b1, w2, g2, b2))

    assert out.shape == (N, C_OUT, 2 * D, 2 * H, 2 * W), out.shape
    err_max = float(jnp.max(jnp.abs(out - ref)))
    err_rel = float(jnp.linalg.norm(out - ref) / (jnp.linalg.norm(ref) + 1e-12))
    # bf16 MXU operands / bf16 intermediates (f32 accumulation + f32 BN stats) vs. a pure-f32
    # reference -> loose but meaningful tolerances.
    assert err_max < 3e-1 and err_rel < 5e-2, (err_max, err_rel)
    print("KERNEL_OK")
</pallas_src>

<mosaic_0001>
module attributes {stable_mosaic.version = 11 : i64} {
  func.func @_upsample_kernel(%arg0: i32, %arg1: memref<128x64xbf16, #tpu.memory_space<vmem>>, %arg2: memref<64x256xbf16, #tpu.memory_space<vmem>>, %arg3: memref<128x256xbf16, #tpu.memory_space<vmem>>, %arg4: memref<1x2x256xf32, #tpu.memory_space<vmem>>) attributes {dimension_semantics = [#tpu.dimension_semantics<parallel>], iteration_bounds = array<i64: 1>, scalar_prefetch = 0 : i64, scratch_operands = 0 : i64, tpu.core_type = #tpu.core_type<tc>, window_params = [{transform_indices = @transform_0, window_bounds = array<i64: 128, 64>}, {pipeline_mode = #tpu.pipeline_mode<synchronous>, transform_indices = @transform_1, window_bounds = array<i64: 64, 256>}, {transform_indices = @transform_2, window_bounds = array<i64: 128, 256>}, {transform_indices = @transform_3, window_bounds = array<i64: 1, 2, 256>}]} {
    %c0 = arith.constant 0 : index
    %c0_0 = arith.constant 0 : index
    %0 = vector.load %arg1[%c0, %c0_0] : memref<128x64xbf16, #tpu.memory_space<vmem>>, vector<128x64xbf16>
    %c0_1 = arith.constant 0 : index
    %c0_2 = arith.constant 0 : index
    %1 = vector.load %arg2[%c0_1, %c0_2] : memref<64x256xbf16, #tpu.memory_space<vmem>>, vector<64x256xbf16>
    %cst = arith.constant dense<0.000000e+00> : vector<128x256xf32>
    %2 = tpu.matmul %0, %1, %cst {dimension_numbers = #tpu.dot_dimension_numbers<[1], [0], [0], [1], [0, 0, 1, 1], [], []>} : vector<128x64xbf16>, vector<64x256xbf16>, vector<128x256xf32> -> vector<128x256xf32>
    %3 = arith.truncf %2 : vector<128x256xf32> to vector<128x256xbf16>
    %c0_3 = arith.constant 0 : index
    %c0_4 = arith.constant 0 : index
    %4 = vector.load %arg3[%c0_3, %c0_4] : memref<128x256xbf16, #tpu.memory_space<vmem>>, vector<128x256xbf16>
    tpu.vector_store %arg3[%c0_3, %c0_4], %3 {strides = array<i32>} : memref<128x256xbf16, #tpu.memory_space<vmem>>, vector<128x256xbf16>,
    %cst_5 = arith.constant dense<0.000000e+00> : vector<256xf32>
    %5 = vector.multi_reduction <add>, %2, %cst_5 [0] : vector<128x256xf32> to vector<256xf32>
    %6 = vector.shape_cast %5 : vector<256xf32> to vector<1x256xf32>
    %c0_6 = arith.constant 0 : index
    %c0_7 = arith.constant 0 : index
    %c0_8 = arith.constant 0 : index
    %7 = vector.load %arg4[%c0_6, %c0_7, %c0_8] : memref<1x2x256xf32, #tpu.memory_space<vmem>>, vector<1x1x256xf32>
    %8 = vector.shape_cast %7 : vector<1x1x256xf32> to vector<1x256xf32>
    %9 = vector.shape_cast %6 : vector<1x256xf32> to vector<1x1x256xf32>
    tpu.vector_store %arg4[%c0_6, %c0_7, %c0_8], %9 {strides = array<i32>} : memref<1x2x256xf32, #tpu.memory_space<vmem>>, vector<1x1x256xf32>,
    %10 = arith.mulf %2, %2 : vector<128x256xf32>
    %cst_9 = arith.constant dense<0.000000e+00> : vector<256xf32>
    %11 = vector.multi_reduction <add>, %10, %cst_9 [0] : vector<128x256xf32> to vector<256xf32>
    %12 = vector.shape_cast %11 : vector<256xf32> to vector<1x256xf32>
    %c0_10 = arith.constant 0 : index
    %c1 = arith.constant 1 : index
    %c0_11 = arith.constant 0 : index
    %13 = vector.load %arg4[%c0_10, %c1, %c0_11] : memref<1x2x256xf32, #tpu.memory_space<vmem>>, vector<1x1x256xf32>
    %14 = vector.shape_cast %13 : vector<1x1x256xf32> to vector<1x256xf32>
    %15 = vector.shape_cast %12 : vector<1x256xf32> to vector<1x1x256xf32>
    tpu.vector_store %arg4[%c0_10, %c1, %c0_11], %15 {strides = array<i32>} : memref<1x2x256xf32, #tpu.memory_space<vmem>>, vector<1x1x256xf32>,
    return
  }
  func.func @transform_0(%arg0: i32) -> (i32, i32) {
    %c0_i32 = arith.constant 0 : i32
    %c0_i32_0 = arith.constant 0 : i32
    return %arg0, %c0_i32 : i32, i32
  }
  func.func @transform_1(%arg0: i32) -> (i32, i32) {
    %c0_i32 = arith.constant 0 : i32
    %c0_i32_0 = arith.constant 0 : i32
    %c0_i32_1 = arith.constant 0 : i32
    return %c0_i32, %c0_i32_0 : i32, i32
  }
  func.func @transform_2(%arg0: i32) -> (i32, i32) {
    %c0_i32 = arith.constant 0 : i32
    %c0_i32_0 = arith.constant 0 : i32
    return %arg0, %c0_i32 : i32, i32
  }
  func.func @transform_3(%arg0: i32) -> (i32, i32, i32) {
    %c0_i32 = arith.constant 0 : i32
    %c0_i32_0 = arith.constant 0 : i32
    %c0_i32_1 = arith.constant 0 : i32
    return %arg0, %c0_i32, %c0_i32_0 : i32, i32, i32
  }
}

module attributes {stable_mosaic.version = 11 : i64} {
  func.func @_conv3x3x3_kernel(%arg0: i32, %arg1: memref<2x1x18x128xbf16, #tpu.memory_space<vmem>>, %arg2: memref<2x1x18x128xbf16, #tpu.memory_space<vmem>>, %arg3: memref<2x1x18x128xbf16, #tpu.memory_space<vmem>>, %arg4: memref<3x3x128x64xbf16, #tpu.memory_space<vmem>>, %arg5: memref<2x1x16x64xbf16, #tpu.memory_space<vmem>>, %arg6: memref<1x2x64xf32, #tpu.memory_space<vmem>>) attributes {dimension_semantics = [#tpu.dimension_semantics<parallel>], iteration_bounds = array<i64: 16>, scalar_prefetch = 0 : i64, scratch_operands = 0 : i64, tpu.core_type = #tpu.core_type<tc>, window_params = [{transform_indices = @transform_0, window_bounds = array<i64: 2, 1, 18, 128>}, {transform_indices = @transform_1, window_bounds = array<i64: 2, 1, 18, 128>}, {transform_indices = @transform_2, window_bounds = array<i64: 2, 1, 18, 128>}, {pipeline_mode = #tpu.pipeline_mode<synchronous>, transform_indices = @transform_3, window_bounds = array<i64: 3, 3, 128, 64>}, {transform_indices = @transform_4, window_bounds = array<i64: 2, 1, 16, 64>}, {transform_indices = @transform_5, window_bounds = array<i64: 1, 2, 64>}]} {
    %cst = arith.constant 0.000000e+00 : f32
    %0 = vector.broadcast %cst : f32 to vector<1x64xf32>
    %cst_0 = arith.constant 0.000000e+00 : f32
    %1 = vector.broadcast %cst_0 : f32 to vector<1x64xf32>
    %cst_1 = arith.constant 0.000000e+00 : f32
    %2 = vector.broadcast %cst_1 : f32 to vector<16x64xf32>
    %c0 = arith.constant 0 : index
    %c0_2 = arith.constant 0 : index
    %c0_3 = arith.constant 0 : index
    %c0_4 = arith.constant 0 : index
    %3 = vector.load %arg1[%c0, %c0_2, %c0_3, %c0_4] : memref<2x1x18x128xbf16, #tpu.memory_space<vmem>>, vector<1x1x16x128xbf16>
    %4 = vector.shape_cast %3 : vector<1x1x16x128xbf16> to vector<16x128xbf16>
    %c0_5 = arith.constant 0 : index
    %c0_6 = arith.constant 0 : index
    %c0_7 = arith.constant 0 : index
    %c0_8 = arith.constant 0 : index
    %5 = vector.load %arg4[%c0_5, %c0_6, %c0_7, %c0_8] : memref<3x3x128x64xbf16, #tpu.memory_space<vmem>>, vector<1x1x128x64xbf16>
    %6 = vector.shape_cast %5 : vector<1x1x128x64xbf16> to vector<128x64xbf16>
    %cst_9 = arith.constant dense<0.000000e+00> : vector<16x64xf32>
    %7 = tpu.matmul %4, %6, %cst_9 {dimension_numbers = #tpu.dot_dimension_numbers<[1], [0], [0], [1], [0, 0, 1, 1], [], []>} : vector<16x128xbf16>, vector<128x64xbf16>, vector<16x64xf32> -> vector<16x64xf32>
    %8 = arith.addf %2, %7 : vector<16x64xf32>
    %c0_10 = arith.constant 0 : index
    %c0_11 = arith.constant 0 : index
    %c1 = arith.constant 1 : index
    %c0_12 = arith.constant 0 : index
    %9 = vector.load %arg1[%c0_10, %c0_11, %c1, %c0_12] : memref<2x1x18x128xbf16, #tpu.memory_space<vmem>>, vector<1x1x16x128xbf16>
    %10 = vector.shape_cast %9 : vector<1x1x16x128xbf16> to vector<16x128xbf16>
    %c0_13 = arith.constant 0 : index
    %c1_14 = arith.constant 1 : index
    %c0_15 = arith.constant 0 : index
    %c0_16 = arith.constant 0 : index
    %11 = vector.load %arg4[%c0_13, %c1_14, %c0_15, %c0_16] : memref<3x3x128x64xbf16, #tpu.memory_space<vmem>>, vector<1x1x128x64xbf16>
    %12 = vector.shape_cast %11 : vector<1x1x128x64xbf16> to vector<128x64xbf16>
    %cst_17 = arith.constant dense<0.000000e+00> : vector<16x64xf32>
    %13 = tpu.matmul %10, %12, %cst_17 {dimension_numbers = #tpu.dot_dimension_numbers<[1], [0], [0], [1], [0, 0, 1, 1], [], []>} : vector<16x128xbf16>, vector<128x64xbf16>, vector<16x64xf32> -> vector<16x64xf32>
    %14 = arith.addf %8, %13 : vector<16x64xf32>
    %c0_18 = arith.constant 0 : index
    %c0_19 = arith.constant 0 : index
    %c2 = arith.constant 2 : index
    %c0_20 = arith.constant 0 : index
    %15 = vector.load %arg1[%c0_18, %c0_19, %c2, %c0_20] : memref<2x1x18x128xbf16, #tpu.memory_space<vmem>>, vector<1x1x16x128xbf16>
    %16 = vector.shape_cast %15 : vector<1x1x16x128xbf16> to vector<16x128xbf16>
    %c0_21 = arith.constant 0 : index
    %c2_22 = arith.constant 2 : index
    %c0_23 = arith.constant 0 : index
    %c0_24 = arith.constant 0 : index
    %17 = vector.load %arg4[%c0_21, %c2_22, %c0_23, %c0_24] : memref<3x3x128x64xbf16, #tpu.memory_space<vmem>>, vector<1x1x128x64xbf16>
    %18 = vector.shape_cast %17 : vector<1x1x128x64xbf16> to vector<128x64xbf16>
    %cst_25 = arith.constant dense<0.000000e+00> : vector<16x64xf32>
    %19 = tpu.matmul %16, %18, %cst_25 {dimension_numbers = #tpu.dot_dimension_numbers<[1], [0], [0], [1], [0, 0, 1, 1], [], []>} : vector<16x128xbf16>, vector<128x64xbf16>, vector<16x64xf32> -> vector<16x64xf32>
    %20 = arith.addf %14, %19 : vector<16x64xf32>
    %c0_26 = arith.constant 0 : index
    %c0_27 = arith.constant 0 : index
    %c0_28 = arith.constant 0 : index
    %c0_29 = arith.constant 0 : index
    %21 = vector.load %arg2[%c0_26, %c0_27, %c0_28, %c0_29] : memref<2x1x18x128xbf16, #tpu.memory_space<vmem>>, vector<1x1x16x128xbf16>
    %22 = vector.shape_cast %21 : vector<1x1x16x128xbf16> to vector<16x128xbf16>
    %c1_30 = arith.constant 1 : index
    %c0_31 = arith.constant 0 : index
    %c0_32 = arith.constant 0 : index
    %c0_33 = arith.constant 0 : index
    %23 = vector.load %arg4[%c1_30, %c0_31, %c0_32, %c0_33] : memref<3x3x128x64xbf16, #tpu.memory_space<vmem>>, vector<1x1x128x64xbf16>
    %24 = vector.shape_cast %23 : vector<1x1x128x64xbf16> to vector<128x64xbf16>
    %cst_34 = arith.constant dense<0.000000e+00> : vector<16x64xf32>
    %25 = tpu.matmul %22, %24, %cst_34 {dimension_numbers = #tpu.dot_dimension_numbers<[1], [0], [0], [1], [0, 0, 1, 1], [], []>} : vector<16x128xbf16>, vector<128x64xbf16>, vector<16x64xf32> -> vector<16x64xf32>
    %26 = arith.addf %20, %25 : vector<16x64xf32>
    %c0_35 = arith.constant 0 : index
    %c0_36 = arith.constant 0 : index
    %c1_37 = arith.constant 1 : index
    %c0_38 = arith.constant 0 : index
    %27 = vector.load %arg2[%c0_35, %c0_36, %c1_37, %c0_38] : memref<2x1x18x128xbf16, #tpu.memory_space<vmem>>, vector<1x1x16x128xbf16>
    %28 = vector.shape_cast %27 : vector<1x1x16x128xbf16> to vector<16x128xbf16>
    %c1_39 = arith.constant 1 : index
    %c1_40 = arith.constant 1 : index
    %c0_41 = arith.constant 0 : index
    %c0_42 = arith.constant 0 : index
    %29 = vector.load %arg4[%c1_39, %c1_40, %c0_41, %c0_42] : memref<3x3x128x64xbf16, #tpu.memory_space<vmem>>, vector<1x1x128x64xbf16>
    %30 = vector.shape_cast %29 : vector<1x1x128x64xbf16> to vector<128x64xbf16>
    %cst_43 = arith.constant dense<0.000000e+00> : vector<16x64xf32>
    %31 = tpu.matmul %28, %30, %cst_43 {dimension_numbers = #tpu.dot_dimension_numbers<[1], [0], [0], [1], [0, 0, 1, 1], [], []>} : vector<16x128xbf16>, vector<128x64xbf16>, vector<16x64xf32> -> vector<16x64xf32>
    %32 = arith.addf %26, %31 : vector<16x64xf32>
    %c0_44 = arith.constant 0 : index
    %c0_45 = arith.constant 0 : index
    %c2_46 = arith.constant 2 : index
    %c0_47 = arith.constant 0 : index
    %33 = vector.load %arg2[%c0_44, %c0_45, %c2_46, %c0_47] : memref<2x1x18x128xbf16, #tpu.memory_space<vmem>>, vector<1x1x16x128xbf16>
    %34 = vector.shape_cast %33 : vector<1x1x16x128xbf16> to vector<16x128xbf16>
    %c1_48 = arith.constant 1 : index
    %c2_49 = arith.constant 2 : index
    %c0_50 = arith.constant 0 : index
    %c0_51 = arith.constant 0 : index
    %35 = vector.load %arg4[%c1_48, %c2_49, %c0_50, %c0_51] : memref<3x3x128x64xbf16, #tpu.memory_space<vmem>>, vector<1x1x128x64xbf16>
    %36 = vector.shape_cast %35 : vector<1x1x128x64xbf16> to vector<128x64xbf16>
    %cst_52 = arith.constant dense<0.000000e+00> : vector<16x64xf32>
    %37 = tpu.matmul %34, %36, %cst_52 {dimension_numbers = #tpu.dot_dimension_numbers<[1], [0], [0], [1], [0, 0, 1, 1], [], []>} : vector<16x128xbf16>, vector<128x64xbf16>, vector<16x64xf32> -> vector<16x64xf32>
    %38 = arith.addf %32, %37 : vector<16x64xf32>
    %c0_53 = arith.constant 0 : index
    %c0_54 = arith.constant 0 : index
    %c0_55 = arith.constant 0 : index
    %c0_56 = arith.constant 0 : index
    %39 = vector.load %arg3[%c0_53, %c0_54, %c0_55, %c0_56] : memref<2x1x18x128xbf16, #tpu.memory_space<vmem>>, vector<1x1x16x128xbf16>
    %40 = vector.shape_cast %39 : vector<1x1x16x128xbf16> to vector<16x128xbf16>
    %c2_57 = arith.constant 2 : index
    %c0_58 = arith.constant 0 : index
    %c0_59 = arith.constant 0 : index
    %c0_60 = arith.constant 0 : index
    %41 = vector.load %arg4[%c2_57, %c0_58, %c0_59, %c0_60] : memref<3x3x128x64xbf16, #tpu.memory_space<vmem>>, vector<1x1x128x64xbf16>
    %42 = vector.shape_cast %41 : vector<1x1x128x64xbf16> to vector<128x64xbf16>
    %cst_61 = arith.constant dense<0.000000e+00> : vector<16x64xf32>
    %43 = tpu.matmul %40, %42, %cst_61 {dimension_numbers = #tpu.dot_dimension_numbers<[1], [0], [0], [1], [0, 0, 1, 1], [], []>} : vector<16x128xbf16>, vector<128x64xbf16>, vector<16x64xf32> -> vector<16x64xf32>
    %44 = arith.addf %38, %43 : vector<16x64xf32>
    %c0_62 = arith.constant 0 : index
    %c0_63 = arith.constant 0 : index
    %c1_64 = arith.constant 1 : index
    %c0_65 = arith.constant 0 : index
    %45 = vector.load %arg3[%c0_62, %c0_63, %c1_64, %c0_65] : memref<2x1x18x128xbf16, #tpu.memory_space<vmem>>, vector<1x1x16x128xbf16>
    %46 = vector.shape_cast %45 : vector<1x1x16x128xbf16> to vector<16x128xbf16>
    %c2_66 = arith.constant 2 : index
    %c1_67 = arith.constant 1 : index
    %c0_68 = arith.constant 0 : index
    %c0_69 = arith.constant 0 : index
    %47 = vector.load %arg4[%c2_66, %c1_67, %c0_68, %c0_69] : memref<3x3x128x64xbf16, #tpu.memory_space<vmem>>, vector<1x1x128x64xbf16>
    %48 = vector.shape_cast %47 : vector<1x1x128x64xbf16> to vector<128x64xbf16>
    %cst_70 = arith.constant dense<0.000000e+00> : vector<16x64xf32>
    %49 = tpu.matmul %46, %48, %cst_70 {dimension_numbers = #tpu.dot_dimension_numbers<[1], [0], [0], [1], [0, 0, 1, 1], [], []>} : vector<16x128xbf16>, vector<128x64xbf16>, vector<16x64xf32> -> vector<16x64xf32>
    %50 = arith.addf %44, %49 : vector<16x64xf32>
    %c0_71 = arith.constant 0 : index
    %c0_72 = arith.constant 0 : index
    %c2_73 = arith.constant 2 : index
    %c0_74 = arith.constant 0 : index
    %51 = vector.load %arg3[%c0_71, %c0_72, %c2_73, %c0_74] : memref<2x1x18x128xbf16, #tpu.memory_space<vmem>>, vector<1x1x16x128xbf16>
    %52 = vector.shape_cast %51 : vector<1x1x16x128xbf16> to vector<16x128xbf16>
    %c2_75 = arith.constant 2 : index
    %c2_76 = arith.constant 2 : index
    %c0_77 = arith.constant 0 : index
    %c0_78 = arith.constant 0 : index
    %53 = vector.load %arg4[%c2_75, %c2_76, %c0_77, %c0_78] : memref<3x3x128x64xbf16, #tpu.memory_space<vmem>>, vector<1x1x128x64xbf16>
    %54 = vector.shape_cast %53 : vector<1x1x128x64xbf16> to vector<128x64xbf16>
    %cst_79 = arith.constant dense<0.000000e+00> : vector<16x64xf32>
    %55 = tpu.matmul %52, %54, %cst_79 {dimension_numbers = #tpu.dot_dimension_numbers<[1], [0], [0], [1], [0, 0, 1, 1], [], []>} : vector<16x128xbf16>, vector<128x64xbf16>, vector<16x64xf32> -> vector<16x64xf32>
    %56 = arith.addf %50, %55 : vector<16x64xf32>
    %57 = arith.truncf %56 : vector<16x64xf32> to vector<16x64xbf16>
    %c0_80 = arith.constant 0 : index
    %c0_81 = arith.constant 0 : index
    %c0_82 = arith.constant 0 : index
    %c0_83 = arith.constant 0 : index
    %58 = vector.load %arg5[%c0_80, %c0_81, %c0_82, %c0_83] : memref<2x1x16x64xbf16, #tpu.memory_space<vmem>>, vector<1x1x16x64xbf16>
    %59 = vector.shape_cast %58 : vector<1x1x16x64xbf16> to vector<16x64xbf16>
    %60 = vector.shape_cast %57 : vector<16x64xbf16> to vector<1x1x16x64xbf16>
    tpu.vector_store %arg5[%c0_80, %c0_81, %c0_82, %c0_83], %60 {strides = array<i32>} : memref<2x1x16x64xbf16, #tpu.memory_space<vmem>>, vector<1x1x16x64xbf16>,
    %cst_84 = arith.constant dense<0.000000e+00> : vector<64xf32>
    %61 = vector.multi_reduction <add>, %56, %cst_84 [0] : vector<16x64xf32> to vector<64xf32>
    %62 = vector.shape_cast %61 : vector<64xf32> to vector<1x64xf32>
    %63 = arith.addf %0, %62 : vector<1x64xf32>
    %64 = arith.mulf %56, %56 : vector<16x64xf32>
    %cst_85 = arith.constant dense<0.000000e+00> : vector<64xf32>
    %65 = vector.multi_reduction <add>, %64, %cst_85 [0] : vector<16x64xf32> to vector<64xf32>
    %66 = vector.shape_cast %65 : vector<64xf32> to vector<1x64xf32>
    %67 = arith.addf %1, %66 : vector<1x64xf32>
    %cst_86 = arith.constant 0.000000e+00 : f32
    %68 = vector.broadcast %cst_86 : f32 to vector<16x64xf32>
    %c1_87 = arith.constant 1 : index
    %c0_88 = arith.constant 0 : index
    %c0_89 = arith.constant 0 : index
    %c0_90 = arith.constant 0 : index
    %69 = vector.load %arg1[%c1_87, %c0_88, %c0_89, %c0_90] : memref<2x1x18x128xbf16, #tpu.memory_space<vmem>>, vector<1x1x16x128xbf16>
    %70 = vector.shape_cast %69 : vector<1x1x16x128xbf16> to vector<16x128xbf16>
    %c0_91 = arith.constant 0 : index
    %c0_92 = arith.constant 0 : index
    %c0_93 = arith.constant 0 : index
    %c0_94 = arith.constant 0 : index
    %71 = vector.load %arg4[%c0_91, %c0_92, %c0_93, %c0_94] : memref<3x3x128x64xbf16, #tpu.memory_space<vmem>>, vector<1x1x128x64xbf16>
    %72 = vector.shape_cast %71 : vector<1x1x128x64xbf16> to vector<128x64xbf16>
    %cst_95 = arith.constant dense<0.000000e+00> : vector<16x64xf32>
    %73 = tpu.matmul %70, %72, %cst_95 {dimension_numbers = #tpu.dot_dimension_numbers<[1], [0], [0], [1], [0, 0, 1, 1], [], []>} : vector<16x128xbf16>, vector<128x64xbf16>, vector<16x64xf32> -> vector<16x64xf32>
    %74 = arith.addf %68, %73 : vector<16x64xf32>
    %c1_96 = arith.constant 1 : index
    %c0_97 = arith.constant 0 : index
    %c1_98 = arith.constant 1 : index
    %c0_99 = arith.constant 0 : index
    %75 = vector.load %arg1[%c1_96, %c0_97, %c1_98, %c0_99] : memref<2x1x18x128xbf16, #tpu.memory_space<vmem>>, vector<1x1x16x128xbf16>
    %76 = vector.shape_cast %75 : vector<1x1x16x128xbf16> to vector<16x128xbf16>
    %c0_100 = arith.constant 0 : index
    %c1_101 = arith.constant 1 : index
    %c0_102 = arith.constant 0 : index
    %c0_103 = arith.constant 0 : index
    %77 = vector.load %arg4[%c0_100, %c1_101, %c0_102, %c0_103] : memref<3x3x128x64xbf16, #tpu.memory_space<vmem>>, vector<1x1x128x64xbf16>
    %78 = vector.shape_cast %77 : vector<1x1x128x64xbf16> to vector<128x64xbf16>
    %cst_104 = arith.constant dense<0.000000e+00> : vector<16x64xf32>
    %79 = tpu.matmul %76, %78, %cst_104 {dimension_numbers = #tpu.dot_dimension_numbers<[1], [0], [0], [1], [0, 0, 1, 1], [], []>} : vector<16x128xbf16>, vector<128x64xbf16>, vector<16x64xf32> -> vector<16x64xf32>
    %80 = arith.addf %74, %79 : vector<16x64xf32>
    %c1_105 = arith.constant 1 : index
    %c0_106 = arith.constant 0 : index
    %c2_107 = arith.constant 2 : index
    %c0_108 = arith.constant 0 : index
    %81 = vector.load %arg1[%c1_105, %c0_106, %c2_107, %c0_108] : memref<2x1x18x128xbf16, #tpu.memory_space<vmem>>, vector<1x1x16x128xbf16>
    %82 = vector.shape_cast %81 : vector<1x1x16x128xbf16> to vector<16x128xbf16>
    %c0_109 = arith.constant 0 : index
    %c2_110 = arith.constant 2 : index
    %c0_111 = arith.constant 0 : index
    %c0_112 = arith.constant 0 : index
    %83 = vector.load %arg4[%c0_109, %c2_110, %c0_111, %c0_112] : memref<3x3x128x64xbf16, #tpu.memory_space<vmem>>, vector<1x1x128x64xbf16>
    %84 = vector.shape_cast %83 : vector<1x1x128x64xbf16> to vector<128x64xbf16>
    %cst_113 = arith.constant dense<0.000000e+00> : vector<16x64xf32>
    %85 = tpu.matmul %82, %84, %cst_113 {dimension_numbers = #tpu.dot_dimension_numbers<[1], [0], [0], [1], [0, 0, 1, 1], [], []>} : vector<16x128xbf16>, vector<128x64xbf16>, vector<16x64xf32> -> vector<16x64xf32>
    %86 = arith.addf %80, %85 : vector<16x64xf32>
    %c1_114 = arith.constant 1 : index
    %c0_115 = arith.constant 0 : index
    %c0_116 = arith.constant 0 : index
    %c0_117 = arith.constant 0 : index
    %87 = vector.load %arg2[%c1_114, %c0_115, %c0_116, %c0_117] : memref<2x1x18x128xbf16, #tpu.memory_space<vmem>>, vector<1x1x16x128xbf16>
    %88 = vector.shape_cast %87 : vector<1x1x16x128xbf16> to vector<16x128xbf16>
    %c1_118 = arith.constant 1 : index
    %c0_119 = arith.constant 0 : index
    %c0_120 = arith.constant 0 : index
    %c0_121 = arith.constant 0 : index
    %89 = vector.load %arg4[%c1_118, %c0_119, %c0_120, %c0_121] : memref<3x3x128x64xbf16, #tpu.memory_space<vmem>>, vector<1x1x128x64xbf16>
    %90 = vector.shape_cast %89 : vector<1x1x128x64xbf16> to vector<128x64xbf16>
    %cst_122 = arith.constant dense<0.000000e+00> : vector<16x64xf32>
    %91 = tpu.matmul %88, %90, %cst_122 {dimension_numbers = #tpu.dot_dimension_numbers<[1], [0], [0], [1], [0, 0, 1, 1], [], []>} : vector<16x128xbf16>, vector<128x64xbf16>, vector<16x64xf32> -> vector<16x64xf32>
    %92 = arith.addf %86, %91 : vector<16x64xf32>
    %c1_123 = arith.constant 1 : index
    %c0_124 = arith.constant 0 : index
    %c1_125 = arith.constant 1 : index
    %c0_126 = arith.constant 0 : index
    %93 = vector.load %arg2[%c1_123, %c0_124, %c1_125, %c0_126] : memref<2x1x18x128xbf16, #tpu.memory_space<vmem>>, vector<1x1x16x128xbf16>
    %94 = vector.shape_cast %93 : vector<1x1x16x128xbf16> to vector<16x128xbf16>
    %c1_127 = arith.constant 1 : index
    %c1_128 = arith.constant 1 : index
    %c0_129 = arith.constant 0 : index
    %c0_130 = arith.constant 0 : index
    %95 = vector.load %arg4[%c1_127, %c1_128, %c0_129, %c0_130] : memref<3x3x128x64xbf16, #tpu.memory_space<vmem>>, vector<1x1x128x64xbf16>
    %96 = vector.shape_cast %95 : vector<1x1x128x64xbf16> to vector<128x64xbf16>
    %cst_131 = arith.constant dense<0.000000e+00> : vector<16x64xf32>
    %97 = tpu.matmul %94, %96, %cst_131 {dimension_numbers = #tpu.dot_dimension_numbers<[1], [0], [0], [1], [0, 0, 1, 1], [], []>} : vector<16x128xbf16>, vector<128x64xbf16>, vector<16x64xf32> -> vector<16x64xf32>
    %98 = arith.addf %92, %97 : vector<16x64xf32>
    %c1_132 = arith.constant 1 : index
    %c0_133 = arith.constant 0 : index
    %c2_134 = arith.constant 2 : index
    %c0_135 = arith.constant 0 : index
    %99 = vector.load %arg2[%c1_132, %c0_133, %c2_134, %c0_135] : memref<2x1x18x128xbf16, #tpu.memory_space<vmem>>, vector<1x1x16x128xbf16>
    %100 = vector.shape_cast %99 : vector<1x1x16x128xbf16> to vector<16x128xbf16>
    %c1_136 = arith.constant 1 : index
    %c2_137 = arith.constant 2 : index
    %c0_138 = arith.constant 0 : index
    %c0_139 = arith.constant 0 : index
    %101 = vector.load %arg4[%c1_136, %c2_137, %c0_138, %c0_139] : memref<3x3x128x64xbf16, #tpu.memory_space<vmem>>, vector<1x1x128x64xbf16>
    %102 = vector.shape_cast %101 : vector<1x1x128x64xbf16> to vector<128x64xbf16>
    %cst_140 = arith.constant dense<0.000000e+00> : vector<16x64xf32>
    %103 = tpu.matmul %100, %102, %cst_140 {dimension_numbers = #tpu.dot_dimension_numbers<[1], [0], [0], [1], [0, 0, 1, 1], [], []>} : vector<16x128xbf16>, vector<128x64xbf16>, vector<16x64xf32> -> vector<16x64xf32>
    %104 = arith.addf %98, %103 : vector<16x64xf32>
    %c1_141 = arith.constant 1 : index
    %c0_142 = arith.constant 0 : index
    %c0_143 = arith.constant 0 : index
    %c0_144 = arith.constant 0 : index
    %105 = vector.load %arg3[%c1_141, %c0_142, %c0_143, %c0_144] : memref<2x1x18x128xbf16, #tpu.memory_space<vmem>>, vector<1x1x16x128xbf16>
    %106 = vector.shape_cast %105 : vector<1x1x16x128xbf16> to vector<16x128xbf16>
    %c2_145 = arith.constant 2 : index
    %c0_146 = arith.constant 0 : index
    %c0_147 = arith.constant 0 : index
    %c0_148 = arith.constant 0 : index
    %107 = vector.load %arg4[%c2_145, %c0_146, %c0_147, %c0_148] : memref<3x3x128x64xbf16, #tpu.memory_space<vmem>>, vector<1x1x128x64xbf16>
    %108 = vector.shape_cast %107 : vector<1x1x128x64xbf16> to vector<128x64xbf16>
    %cst_149 = arith.constant dense<0.000000e+00> : vector<16x64xf32>
    %109 = tpu.matmul %106, %108, %cst_149 {dimension_numbers = #tpu.dot_dimension_numbers<[1], [0], [0], [1], [0, 0, 1, 1], [], []>} : vector<16x128xbf16>, vector<128x64xbf16>, vector<16x64xf32> -> vector<16x64xf32>
    %110 = arith.addf %104, %109 : vector<16x64xf32>
    %c1_150 = arith.constant 1 : index
    %c0_151 = arith.constant 0 : index
    %c1_152 = arith.constant 1 : index
    %c0_153 = arith.constant 0 : index
    %111 = vector.load %arg3[%c1_150, %c0_151, %c1_152, %c0_153] : memref<2x1x18x128xbf16, #tpu.memory_space<vmem>>, vector<1x1x16x128xbf16>
    %112 = vector.shape_cast %111 : vector<1x1x16x128xbf16> to vector<16x128xbf16>
    %c2_154 = arith.constant 2 : index
    %c1_155 = arith.constant 1 : index
    %c0_156 = arith.constant 0 : index
    %c0_157 = arith.constant 0 : index
    %113 = vector.load %arg4[%c2_154, %c1_155, %c0_156, %c0_157] : memref<3x3x128x64xbf16, #tpu.memory_space<vmem>>, vector<1x1x128x64xbf16>
    %114 = vector.shape_cast %113 : vector<1x1x128x64xbf16> to vector<128x64xbf16>
    %cst_158 = arith.constant dense<0.000000e+00> : vector<16x64xf32>
    %115 = tpu.matmul %112, %114, %cst_158 {dimension_numbers = #tpu.dot_dimension_numbers<[1], [0], [0], [1], [0, 0, 1, 1], [], []>} : vector<16x128xbf16>, vector<128x64xbf16>, vector<16x64xf32> -> vector<16x64xf32>
    %116 = arith.addf %110, %115 : vector<16x64xf32>
    %c1_159 = arith.constant 1 : index
    %c0_160 = arith.constant 0 : index
    %c2_161 = arith.constant 2 : index
    %c0_162 = arith.constant 0 : index
    %117 = vector.load %arg3[%c1_159, %c0_160, %c2_161, %c0_162] : memref<2x1x18x128xbf16, #tpu.memory_space<vmem>>, vector<1x1x16x128xbf16>
    %118 = vector.shape_cast %117 : vector<1x1x16x128xbf16> to vector<16x128xbf16>
    %c2_163 = arith.constant 2 : index
    %c2_164 = arith.constant 2 : index
    %c0_165 = arith.constant 0 : index
    %c0_166 = arith.constant 0 : index
    %119 = vector.load %arg4[%c2_163, %c2_164, %c0_165, %c0_166] : memref<3x3x128x64xbf16, #tpu.memory_space<vmem>>, vector<1x1x128x64xbf16>
    %120 = vector.shape_cast %119 : vector<1x1x128x64xbf16> to vector<128x64xbf16>
    %cst_167 = arith.constant dense<0.000000e+00> : vector<16x64xf32>
    %121 = tpu.matmul %118, %120, %cst_167 {dimension_numbers = #tpu.dot_dimension_numbers<[1], [0], [0], [1], [0, 0, 1, 1], [], []>} : vector<16x128xbf16>, vector<128x64xbf16>, vector<16x64xf32> -> vector<16x64xf32>
    %122 = arith.addf %116, %121 : vector<16x64xf32>
    %123 = arith.truncf %122 : vector<16x64xf32> to vector<16x64xbf16>
    %c1_168 = arith.constant 1 : index
    %c0_169 = arith.constant 0 : index
    %c0_170 = arith.constant 0 : index
    %c0_171 = arith.constant 0 : index
    %124 = vector.load %arg5[%c1_168, %c0_169, %c0_170, %c0_171] : memref<2x1x16x64xbf16, #tpu.memory_space<vmem>>, vector<1x1x16x64xbf16>
    %125 = vector.shape_cast %124 : vector<1x1x16x64xbf16> to vector<16x64xbf16>
    %126 = vector.shape_cast %123 : vector<16x64xbf16> to vector<1x1x16x64xbf16>
    tpu.vector_store %arg5[%c1_168, %c0_169, %c0_170, %c0_171], %126 {strides = array<i32>} : memref<2x1x16x64xbf16, #tpu.memory_space<vmem>>, vector<1x1x16x64xbf16>,
    %cst_172 = arith.constant dense<0.000000e+00> : vector<64xf32>
    %127 = vector.multi_reduction <add>, %122, %cst_172 [0] : vector<16x64xf32> to vector<64xf32>
    %128 = vector.shape_cast %127 : vector<64xf32> to vector<1x64xf32>
    %129 = arith.addf %63, %128 : vector<1x64xf32>
    %130 = arith.mulf %122, %122 : vector<16x64xf32>
    %cst_173 = arith.constant dense<0.000000e+00> : vector<64xf32>
    %131 = vector.multi_reduction <add>, %130, %cst_173 [0] : vector<16x64xf32> to vector<64xf32>
    %132 = vector.shape_cast %131 : vector<64xf32> to vector<1x64xf32>
    %133 = arith.addf %67, %132 : vector<1x64xf32>
    %c0_174 = arith.constant 0 : index
    %c0_175 = arith.constant 0 : index
    %c0_176 = arith.constant 0 : index
    %134 = vector.load %arg6[%c0_174, %c0_175, %c0_176] : memref<1x2x64xf32, #tpu.memory_space<vmem>>, vector<1x1x64xf32>
    %135 = vector.shape_cast %134 : vector<1x1x64xf32> to vector<1x64xf32>
    %136 = vector.shape_cast %129 : vector<1x64xf32> to vector<1x1x64xf32>
    tpu.vector_store %arg6[%c0_174, %c0_175, %c0_176], %136 {strides = array<i32>} : memref<1x2x64xf32, #tpu.memory_space<vmem>>, vector<1x1x64xf32>,
    %c0_177 = arith.constant 0 : index
    %c1_178 = arith.constant 1 : index
    %c0_179 = arith.constant 0 : index
    %137 = vector.load %arg6[%c0_177, %c1_178, %c0_179] : memref<1x2x64xf32, #tpu.memory_space<vmem>>, vector<1x1x64xf32>
    %138 = vector.shape_cast %137 : vector<1x1x64xf32> to vector<1x64xf32>
    %139 = vector.shape_cast %133 : vector<1x64xf32> to vector<1x1x64xf32>
    tpu.vector_store %arg6[%c0_177, %c1_178, %c0_179], %139 {strides = array<i32>} : memref<1x2x64xf32, #tpu.memory_space<vmem>>, vector<1x1x64xf32>,
    return
  }
  func.func @transform_0(%arg0: i32) -> (i32, i32, i32, i32) {
    %c0_i32 = arith.constant 0 : i32
    %c0_i32_0 = arith.constant 0 : i32
    %c0_i32_1 = arith.constant 0 : i32
    %c0_i32_2 = arith.constant 0 : i32
    return %c0_i32, %arg0, %c0_i32_0, %c0_i32_1 : i32, i32, i32, i32
  }
  func.func @transform_1(%arg0: i32) -> (i32, i32, i32, i32) {
    %c1_i32 = arith.constant 1 : i32
    %0 = arith.addi %arg0, %c1_i32 : i32
    %c0_i32 = arith.constant 0 : i32
    %c0_i32_0 = arith.constant 0 : i32
    %c0_i32_1 = arith.constant 0 : i32
    %c0_i32_2 = arith.constant 0 : i32
    return %c0_i32, %0, %c0_i32_0, %c0_i32_1 : i32, i32, i32, i32
  }
  func.func @transform_2(%arg0: i32) -> (i32, i32, i32, i32) {
    %c2_i32 = arith.constant 2 : i32
    %0 = arith.addi %arg0, %c2_i32 : i32
    %c0_i32 = arith.constant 0 : i32
    %c0_i32_0 = arith.constant 0 : i32
    %c0_i32_1 = arith.constant 0 : i32
    %c0_i32_2 = arith.constant 0 : i32
    return %c0_i32, %0, %c0_i32_0, %c0_i32_1 : i32, i32, i32, i32
  }
  func.func @transform_3(%arg0: i32) -> (i32, i32, i32, i32) {
    %c0_i32 = arith.constant 0 : i32
    %c0_i32_0 = arith.constant 0 : i32
    %c0_i32_1 = arith.constant 0 : i32
    %c0_i32_2 = arith.constant 0 : i32
    %c0_i32_3 = arith.constant 0 : i32
    return %c0_i32, %c0_i32_0, %c0_i32_1, %c0_i32_2 : i32, i32, i32, i32
  }
  func.func @transform_4(%arg0: i32) -> (i32, i32, i32, i32) {
    %c0_i32 = arith.constant 0 : i32
    %c0_i32_0 = arith.constant 0 : i32
    %c0_i32_1 = arith.constant 0 : i32
    %c0_i32_2 = arith.constant 0 : i32
    return %c0_i32, %arg0, %c0_i32_0, %c0_i32_1 : i32, i32, i32, i32
  }
  func.func @transform_5(%arg0: i32) -> (i32, i32, i32) {
    %c0_i32 = arith.constant 0 : i32
    %c0_i32_0 = arith.constant 0 : i32
    %c0_i32_1 = arith.constant 0 : i32
    return %arg0, %c0_i32, %c0_i32_0 : i32, i32, i32
  }
}

module attributes {stable_mosaic.version = 11 : i64} {
  func.func @_conv3x3x3_kernel(%arg0: i32, %arg1: memref<2x1x18x64xbf16, #tpu.memory_space<vmem>>, %arg2: memref<2x1x18x64xbf16, #tpu.memory_space<vmem>>, %arg3: memref<2x1x18x64xbf16, #tpu.memory_space<vmem>>, %arg4: memref<3x3x64x64xbf16, #tpu.memory_space<vmem>>, %arg5: memref<2x1x16x64xf32, #tpu.memory_space<vmem>>, %arg6: memref<1x2x64xf32, #tpu.memory_space<vmem>>) attributes {dimension_semantics = [#tpu.dimension_semantics<parallel>], iteration_bounds = array<i64: 16>, scalar_prefetch = 0 : i64, scratch_operands = 0 : i64, tpu.core_type = #tpu.core_type<tc>, window_params = [{transform_indices = @transform_0, window_bounds = array<i64: 2, 1, 18, 64>}, {transform_indices = @transform_1, window_bounds = array<i64: 2, 1, 18, 64>}, {transform_indices = @transform_2, window_bounds = array<i64: 2, 1, 18, 64>}, {pipeline_mode = #tpu.pipeline_mode<synchronous>, transform_indices = @transform_3, window_bounds = array<i64: 3, 3, 64, 64>}, {transform_indices = @transform_4, window_bounds = array<i64: 2, 1, 16, 64>}, {transform_indices = @transform_5, window_bounds = array<i64: 1, 2, 64>}]} {
    %cst = arith.constant 0.000000e+00 : f32
    %0 = vector.broadcast %cst : f32 to vector<1x64xf32>
    %cst_0 = arith.constant 0.000000e+00 : f32
    %1 = vector.broadcast %cst_0 : f32 to vector<1x64xf32>
    %cst_1 = arith.constant 0.000000e+00 : f32
    %2 = vector.broadcast %cst_1 : f32 to vector<16x64xf32>
    %c0 = arith.constant 0 : index
    %c0_2 = arith.constant 0 : index
    %c0_3 = arith.constant 0 : index
    %c0_4 = arith.constant 0 : index
    %3 = vector.load %arg1[%c0, %c0_2, %c0_3, %c0_4] : memref<2x1x18x64xbf16, #tpu.memory_space<vmem>>, vector<1x1x16x64xbf16>
    %4 = vector.shape_cast %3 : vector<1x1x16x64xbf16> to vector<16x64xbf16>
    %c0_5 = arith.constant 0 : index
    %c0_6 = arith.constant 0 : index
    %c0_7 = arith.constant 0 : index
    %c0_8 = arith.constant 0 : index
    %5 = vector.load %arg4[%c0_5, %c0_6, %c0_7, %c0_8] : memref<3x3x64x64xbf16, #tpu.memory_space<vmem>>, vector<1x1x64x64xbf16>
    %6 = vector.shape_cast %5 : vector<1x1x64x64xbf16> to vector<64x64xbf16>
    %cst_9 = arith.constant dense<0.000000e+00> : vector<16x64xf32>
    %7 = tpu.matmul %4, %6, %cst_9 {dimension_numbers = #tpu.dot_dimension_numbers<[1], [0], [0], [1], [0, 0, 1, 1], [], []>} : vector<16x64xbf16>, vector<64x64xbf16>, vector<16x64xf32> -> vector<16x64xf32>
    %8 = arith.addf %2, %7 : vector<16x64xf32>
    %c0_10 = arith.constant 0 : index
    %c0_11 = arith.constant 0 : index
    %c1 = arith.constant 1 : index
    %c0_12 = arith.constant 0 : index
    %9 = vector.load %arg1[%c0_10, %c0_11, %c1, %c0_12] : memref<2x1x18x64xbf16, #tpu.memory_space<vmem>>, vector<1x1x16x64xbf16>
    %10 = vector.shape_cast %9 : vector<1x1x16x64xbf16> to vector<16x64xbf16>
    %c0_13 = arith.constant 0 : index
    %c1_14 = arith.constant 1 : index
    %c0_15 = arith.constant 0 : index
    %c0_16 = arith.constant 0 : index
    %11 = vector.load %arg4[%c0_13, %c1_14, %c0_15, %c0_16] : memref<3x3x64x64xbf16, #tpu.memory_space<vmem>>, vector<1x1x64x64xbf16>
    %12 = vector.shape_cast %11 : vector<1x1x64x64xbf16> to vector<64x64xbf16>
    %cst_17 = arith.constant dense<0.000000e+00> : vector<16x64xf32>
    %13 = tpu.matmul %10, %12, %cst_17 {dimension_numbers = #tpu.dot_dimension_numbers<[1], [0], [0], [1], [0, 0, 1, 1], [], []>} : vector<16x64xbf16>, vector<64x64xbf16>, vector<16x64xf32> -> vector<16x64xf32>
    %14 = arith.addf %8, %13 : vector<16x64xf32>
    %c0_18 = arith.constant 0 : index
    %c0_19 = arith.constant 0 : index
    %c2 = arith.constant 2 : index
    %c0_20 = arith.constant 0 : index
    %15 = vector.load %arg1[%c0_18, %c0_19, %c2, %c0_20] : memref<2x1x18x64xbf16, #tpu.memory_space<vmem>>, vector<1x1x16x64xbf16>
    %16 = vector.shape_cast %15 : vector<1x1x16x64xbf16> to vector<16x64xbf16>
    %c0_21 = arith.constant 0 : index
    %c2_22 = arith.constant 2 : index
    %c0_23 = arith.constant 0 : index
    %c0_24 = arith.constant 0 : index
    %17 = vector.load %arg4[%c0_21, %c2_22, %c0_23, %c0_24] : memref<3x3x64x64xbf16, #tpu.memory_space<vmem>>, vector<1x1x64x64xbf16>
    %18 = vector.shape_cast %17 : vector<1x1x64x64xbf16> to vector<64x64xbf16>
    %cst_25 = arith.constant dense<0.000000e+00> : vector<16x64xf32>
    %19 = tpu.matmul %16, %18, %cst_25 {dimension_numbers = #tpu.dot_dimension_numbers<[1], [0], [0], [1], [0, 0, 1, 1], [], []>} : vector<16x64xbf16>, vector<64x64xbf16>, vector<16x64xf32> -> vector<16x64xf32>
    %20 = arith.addf %14, %19 : vector<16x64xf32>
    %c0_26 = arith.constant 0 : index
    %c0_27 = arith.constant 0 : index
    %c0_28 = arith.constant 0 : index
    %c0_29 = arith.constant 0 : index
    %21 = vector.load %arg2[%c0_26, %c0_27, %c0_28, %c0_29] : memref<2x1x18x64xbf16, #tpu.memory_space<vmem>>, vector<1x1x16x64xbf16>
    %22 = vector.shape_cast %21 : vector<1x1x16x64xbf16> to vector<16x64xbf16>
    %c1_30 = arith.constant 1 : index
    %c0_31 = arith.constant 0 : index
    %c0_32 = arith.constant 0 : index
    %c0_33 = arith.constant 0 : index
    %23 = vector.load %arg4[%c1_30, %c0_31, %c0_32, %c0_33] : memref<3x3x64x64xbf16, #tpu.memory_space<vmem>>, vector<1x1x64x64xbf16>
    %24 = vector.shape_cast %23 : vector<1x1x64x64xbf16> to vector<64x64xbf16>
    %cst_34 = arith.constant dense<0.000000e+00> : vector<16x64xf32>
    %25 = tpu.matmul %22, %24, %cst_34 {dimension_numbers = #tpu.dot_dimension_numbers<[1], [0], [0], [1], [0, 0, 1, 1], [], []>} : vector<16x64xbf16>, vector<64x64xbf16>, vector<16x64xf32> -> vector<16x64xf32>
    %26 = arith.addf %20, %25 : vector<16x64xf32>
    %c0_35 = arith.constant 0 : index
    %c0_36 = arith.constant 0 : index
    %c1_37 = arith.constant 1 : index
    %c0_38 = arith.constant 0 : index
    %27 = vector.load %arg2[%c0_35, %c0_36, %c1_37, %c0_38] : memref<2x1x18x64xbf16, #tpu.memory_space<vmem>>, vector<1x1x16x64xbf16>
    %28 = vector.shape_cast %27 : vector<1x1x16x64xbf16> to vector<16x64xbf16>
    %c1_39 = arith.constant 1 : index
    %c1_40 = arith.constant 1 : index
    %c0_41 = arith.constant 0 : index
    %c0_42 = arith.constant 0 : index
    %29 = vector.load %arg4[%c1_39, %c1_40, %c0_41, %c0_42] : memref<3x3x64x64xbf16, #tpu.memory_space<vmem>>, vector<1x1x64x64xbf16>
    %30 = vector.shape_cast %29 : vector<1x1x64x64xbf16> to vector<64x64xbf16>
    %cst_43 = arith.constant dense<0.000000e+00> : vector<16x64xf32>
    %31 = tpu.matmul %28, %30, %cst_43 {dimension_numbers = #tpu.dot_dimension_numbers<[1], [0], [0], [1], [0, 0, 1, 1], [], []>} : vector<16x64xbf16>, vector<64x64xbf16>, vector<16x64xf32> -> vector<16x64xf32>
    %32 = arith.addf %26, %31 : vector<16x64xf32>
    %c0_44 = arith.constant 0 : index
    %c0_45 = arith.constant 0 : index
    %c2_46 = arith.constant 2 : index
    %c0_47 = arith.constant 0 : index
    %33 = vector.load %arg2[%c0_44, %c0_45, %c2_46, %c0_47] : memref<2x1x18x64xbf16, #tpu.memory_space<vmem>>, vector<1x1x16x64xbf16>
    %34 = vector.shape_cast %33 : vector<1x1x16x64xbf16> to vector<16x64xbf16>
    %c1_48 = arith.constant 1 : index
    %c2_49 = arith.constant 2 : index
    %c0_50 = arith.constant 0 : index
    %c0_51 = arith.constant 0 : index
    %35 = vector.load %arg4[%c1_48, %c2_49, %c0_50, %c0_51] : memref<3x3x64x64xbf16, #tpu.memory_space<vmem>>, vector<1x1x64x64xbf16>
    %36 = vector.shape_cast %35 : vector<1x1x64x64xbf16> to vector<64x64xbf16>
    %cst_52 = arith.constant dense<0.000000e+00> : vector<16x64xf32>
    %37 = tpu.matmul %34, %36, %cst_52 {dimension_numbers = #tpu.dot_dimension_numbers<[1], [0], [0], [1], [0, 0, 1, 1], [], []>} : vector<16x64xbf16>, vector<64x64xbf16>, vector<16x64xf32> -> vector<16x64xf32>
    %38 = arith.addf %32, %37 : vector<16x64xf32>
    %c0_53 = arith.constant 0 : index
    %c0_54 = arith.constant 0 : index
    %c0_55 = arith.constant 0 : index
    %c0_56 = arith.constant 0 : index
    %39 = vector.load %arg3[%c0_53, %c0_54, %c0_55, %c0_56] : memref<2x1x18x64xbf16, #tpu.memory_space<vmem>>, vector<1x1x16x64xbf16>
    %40 = vector.shape_cast %39 : vector<1x1x16x64xbf16> to vector<16x64xbf16>
    %c2_57 = arith.constant 2 : index
    %c0_58 = arith.constant 0 : index
    %c0_59 = arith.constant 0 : index
    %c0_60 = arith.constant 0 : index
    %41 = vector.load %arg4[%c2_57, %c0_58, %c0_59, %c0_60] : memref<3x3x64x64xbf16, #tpu.memory_space<vmem>>, vector<1x1x64x64xbf16>
    %42 = vector.shape_cast %41 : vector<1x1x64x64xbf16> to vector<64x64xbf16>
    %cst_61 = arith.constant dense<0.000000e+00> : vector<16x64xf32>
    %43 = tpu.matmul %40, %42, %cst_61 {dimension_numbers = #tpu.dot_dimension_numbers<[1], [0], [0], [1], [0, 0, 1, 1], [], []>} : vector<16x64xbf16>, vector<64x64xbf16>, vector<16x64xf32> -> vector<16x64xf32>
    %44 = arith.addf %38, %43 : vector<16x64xf32>
    %c0_62 = arith.constant 0 : index
    %c0_63 = arith.constant 0 : index
    %c1_64 = arith.constant 1 : index
    %c0_65 = arith.constant 0 : index
    %45 = vector.load %arg3[%c0_62, %c0_63, %c1_64, %c0_65] : memref<2x1x18x64xbf16, #tpu.memory_space<vmem>>, vector<1x1x16x64xbf16>
    %46 = vector.shape_cast %45 : vector<1x1x16x64xbf16> to vector<16x64xbf16>
    %c2_66 = arith.constant 2 : index
    %c1_67 = arith.constant 1 : index
    %c0_68 = arith.constant 0 : index
    %c0_69 = arith.constant 0 : index
    %47 = vector.load %arg4[%c2_66, %c1_67, %c0_68, %c0_69] : memref<3x3x64x64xbf16, #tpu.memory_space<vmem>>, vector<1x1x64x64xbf16>
    %48 = vector.shape_cast %47 : vector<1x1x64x64xbf16> to vector<64x64xbf16>
    %cst_70 = arith.constant dense<0.000000e+00> : vector<16x64xf32>
    %49 = tpu.matmul %46, %48, %cst_70 {dimension_numbers = #tpu.dot_dimension_numbers<[1], [0], [0], [1], [0, 0, 1, 1], [], []>} : vector<16x64xbf16>, vector<64x64xbf16>, vector<16x64xf32> -> vector<16x64xf32>
    %50 = arith.addf %44, %49 : vector<16x64xf32>
    %c0_71 = arith.constant 0 : index
    %c0_72 = arith.constant 0 : index
    %c2_73 = arith.constant 2 : index
    %c0_74 = arith.constant 0 : index
    %51 = vector.load %arg3[%c0_71, %c0_72, %c2_73, %c0_74] : memref<2x1x18x64xbf16, #tpu.memory_space<vmem>>, vector<1x1x16x64xbf16>
    %52 = vector.shape_cast %51 : vector<1x1x16x64xbf16> to vector<16x64xbf16>
    %c2_75 = arith.constant 2 : index
    %c2_76 = arith.constant 2 : index
    %c0_77 = arith.constant 0 : index
    %c0_78 = arith.constant 0 : index
    %53 = vector.load %arg4[%c2_75, %c2_76, %c0_77, %c0_78] : memref<3x3x64x64xbf16, #tpu.memory_space<vmem>>, vector<1x1x64x64xbf16>
    %54 = vector.shape_cast %53 : vector<1x1x64x64xbf16> to vector<64x64xbf16>
    %cst_79 = arith.constant dense<0.000000e+00> : vector<16x64xf32>
    %55 = tpu.matmul %52, %54, %cst_79 {dimension_numbers = #tpu.dot_dimension_numbers<[1], [0], [0], [1], [0, 0, 1, 1], [], []>} : vector<16x64xbf16>, vector<64x64xbf16>, vector<16x64xf32> -> vector<16x64xf32>
    %56 = arith.addf %50, %55 : vector<16x64xf32>
    %c0_80 = arith.constant 0 : index
    %c0_81 = arith.constant 0 : index
    %c0_82 = arith.constant 0 : index
    %c0_83 = arith.constant 0 : index
    %57 = vector.load %arg5[%c0_80, %c0_81, %c0_82, %c0_83] : memref<2x1x16x64xf32, #tpu.memory_space<vmem>>, vector<1x1x16x64xf32>
    %58 = vector.shape_cast %57 : vector<1x1x16x64xf32> to vector<16x64xf32>
    %59 = vector.shape_cast %56 : vector<16x64xf32> to vector<1x1x16x64xf32>
    tpu.vector_store %arg5[%c0_80, %c0_81, %c0_82, %c0_83], %59 {strides = array<i32>} : memref<2x1x16x64xf32, #tpu.memory_space<vmem>>, vector<1x1x16x64xf32>,
    %cst_84 = arith.constant dense<0.000000e+00> : vector<64xf32>
    %60 = vector.multi_reduction <add>, %56, %cst_84 [0] : vector<16x64xf32> to vector<64xf32>
    %61 = vector.shape_cast %60 : vector<64xf32> to vector<1x64xf32>
    %62 = arith.addf %0, %61 : vector<1x64xf32>
    %63 = arith.mulf %56, %56 : vector<16x64xf32>
    %cst_85 = arith.constant dense<0.000000e+00> : vector<64xf32>
    %64 = vector.multi_reduction <add>, %63, %cst_85 [0] : vector<16x64xf32> to vector<64xf32>
    %65 = vector.shape_cast %64 : vector<64xf32> to vector<1x64xf32>
    %66 = arith.addf %1, %65 : vector<1x64xf32>
    %cst_86 = arith.constant 0.000000e+00 : f32
    %67 = vector.broadcast %cst_86 : f32 to vector<16x64xf32>
    %c1_87 = arith.constant 1 : index
    %c0_88 = arith.constant 0 : index
    %c0_89 = arith.constant 0 : index
    %c0_90 = arith.constant 0 : index
    %68 = vector.load %arg1[%c1_87, %c0_88, %c0_89, %c0_90] : memref<2x1x18x64xbf16, #tpu.memory_space<vmem>>, vector<1x1x16x64xbf16>
    %69 = vector.shape_cast %68 : vector<1x1x16x64xbf16> to vector<16x64xbf16>
    %c0_91 = arith.constant 0 : index
    %c0_92 = arith.constant 0 : index
    %c0_93 = arith.constant 0 : index
    %c0_94 = arith.constant 0 : index
    %70 = vector.load %arg4[%c0_91, %c0_92, %c0_93, %c0_94] : memref<3x3x64x64xbf16, #tpu.memory_space<vmem>>, vector<1x1x64x64xbf16>
    %71 = vector.shape_cast %70 : vector<1x1x64x64xbf16> to vector<64x64xbf16>
    %cst_95 = arith.constant dense<0.000000e+00> : vector<16x64xf32>
    %72 = tpu.matmul %69, %71, %cst_95 {dimension_numbers = #tpu.dot_dimension_numbers<[1], [0], [0], [1], [0, 0, 1, 1], [], []>} : vector<16x64xbf16>, vector<64x64xbf16>, vector<16x64xf32> -> vector<16x64xf32>
    %73 = arith.addf %67, %72 : vector<16x64xf32>
    %c1_96 = arith.constant 1 : index
    %c0_97 = arith.constant 0 : index
    %c1_98 = arith.constant 1 : index
    %c0_99 = arith.constant 0 : index
    %74 = vector.load %arg1[%c1_96, %c0_97, %c1_98, %c0_99] : memref<2x1x18x64xbf16, #tpu.memory_space<vmem>>, vector<1x1x16x64xbf16>
    %75 = vector.shape_cast %74 : vector<1x1x16x64xbf16> to vector<16x64xbf16>
    %c0_100 = arith.constant 0 : index
    %c1_101 = arith.constant 1 : index
    %c0_102 = arith.constant 0 : index
    %c0_103 = arith.constant 0 : index
    %76 = vector.load %arg4[%c0_100, %c1_101, %c0_102, %c0_103] : memref<3x3x64x64xbf16, #tpu.memory_space<vmem>>, vector<1x1x64x64xbf16>
    %77 = vector.shape_cast %76 : vector<1x1x64x64xbf16> to vector<64x64xbf16>
    %cst_104 = arith.constant dense<0.000000e+00> : vector<16x64xf32>
    %78 = tpu.matmul %75, %77, %cst_104 {dimension_numbers = #tpu.dot_dimension_numbers<[1], [0], [0], [1], [0, 0, 1, 1], [], []>} : vector<16x64xbf16>, vector<64x64xbf16>, vector<16x64xf32> -> vector<16x64xf32>
    %79 = arith.addf %73, %78 : vector<16x64xf32>
    %c1_105 = arith.constant 1 : index
    %c0_106 = arith.constant 0 : index
    %c2_107 = arith.constant 2 : index
    %c0_108 = arith.constant 0 : index
    %80 = vector.load %arg1[%c1_105, %c0_106, %c2_107, %c0_108] : memref<2x1x18x64xbf16, #tpu.memory_space<vmem>>, vector<1x1x16x64xbf16>
    %81 = vector.shape_cast %80 : vector<1x1x16x64xbf16> to vector<16x64xbf16>
    %c0_109 = arith.constant 0 : index
    %c2_110 = arith.constant 2 : index
    %c0_111 = arith.constant 0 : index
    %c0_112 = arith.constant 0 : index
    %82 = vector.load %arg4[%c0_109, %c2_110, %c0_111, %c0_112] : memref<3x3x64x64xbf16, #tpu.memory_space<vmem>>, vector<1x1x64x64xbf16>
    %83 = vector.shape_cast %82 : vector<1x1x64x64xbf16> to vector<64x64xbf16>
    %cst_113 = arith.constant dense<0.000000e+00> : vector<16x64xf32>
    %84 = tpu.matmul %81, %83, %cst_113 {dimension_numbers = #tpu.dot_dimension_numbers<[1], [0], [0], [1], [0, 0, 1, 1], [], []>} : vector<16x64xbf16>, vector<64x64xbf16>, vector<16x64xf32> -> vector<16x64xf32>
    %85 = arith.addf %79, %84 : vector<16x64xf32>
    %c1_114 = arith.constant 1 : index
    %c0_115 = arith.constant 0 : index
    %c0_116 = arith.constant 0 : index
    %c0_117 = arith.constant 0 : index
    %86 = vector.load %arg2[%c1_114, %c0_115, %c0_116, %c0_117] : memref<2x1x18x64xbf16, #tpu.memory_space<vmem>>, vector<1x1x16x64xbf16>
    %87 = vector.shape_cast %86 : vector<1x1x16x64xbf16> to vector<16x64xbf16>
    %c1_118 = arith.constant 1 : index
    %c0_119 = arith.constant 0 : index
    %c0_120 = arith.constant 0 : index
    %c0_121 = arith.constant 0 : index
    %88 = vector.load %arg4[%c1_118, %c0_119, %c0_120, %c0_121] : memref<3x3x64x64xbf16, #tpu.memory_space<vmem>>, vector<1x1x64x64xbf16>
    %89 = vector.shape_cast %88 : vector<1x1x64x64xbf16> to vector<64x64xbf16>
    %cst_122 = arith.constant dense<0.000000e+00> : vector<16x64xf32>
    %90 = tpu.matmul %87, %89, %cst_122 {dimension_numbers = #tpu.dot_dimension_numbers<[1], [0], [0], [1], [0, 0, 1, 1], [], []>} : vector<16x64xbf16>, vector<64x64xbf16>, vector<16x64xf32> -> vector<16x64xf32>
    %91 = arith.addf %85, %90 : vector<16x64xf32>
    %c1_123 = arith.constant 1 : index
    %c0_124 = arith.constant 0 : index
    %c1_125 = arith.constant 1 : index
    %c0_126 = arith.constant 0 : index
    %92 = vector.load %arg2[%c1_123, %c0_124, %c1_125, %c0_126] : memref<2x1x18x64xbf16, #tpu.memory_space<vmem>>, vector<1x1x16x64xbf16>
    %93 = vector.shape_cast %92 : vector<1x1x16x64xbf16> to vector<16x64xbf16>
    %c1_127 = arith.constant 1 : index
    %c1_128 = arith.constant 1 : index
    %c0_129 = arith.constant 0 : index
    %c0_130 = arith.constant 0 : index
    %94 = vector.load %arg4[%c1_127, %c1_128, %c0_129, %c0_130] : memref<3x3x64x64xbf16, #tpu.memory_space<vmem>>, vector<1x1x64x64xbf16>
    %95 = vector.shape_cast %94 : vector<1x1x64x64xbf16> to vector<64x64xbf16>
    %cst_131 = arith.constant dense<0.000000e+00> : vector<16x64xf32>
    %96 = tpu.matmul %93, %95, %cst_131 {dimension_numbers = #tpu.dot_dimension_numbers<[1], [0], [0], [1], [0, 0, 1, 1], [], []>} : vector<16x64xbf16>, vector<64x64xbf16>, vector<16x64xf32> -> vector<16x64xf32>
    %97 = arith.addf %91, %96 : vector<16x64xf32>
    %c1_132 = arith.constant 1 : index
    %c0_133 = arith.constant 0 : index
    %c2_134 = arith.constant 2 : index
    %c0_135 = arith.constant 0 : index
    %98 = vector.load %arg2[%c1_132, %c0_133, %c2_134, %c0_135] : memref<2x1x18x64xbf16, #tpu.memory_space<vmem>>, vector<1x1x16x64xbf16>
    %99 = vector.shape_cast %98 : vector<1x1x16x64xbf16> to vector<16x64xbf16>
    %c1_136 = arith.constant 1 : index
    %c2_137 = arith.constant 2 : index
    %c0_138 = arith.constant 0 : index
    %c0_139 = arith.constant 0 : index
    %100 = vector.load %arg4[%c1_136, %c2_137, %c0_138, %c0_139] : memref<3x3x64x64xbf16, #tpu.memory_space<vmem>>, vector<1x1x64x64xbf16>
    %101 = vector.shape_cast %100 : vector<1x1x64x64xbf16> to vector<64x64xbf16>
    %cst_140 = arith.constant dense<0.000000e+00> : vector<16x64xf32>
    %102 = tpu.matmul %99, %101, %cst_140 {dimension_numbers = #tpu.dot_dimension_numbers<[1], [0], [0], [1], [0, 0, 1, 1], [], []>} : vector<16x64xbf16>, vector<64x64xbf16>, vector<16x64xf32> -> vector<16x64xf32>
    %103 = arith.addf %97, %102 : vector<16x64xf32>
    %c1_141 = arith.constant 1 : index
    %c0_142 = arith.constant 0 : index
    %c0_143 = arith.constant 0 : index
    %c0_144 = arith.constant 0 : index
    %104 = vector.load %arg3[%c1_141, %c0_142, %c0_143, %c0_144] : memref<2x1x18x64xbf16, #tpu.memory_space<vmem>>, vector<1x1x16x64xbf16>
    %105 = vector.shape_cast %104 : vector<1x1x16x64xbf16> to vector<16x64xbf16>
    %c2_145 = arith.constant 2 : index
    %c0_146 = arith.constant 0 : index
    %c0_147 = arith.constant 0 : index
    %c0_148 = arith.constant 0 : index
    %106 = vector.load %arg4[%c2_145, %c0_146, %c0_147, %c0_148] : memref<3x3x64x64xbf16, #tpu.memory_space<vmem>>, vector<1x1x64x64xbf16>
    %107 = vector.shape_cast %106 : vector<1x1x64x64xbf16> to vector<64x64xbf16>
    %cst_149 = arith.constant dense<0.000000e+00> : vector<16x64xf32>
    %108 = tpu.matmul %105, %107, %cst_149 {dimension_numbers = #tpu.dot_dimension_numbers<[1], [0], [0], [1], [0, 0, 1, 1], [], []>} : vector<16x64xbf16>, vector<64x64xbf16>, vector<16x64xf32> -> vector<16x64xf32>
    %109 = arith.addf %103, %108 : vector<16x64xf32>
    %c1_150 = arith.constant 1 : index
    %c0_151 = arith.constant 0 : index
    %c1_152 = arith.constant 1 : index
    %c0_153 = arith.constant 0 : index
    %110 = vector.load %arg3[%c1_150, %c0_151, %c1_152, %c0_153] : memref<2x1x18x64xbf16, #tpu.memory_space<vmem>>, vector<1x1x16x64xbf16>
    %111 = vector.shape_cast %110 : vector<1x1x16x64xbf16> to vector<16x64xbf16>
    %c2_154 = arith.constant 2 : index
    %c1_155 = arith.constant 1 : index
    %c0_156 = arith.constant 0 : index
    %c0_157 = arith.constant 0 : index
    %112 = vector.load %arg4[%c2_154, %c1_155, %c0_156, %c0_157] : memref<3x3x64x64xbf16, #tpu.memory_space<vmem>>, vector<1x1x64x64xbf16>
    %113 = vector.shape_cast %112 : vector<1x1x64x64xbf16> to vector<64x64xbf16>
    %cst_158 = arith.constant dense<0.000000e+00> : vector<16x64xf32>
    %114 = tpu.matmul %111, %113, %cst_158 {dimension_numbers = #tpu.dot_dimension_numbers<[1], [0], [0], [1], [0, 0, 1, 1], [], []>} : vector<16x64xbf16>, vector<64x64xbf16>, vector<16x64xf32> -> vector<16x64xf32>
    %115 = arith.addf %109, %114 : vector<16x64xf32>
    %c1_159 = arith.constant 1 : index
    %c0_160 = arith.constant 0 : index
    %c2_161 = arith.constant 2 : index
    %c0_162 = arith.constant 0 : index
    %116 = vector.load %arg3[%c1_159, %c0_160, %c2_161, %c0_162] : memref<2x1x18x64xbf16, #tpu.memory_space<vmem>>, vector<1x1x16x64xbf16>
    %117 = vector.shape_cast %116 : vector<1x1x16x64xbf16> to vector<16x64xbf16>
    %c2_163 = arith.constant 2 : index
    %c2_164 = arith.constant 2 : index
    %c0_165 = arith.constant 0 : index
    %c0_166 = arith.constant 0 : index
    %118 = vector.load %arg4[%c2_163, %c2_164, %c0_165, %c0_166] : memref<3x3x64x64xbf16, #tpu.memory_space<vmem>>, vector<1x1x64x64xbf16>
    %119 = vector.shape_cast %118 : vector<1x1x64x64xbf16> to vector<64x64xbf16>
    %cst_167 = arith.constant dense<0.000000e+00> : vector<16x64xf32>
    %120 = tpu.matmul %117, %119, %cst_167 {dimension_numbers = #tpu.dot_dimension_numbers<[1], [0], [0], [1], [0, 0, 1, 1], [], []>} : vector<16x64xbf16>, vector<64x64xbf16>, vector<16x64xf32> -> vector<16x64xf32>
    %121 = arith.addf %115, %120 : vector<16x64xf32>
    %c1_168 = arith.constant 1 : index
    %c0_169 = arith.constant 0 : index
    %c0_170 = arith.constant 0 : index
    %c0_171 = arith.constant 0 : index
    %122 = vector.load %arg5[%c1_168, %c0_169, %c0_170, %c0_171] : memref<2x1x16x64xf32, #tpu.memory_space<vmem>>, vector<1x1x16x64xf32>
    %123 = vector.shape_cast %122 : vector<1x1x16x64xf32> to vector<16x64xf32>
    %124 = vector.shape_cast %121 : vector<16x64xf32> to vector<1x1x16x64xf32>
    tpu.vector_store %arg5[%c1_168, %c0_169, %c0_170, %c0_171], %124 {strides = array<i32>} : memref<2x1x16x64xf32, #tpu.memory_space<vmem>>, vector<1x1x16x64xf32>,
    %cst_172 = arith.constant dense<0.000000e+00> : vector<64xf32>
    %125 = vector.multi_reduction <add>, %121, %cst_172 [0] : vector<16x64xf32> to vector<64xf32>
    %126 = vector.shape_cast %125 : vector<64xf32> to vector<1x64xf32>
    %127 = arith.addf %62, %126 : vector<1x64xf32>
    %128 = arith.mulf %121, %121 : vector<16x64xf32>
    %cst_173 = arith.constant dense<0.000000e+00> : vector<64xf32>
    %129 = vector.multi_reduction <add>, %128, %cst_173 [0] : vector<16x64xf32> to vector<64xf32>
    %130 = vector.shape_cast %129 : vector<64xf32> to vector<1x64xf32>
    %131 = arith.addf %66, %130 : vector<1x64xf32>
    %c0_174 = arith.constant 0 : index
    %c0_175 = arith.constant 0 : index
    %c0_176 = arith.constant 0 : index
    %132 = vector.load %arg6[%c0_174, %c0_175, %c0_176] : memref<1x2x64xf32, #tpu.memory_space<vmem>>, vector<1x1x64xf32>
    %133 = vector.shape_cast %132 : vector<1x1x64xf32> to vector<1x64xf32>
    %134 = vector.shape_cast %127 : vector<1x64xf32> to vector<1x1x64xf32>
    tpu.vector_store %arg6[%c0_174, %c0_175, %c0_176], %134 {strides = array<i32>} : memref<1x2x64xf32, #tpu.memory_space<vmem>>, vector<1x1x64xf32>,
    %c0_177 = arith.constant 0 : index
    %c1_178 = arith.constant 1 : index
    %c0_179 = arith.constant 0 : index
    %135 = vector.load %arg6[%c0_177, %c1_178, %c0_179] : memref<1x2x64xf32, #tpu.memory_space<vmem>>, vector<1x1x64xf32>
    %136 = vector.shape_cast %135 : vector<1x1x64xf32> to vector<1x64xf32>
    %137 = vector.shape_cast %131 : vector<1x64xf32> to vector<1x1x64xf32>
    tpu.vector_store %arg6[%c0_177, %c1_178, %c0_179], %137 {strides = array<i32>} : memref<1x2x64xf32, #tpu.memory_space<vmem>>, vector<1x1x64xf32>,
    return
  }
  func.func @transform_0(%arg0: i32) -> (i32, i32, i32, i32) {
    %c0_i32 = arith.constant 0 : i32
    %c0_i32_0 = arith.constant 0 : i32
    %c0_i32_1 = arith.constant 0 : i32
    %c0_i32_2 = arith.constant 0 : i32
    return %c0_i32, %arg0, %c0_i32_0, %c0_i32_1 : i32, i32, i32, i32
  }
  func.func @transform_1(%arg0: i32) -> (i32, i32, i32, i32) {
    %c1_i32 = arith.constant 1 : i32
    %0 = arith.addi %arg0, %c1_i32 : i32
    %c0_i32 = arith.constant 0 : i32
    %c0_i32_0 = arith.constant 0 : i32
    %c0_i32_1 = arith.constant 0 : i32
    %c0_i32_2 = arith.constant 0 : i32
    return %c0_i32, %0, %c0_i32_0, %c0_i32_1 : i32, i32, i32, i32
  }
  func.func @transform_2(%arg0: i32) -> (i32, i32, i32, i32) {
    %c2_i32 = arith.constant 2 : i32
    %0 = arith.addi %arg0, %c2_i32 : i32
    %c0_i32 = arith.constant 0 : i32
    %c0_i32_0 = arith.constant 0 : i32
    %c0_i32_1 = arith.constant 0 : i32
    %c0_i32_2 = arith.constant 0 : i32
    return %c0_i32, %0, %c0_i32_0, %c0_i32_1 : i32, i32, i32, i32
  }
  func.func @transform_3(%arg0: i32) -> (i32, i32, i32, i32) {
    %c0_i32 = arith.constant 0 : i32
    %c0_i32_0 = arith.constant 0 : i32
    %c0_i32_1 = arith.constant 0 : i32
    %c0_i32_2 = arith.constant 0 : i32
    %c0_i32_3 = arith.constant 0 : i32
    return %c0_i32, %c0_i32_0, %c0_i32_1, %c0_i32_2 : i32, i32, i32, i32
  }
  func.func @transform_4(%arg0: i32) -> (i32, i32, i32, i32) {
    %c0_i32 = arith.constant 0 : i32
    %c0_i32_0 = arith.constant 0 : i32
    %c0_i32_1 = arith.constant 0 : i32
    %c0_i32_2 = arith.constant 0 : i32
    return %c0_i32, %arg0, %c0_i32_0, %c0_i32_1 : i32, i32, i32, i32
  }
  func.func @transform_5(%arg0: i32) -> (i32, i32, i32) {
    %c0_i32 = arith.constant 0 : i32
    %c0_i32_0 = arith.constant 0 : i32
    %c0_i32_1 = arith.constant 0 : i32
    return %arg0, %c0_i32, %c0_i32_0 : i32, i32, i32
  }
}

</mosaic_0001>

<bundles_post_ra>
// kernel: decoding_conv_block_elu.3
= control target key start
LH: loop header
LB: loop body
LE: loop exit
PB: predicated region body
PF: predicated region fallthrough
CT: control target
= control target key end

     0   :  { %v622_v1 = vmov 0   ;;  %vm118_vm0 = vcmask 523264   ;;  %s832_s1 = inlined_call_operand.vmem [shape: bf16[64,256], index: 1, kind: input, shape index: {}]   ;;  %s833_s0 = inlined_call_operand.vmem [shape: bf16[128,64], index: 0, kind: input, shape index: {}]   ;;  %s834_s2 = inlined_call_operand.vmem [shape: bf16[128,256], index: 2, kind: output, shape index: {0}]   ;;  %s835_s3 = inlined_call_operand.vmem [shape: f32[1,2,256], index: 3, kind: output, shape index: {1}]  }
   0x1   :  { %v602_v0 = vld [vmem:[%s832_s1 + $0x4] ss:$8 sps:$4 sm:$0xff]   ;;  %175 = vmatprep.mubr.bf16.mxu0 %v622_v1  ;;  %215 = vmatprep.mubr.bf16.mxu1 %v622_v1  ;;  %v604_v2 = vld [vmem:[%s832_s1] ss:$8 sps:$4 sm:$0xff]   ;;  %v605_v3 = vld [vmem:[%s832_s1 + $0x14] ss:$8 sps:$4 sm:$0xff]  }
   0x2   :  { %143 = vmatprep.subr.bf16.mxu0 %v602_v0  ;;  %592 = vmatprep.subr.bf16.mxu1 %v602_v0  ;;  %v607_v4 = vld [vmem:[%s832_s1 + $0x10] ss:$8 sps:$4 sm:$0xff]   ;;  %v608_v5 = vld [vmem:[%s832_s1 + $0x24] ss:$8 sps:$4 sm:$0xff]   ;;  %v610_v6 = vld [vmem:[%s832_s1 + $0x20] ss:$8 sps:$4 sm:$0xff]  }
   0x3   :  { %144 = vmatpush1.bf16.msra.mxu0 %v604_v2  ;;  %596 = vmatpush1.bf16.msra.mxu1 %v604_v2  ;;  %v611_v7 = vld [vmem:[%s832_s1 + $0x34] ss:$8 sps:$4 sm:$0xff]   ;;  %v613_v8 = vld [vmem:[%s832_s1 + $0x30] ss:$8 sps:$4 sm:$0xff]   ;;  %v614_v9 = vld [vmem:[%s833_s0] sm:$0xff]  }
   0x4   :  { %145 = vmatprep.subr.bf16.mxu0 %v605_v3  ;;  %593 = vmatprep.subr.bf16.mxu1 %v605_v3  ;;  %v616_v10 = vld [vmem:[%s833_s0 + $0x20] sm:$0xff]   ;;  %v615_v11 = vld [vmem:[%s833_s0 + $0x8] sm:$0xff]   ;;  %v617_v13 = vld [vmem:[%s833_s0 + $0x10] sm:$0xff]  }
   0x5   :  { %v618_v12 = vld [vmem:[%s833_s0 + $0x28] sm:$0xff]   ;;  %v620_v14 = vld [vmem:[%s833_s0 + $0x30] sm:$0xff]   ;;  %v619_v15 = vld [vmem:[%s833_s0 + $0x18] sm:$0xff]  }
   0x6   :  { %v621_v16 = vld [vmem:[%s833_s0 + $0x38] sm:$0xff]  }
   0x7   :  { %146 = vmatpush1.bf16.msra.mxu0 %v607_v4  ;;  %597 = vmatpush1.bf16.msra.mxu1 %v607_v4 }
   0x8   :  { %147 = vmatprep.subr.bf16.mxu0 %v608_v5  ;;  %594 = vmatprep.subr.bf16.mxu1 %v608_v5 }
   0xb   :  { %148 = vmatpush1.bf16.msra.mxu0 %v610_v6  ;;  %598 = vmatpush1.bf16.msra.mxu1 %v610_v6 }
   0xc   :  { %149 = vmatprep.subr.bf16.mxu0 %v611_v7  ;;  %595 = vmatprep.subr.bf16.mxu1 %v611_v7 }
   0xf   :  { %150 = vmatpush1.bf16.msra.mxu0 %v613_v8  ;;  %599 = vmatpush1.bf16.msra.mxu1 %v613_v8 }
  0x12   :  { %551 = vmatmul.mubr.msk.bf16.vlgmr.msra.gmra.mrb[0].mxu0 %vm118_vm0, %v614_v9  ;;  %555 = vmatmul.mubr.msk.bf16.vlgmr.msra.gmra.mrb[0].mxu1 %vm118_vm0, %v616_v10 }
  0x13   :  { %185 = vmatprep.mubr.bf16.mxu0 %v622_v1  ;;  %225 = vmatprep.mubr.bf16.mxu1 %v622_v1 }
  0x1a   :  { %552 = vmatmul.mubr.msk.bf16.gmra.mrb[4].mxu0 %vm118_vm0, %v615_v11  ;;  %556 = vmatmul.mubr.msk.bf16.gmra.mrb[4].mxu1 %vm118_vm0, %v618_v12 }
  0x1b   :  { %195 = vmatprep.mubr.bf16.mxu0 %v622_v1  ;;  %235 = vmatprep.mubr.bf16.mxu1 %v622_v1 }
  0x22   :  { %553 = vmatmul.mubr.msk.bf16.gmra.mrb[8].mxu0 %vm118_vm0, %v617_v13  ;;  %557 = vmatmul.mubr.msk.bf16.gmra.mrb[8].mxu1 %vm118_vm0, %v620_v14 }
  0x23   :  { %205 = vmatprep.mubr.bf16.mxu0 %v622_v1  ;;  %245 = vmatprep.mubr.bf16.mxu1 %v622_v1 }
  0x2a   :  { %554 = vmatmul.mubr.msk.bf16.gmra.mrb[12].mxu0 %vm118_vm0, %v619_v15  ;;  %558 = vmatmul.mubr.msk.bf16.gmra.mrb[12].mxu1 %vm118_vm0, %v621_v16 }
  0xe5   :  { %v177_v17 = vpop.f32.mrb[0].mxu0  ;;  %v700_v18 = vpop.f32.mrb[0].mxu1 }
  0xe6   :  { %v179_v19 = vpop.f32.mrb[1].mxu0  ;;  %v702_v20 = vpop.f32.mrb[1].mxu1  ;;  %v433_v25 = vmul.f32 %v177_v17, %v177_v17 }
  0xe7   :  { %v576_v21 = vpack.c.bf16 %v179_v19, %v177_v17  ;;  %v181_v22 = vpop.f32.mrb[2].mxu0  ;;  %v584_v23 = vpack.c.bf16 %v702_v20, %v700_v18  ;;  %v706_v24 = vpop.f32.mrb[2].mxu1  ;;  %v434_v26 = vmul.f32 %v179_v19, %v179_v19 }
  0xe8   :  { %v368_v27 = vadd.f32 %v181_v22, %v177_v17  ;;  %v435_v28 = vmul.f32 %v181_v22, %v181_v22  ;;  %v183_v29 = vpop.f32.mrb[3].mxu0  ;;  %v708_v30 = vpop.f32.mrb[3].mxu1 }
  0xe9   :  { %352 = vst [vmem:[%s834_s2] sm:$0xff] %v576_v21  ;;  %v577_v31 = vpack.c.bf16 %v183_v29, %v181_v22  ;;  %v389_v32 = vadd.f32 %v183_v29, %v179_v19  ;;  %v436_v33 = vmul.f32 %v183_v29, %v183_v29  ;;  %360 = vst [vmem:[%s834_s2 + $0x40] sm:$0xff] %v584_v23 }
  0xea   :  { %v585_v34 = vpack.c.bf16 %v708_v30, %v706_v24  ;;  %v465_v35 = vadd.f32 %v435_v28, %v433_v25 }
  0xeb   :  { %353 = vst [vmem:[%s834_s2 + $0x8] sm:$0xff] %v577_v31  ;;  %v486_v36 = vadd.f32 %v436_v33, %v434_v26 }
  0xec   :  { %361 = vst [vmem:[%s834_s2 + $0x48] sm:$0xff] %v585_v34 }
  0xed   :  { %v187_v37 = vpop.f32.mrb[4].mxu0  ;;  %v724_v38 = vpop.f32.mrb[4].mxu1 }
  0xee   :  { %v369_v39 = vadd.f32 %v368_v27, %v187_v37  ;;  %v437_v40 = vmul.f32 %v187_v37, %v187_v37  ;;  %v189_v41 = vpop.f32.mrb[5].mxu0  ;;  %v726_v42 = vpop.f32.mrb[5].mxu1 }
  0xef   :  { %v578_v43 = vpack.c.bf16 %v189_v41, %v187_v37  ;;  %v390_v44 = vadd.f32 %v389_v32, %v189_v41  ;;  %v438_v45 = vmul.f32 %v189_v41, %v189_v41  ;;  %v191_v46 = vpop.f32.mrb[6].mxu0  ;;  %v586_v47 = vpack.c.bf16 %v726_v42, %v724_v38  ;;  %v730_v48 = vpop.f32.mrb[6].mxu1 }
  0xf0   :  { %v466_v49 = vadd.f32 %v465_v35, %v437_v40  ;;  %v370_v50 = vadd.f32 %v369_v39, %v191_v46  ;;  %v439_v51 = vmul.f32 %v191_v46, %v191_v46  ;;  %v193_v52 = vpop.f32.mrb[7].mxu0  ;;  %v732_v53 = vpop.f32.mrb[7].mxu1 }
  0xf1   :  { %354 = vst [vmem:[%s834_s2 + $0x10] sm:$0xff] %v578_v43  ;;  %v487_v54 = vadd.f32 %v486_v36, %v438_v45  ;;  %v579_v55 = vpack.c.bf16 %v193_v52, %v191_v46  ;;  %v391_v56 = vadd.f32 %v390_v44, %v193_v52  ;;  %v440_v57 = vmul.f32 %v193_v52, %v193_v52 }
  0xf2   :  { %362 = vst [vmem:[%s834_s2 + $0x50] sm:$0xff] %v586_v47  ;;  %v467_v58 = vadd.f32 %v466_v49, %v439_v51  ;;  %v587_v59 = vpack.c.bf16 %v732_v53, %v730_v48  ;;  %v449_v49 = vmul.f32 %v700_v18, %v700_v18 }
  0xf3   :  { %355 = vst [vmem:[%s834_s2 + $0x18] sm:$0xff] %v579_v55  ;;  %v488_v60 = vadd.f32 %v487_v54, %v440_v57  ;;  %v450_v54 = vmul.f32 %v702_v20, %v702_v20  ;;  %v451_v57 = vmul.f32 %v706_v24, %v706_v24 }
  0xf4   :  { %363 = vst [vmem:[%s834_s2 + $0x58] sm:$0xff] %v587_v59 }
  0xf5   :  { %v197_v61 = vpop.f32.mrb[8].mxu0  ;;  %v748_v62 = vpop.f32.mrb[8].mxu1 }
  0xf6   :  { %v371_v63 = vadd.f32 %v370_v50, %v197_v61  ;;  %v441_v0 = vmul.f32 %v197_v61, %v197_v61  ;;  %v199_v1 = vpop.f32.mrb[9].mxu0  ;;  %v750_v2 = vpop.f32.mrb[9].mxu1 }
  0xf7   :  { %v580_v3 = vpack.c.bf16 %v199_v1, %v197_v61  ;;  %v392_v4 = vadd.f32 %v391_v56, %v199_v1  ;;  %v442_v5 = vmul.f32 %v199_v1, %v199_v1  ;;  %v201_v6 = vpop.f32.mrb[10].mxu0  ;;  %v588_v7 = vpack.c.bf16 %v750_v2, %v748_v62  ;;  %v754_v8 = vpop.f32.mrb[10].mxu1 }
  0xf8   :  { %v468_v9 = vadd.f32 %v467_v58, %v441_v0  ;;  %v372_v10 = vadd.f32 %v371_v63, %v201_v6  ;;  %v443_v11 = vmul.f32 %v201_v6, %v201_v6  ;;  %v203_v12 = vpop.f32.mrb[11].mxu0  ;;  %v756_v13 = vpop.f32.mrb[11].mxu1 }
  0xf9   :  { %356 = vst [vmem:[%s834_s2 + $0x20] sm:$0xff] %v580_v3  ;;  %v489_v14 = vadd.f32 %v488_v60, %v442_v5  ;;  %v581_v15 = vpack.c.bf16 %v203_v12, %v201_v6  ;;  %v393_v16 = vadd.f32 %v392_v4, %v203_v12  ;;  %v444_v17 = vmul.f32 %v203_v12, %v203_v12 }
  0xfa   :  { %364 = vst [vmem:[%s834_s2 + $0x60] sm:$0xff] %v588_v7  ;;  %v469_v19 = vadd.f32 %v468_v9, %v443_v11  ;;  %v589_v21 = vpack.c.bf16 %v756_v13, %v754_v8  ;;  %v455_v4 = vmul.f32 %v730_v48, %v730_v48  ;;  %v458_v12 = vmul.f32 %v750_v2, %v750_v2 }
  0xfb   :  { %357 = vst [vmem:[%s834_s2 + $0x28] sm:$0xff] %v581_v15  ;;  %v490_v22 = vadd.f32 %v489_v14, %v444_v17 }
  0xfc   :  { %365 = vst [vmem:[%s834_s2 + $0x68] sm:$0xff] %v589_v21 }
  0xfd   :  { %v207_v23 = vpop.f32.mrb[12].mxu0  ;;  %v772_v25 = vpop.f32.mrb[12].mxu1 }
  0xfe   :  { %v373_v26 = vadd.f32 %v372_v10, %v207_v23  ;;  %v445_v27 = vmul.f32 %v207_v23, %v207_v23  ;;  %v209_v28 = vpop.f32.mrb[13].mxu0  ;;  %v249_v29 = vpop.f32.mrb[13].mxu1  ;;  %v457_v10 = vmul.f32 %v748_v62, %v748_v62 }
  0xff   :  { %v582_v31 = vpack.c.bf16 %v209_v28, %v207_v23  ;;  %v394_v32 = vadd.f32 %v393_v16, %v209_v28  ;;  %v446_v33 = vmul.f32 %v209_v28, %v209_v28  ;;  %v211_v34 = vpop.f32.mrb[14].mxu0  ;;  %v590_v35 = vpack.c.bf16 %v249_v29, %v772_v25  ;;  %v251_v36 = vpop.f32.mrb[14].mxu1 }
 0x100   :  { %v470_v37 = vadd.f32 %v469_v19, %v445_v27  ;;  %v374_v39 = vadd.f32 %v373_v26, %v211_v34  ;;  %v447_v40 = vmul.f32 %v211_v34, %v211_v34  ;;  %v213_v41 = vpop.f32.mrb[15].mxu0  ;;  %v253_v43 = vpop.f32.mrb[15].mxu1  ;;  %v459_v16 = vmul.f32 %v754_v8, %v754_v8 }
 0x101   :  { %358 = vst [vmem:[%s834_s2 + $0x30] sm:$0xff] %v582_v31  ;;  %v491_v44 = vadd.f32 %v490_v22, %v446_v33  ;;  %v583_v45 = vpack.c.bf16 %v213_v41, %v211_v34  ;;  %v395_v46 = vadd.f32 %v394_v32, %v213_v41  ;;  %v448_v47 = vmul.f32 %v213_v41, %v213_v41 }
 0x102   :  { %366 = vst [vmem:[%s834_s2 + $0x70] sm:$0xff] %v590_v35  ;;  %v375_v50 = vadd.f32 %v374_v39, %v700_v18  ;;  %v471_v51 = vadd.f32 %v470_v37, %v447_v40  ;;  %v591_v52 = vpack.c.bf16 %v253_v43, %v251_v36  ;;  %v452_v18 = vmul.f32 %v708_v30, %v708_v30 }
 0x103   :  { %359 = vst [vmem:[%s834_s2 + $0x38] sm:$0xff] %v583_v45  ;;  %v396_v55 = vadd.f32 %v395_v46, %v702_v20  ;;  %v492_v56 = vadd.f32 %v491_v44, %v448_v47  ;;  %v453_v20 = vmul.f32 %v724_v38, %v724_v38  ;;  %v462_v21 = vmul.f32 %v249_v29, %v249_v29 }
 0x104   :  { %v376_v58 = vadd.f32 %v375_v50, %v706_v24  ;;  %v472_v59 = vadd.f32 %v471_v51, %v449_v49  ;;  %367 = vst [vmem:[%s834_s2 + $0x78] sm:$0xff] %v591_v52  ;;  %v454_v24 = vmul.f32 %v726_v42, %v726_v42  ;;  %v463_v31 = vmul.f32 %v251_v36, %v251_v36 }
 0x105   :  { %v397_v60 = vadd.f32 %v396_v55, %v708_v30  ;;  %v493_v61 = vadd.f32 %v492_v56, %v450_v54  ;;  %v456_v30 = vmul.f32 %v732_v53, %v732_v53  ;;  %v464_v33 = vmul.f32 %v253_v43, %v253_v43 }
 0x106   :  { %v473_v63 = vadd.f32 %v472_v59, %v451_v57  ;;  %v377_v0 = vadd.f32 %v376_v58, %v724_v38  ;;  %v416_v46 = vlaneseq }
 0x107   :  { %v494_v1 = vadd.f32 %v493_v61, %v452_v18  ;;  %v398_v3 = vadd.f32 %v397_v60, %v726_v42 }
 0x108   :  { %v378_v5 = vadd.f32 %v377_v0, %v730_v48  ;;  %v474_v6 = vadd.f32 %v473_v63, %v453_v20  ;;  %vm430_vm1 = vcmp.lt.s32.totalorder %v416_v46, 256 }
 0x109   :  { %v399_v7 = vadd.f32 %v398_v3, %v732_v53  ;;  %v495_v9 = vadd.f32 %v494_v1, %v454_v24  ;;  %v461_v53 = vmul.f32 %v772_v25, %v772_v25 }
 0x10a   :  { %v379_v38 = vadd.f32 %v378_v5, %v748_v62  ;;  %v475_v11 = vadd.f32 %v474_v6, %v455_v4  ;;  %v460_v62 = vmul.f32 %v756_v13, %v756_v13 }
 0x10b   :  { %v400_v42 = vadd.f32 %v399_v7, %v750_v2  ;;  %v496_v14 = vadd.f32 %v495_v9, %v456_v30 }
 0x10c   :  { %v476_v48 = vadd.f32 %v475_v11, %v457_v10  ;;  %v380_v15 = vadd.f32 %v379_v38, %v754_v8 }
 0x10d   :  { %v497_v17 = vadd.f32 %v496_v14, %v458_v12  ;;  %v401_v19 = vadd.f32 %v400_v42, %v756_v13  ;;  %v623_v13 = vmov 1966171168  }
 0x10e   :  { %v477_v22 = vadd.f32 %v476_v48, %v459_v16  ;;  %v381_v2 = vadd.f32 %v380_v15, %v772_v25  ;;  %v414_v45 = vunpack.c.l.s4 %v623_v13 }
 0x10f   :  { %v498_v23 = vadd.f32 %v497_v17, %v460_v62  ;;  %v402_v26 = vadd.f32 %v401_v19, %v249_v29 }
 0x110   :  { %v478_v27 = vadd.f32 %v477_v22, %v461_v53  ;;  %v382_v28 = vadd.f32 %v381_v2, %v251_v36  ;;  %v415_v54 = vunpack.c.0.s8 %v414_v45 }
 0x111   :  { %v499_v32 = vadd.f32 %v498_v23, %v462_v21  ;;  %v403_v8 = vadd.f32 %v402_v26, %v253_v43  ;;  %v417_v43 = vshrl.u32 %v416_v46, 7 }
 0x112   :  { %v383_v34 = vrot.slane %v382_v28, 4  ;;  %v479_v35 = vadd.f32 %v478_v27, %v463_v31 }
 0x113   :  { %v404_v37 = vrot.slane %v403_v8, 4  ;;  %v500_v39 = vadd.f32 %v499_v32, %v464_v33  ;;  %v418_v20 = vsub.s32 %v415_v54, %v417_v43 }
 0x114   :  { %v384_v40 = vadd.f32 %v383_v34, %v382_v28  ;;  %v480_v41 = vrot.slane %v479_v35, 4 }
 0x115   :  { %v405_v44 = vadd.f32 %v404_v37, %v403_v8  ;;  %v501_v47 = vrot.slane %v500_v39, 4 }
 0x116   :  { %v385_v25 = vrot.slane %v384_v40, 2  ;;  %v481_v49 = vadd.f32 %v480_v41, %v479_v35 }
 0x117   :  { %v406_v29 = vrot.slane %v405_v44, 2  ;;  %v502_v50 = vadd.f32 %v501_v47, %v500_v39 }
 0x118   :  { %v386_v51 = vadd.f32 %v385_v25, %v384_v40  ;;  %v482_v36 = vrot.slane %v481_v49, 2 }
 0x119   :  { %v407_v52 = vadd.f32 %v406_v29, %v405_v44  ;;  %v503_v55 = vrot.slane %v502_v50, 2 }
 0x11a   :  { %v387_v56 = vrot.slane %v386_v51, 1  ;;  %v483_v57 = vadd.f32 %v482_v36, %v481_v49 }
 0x11b   :  { %v408_v58 = vrot.slane %v407_v52, 1  ;;  %v504_v59 = vadd.f32 %v503_v55, %v502_v50 }
 0x11c   :  { %v388_v18 = vadd.f32 %v387_v56, %v386_v51  ;;  %v484_v60 = vrot.slane %v483_v57, 1 }
 0x11d   :  { %v409_v61 = vadd.f32 %v408_v58, %v407_v52  ;;  %v505_v63 = vrot.slane %v504_v59, 1 }
 0x11e   :  { %v485_v0 = vadd.f32 %v484_v60, %v483_v57 }
 0x11f   :  { %v412_v24 = vcombine.low %v388_v18, %v409_v61  ;;  %v506_v1 = vadd.f32 %v505_v63, %v504_v59 }
 0x121   :  { %v419_v3 = vrot.slane %v412_v24, %v418_v20  ;;  %v509_v4 = vcombine.low %v485_v0, %v506_v1 }
 0x123   :  { %v426_v5 = vrot.slane %v419_v3, %v418_v20  ;;  %v516_v6 = vrot.slane %v509_v4, %v418_v20 }
 0x125   :  { %432 = vst.msk [vmem:[%s835_s3] ss:$2 sm:$0x3] %vm430_vm1, %v426_v5  ;;  %v523_v30 = vrot.slane %v516_v6, %v418_v20 }
 0x127   :  { %575 = vst.msk [vmem:[%s835_s3 + $0x1] ss:$2 sm:$0x3] %vm430_vm1, %v523_v30 }

// kernel: decoding_conv_block_elu.4
= control target key start
LH: loop header
LB: loop body
LE: loop exit
PB: predicated region body
PF: predicated region fallthrough
CT: control target
= control target key end

     0   :  { %s4257_s18 = smov 0   ;;  %s4259_s19 = smov 0   ;;  %s5158_s0 = inlined_call_operand.vmem [shape: bf16[2,18,18,128], index: 0, kind: input, shape index: {}, may-alias: {0,1,2}]   ;;  %s5159_s1 = inlined_call_operand.vmem [shape: bf16[2,18,18,128], index: 1, kind: input, shape index: {}, may-alias: {0,1,2}]   ;;  %s5160_s2 = inlined_call_operand.vmem [shape: bf16[2,18,18,128], index: 2, kind: input, shape index: {}, may-alias: {0,1,2}]   ;;  %s5161_s3 = inlined_call_operand.vmem [shape: bf16[3,3,128,64], index: 3, kind: input, shape index: {}]   ;;  %s5162_s4 = inlined_call_operand.vmem [shape: bf16[2,16,16,64], index: 4, kind: output, shape index: {0}]   ;;  %s5163_s5 = inlined_call_operand.vmem [shape: f32[16,2,64], index: 5, kind: output, shape index: {1}]  }
   0x1   :  { %s4261_s20 = smov 0   ;;  %s4263_s21 = smov 0  }
   0x2   :  { %s4265_s22 = smov 0   ;;  %s4267_s23 = smov 0  }
   0x3   :  { %s4269_s24 = smov 0  }
   0x4 LB: > { %s4293_s25 = sadd.s32 4294967295, %s4223_s24   ;;  %s4296_s26 = sadd.s32 1, %s4223_s24   ;;  %s4223_s24 = sphi %s4269_s24, %s5174_s24   ;;  %s4219_s23 = sphi %s4267_s23, %s5173_s23   ;;  %s4215_s22 = sphi %s4265_s22, %s5172_s22   ;;  %s4211_s21 = sphi %s4263_s21, %s5171_s21   ;;  %s4207_s20 = sphi %s4261_s20, %s5170_s20   ;;  %s4203_s19 = sphi %s4259_s19, %s5169_s19   ;;  %s4199_s18 = sphi %s4257_s18, %s5168_s18  }
   0x5   : > { %s20_s27 = ssub.s32 %s4223_s24, %s4296_s26  ;;  %s23_s28 = sadd.s32 1, %s4219_s23 }
   0x6   : > { %p21_p0 = scmp.eq.s32.totalorder %s20_s27, 0  ;;  %p30_p1 = scmp.ne.s32.totalorder %s4219_s23, %s4215_s22 }
   0x7   : > { %p31_p2 = scmp.eq.s32.totalorder %s4223_s24, 0  ;;  %s47_s29 = sadd.s32 1, %s4296_s26 }
   0x8   : > { %s4306_s30 = scalar_select %p21_p0, %s4219_s23, %s23_s28  }
   0x9   : > { %p4313_p3 = por %p31_p2, %p30_p1  ;;  %s48_s7 = ssub.s32 %s4296_s26, %s47_s29 }
   0xa   : > { %p49_p4 = scmp.eq.s32.totalorder %s48_s7, 0  ;;  %s51_s8 = sadd.s32 1, %s4211_s21 }
   0xb   : > { %p58_p5 = scmp.ne.s32.totalorder %s4211_s21, %s4207_s20  ;;  %s74_s9 = sadd.s32 2, %s4223_s24 }
   0xc   : > { %s4323_s10 = scalar_select %p49_p4, %s4211_s21, %s51_s8  }
   0xd   : > { %p4327_p6 = por %p58_p5, %p31_p2  ;;  %s75_s12 = sadd.s32 2, %s4296_s26 }
   0xe   : > { %s76_s13 = ssub.s32 %s74_s9, %s75_s12  ;;  %s79_s14 = sadd.s32 1, %s4203_s19 }
   0xf   : > { %p77_p7 = scmp.eq.s32.totalorder %s76_s13, 0  ;;  %p86_p8 = scmp.ne.s32.totalorder %s4203_s19, %s4199_s18 }
  0x10   : > { %p137_p9 = scmp.eq.s32.totalorder %s4293_s25, 15  ;;  %p2881_p12 = scmp.ge.s32.totalorder %s4223_s24, 16 }
  0x11   : > { %s4337_s15 = scalar_select %p77_p7, %s4203_s19, %s79_s14  }
  0x12   : > { %p4341_p10 = por %p86_p8, %p31_p2  ;;  %p4348_p11 = por %p137_p9, %p30_p1 }
  0x13   : > { %188 = sbr.rel (%p2881_p12) target bundleno = 47 (0x2f), region = 20 }
  0x1a   : > { %191 = sbr.rel (!%p4313_p3) target bundleno = 33 (0x21), region = 24  ;;  %s193_s27 = sand.u32 (%p4313_p3), 1, %s4219_s23  }
  0x1b   : > { %s3939_s28 = smul.u32 (%p4313_p3), 12, %s4223_s24 }
  0x1c   : > { %s3938_s29 = smul.u32 (%p4313_p3), 24, %s193_s27 }
  0x1d   : > { %s198_s9 = scalar_lea.vmem (%p4313_p3), %s5158_s0, %s3939_s28 }
  0x1e   : > { %v214_v0 = vld [vmem:[%s198_s9] sm:$0xff] (%p4313_p3)   ;;  %v218_v1 = vld [vmem:[%s198_s9 + $0x8] sm:$0xf] (%p4313_p3)  ;;  %v220_v2 = vld [vmem:[%s198_s9 + $0xd8] sm:$0xff] (%p4313_p3)   ;;  %s195_s12 = scalar_lea.vmem (%p4313_p3), [#allocation2], %s3938_s29 }
  0x1f   : > { %215 = vst [vmem:[%s195_s12] sm:$0xff] (%p4313_p3), %v214_v0   ;;  %219 = vst [vmem:[%s195_s12 + $0x8] sm:$0xf] (%p4313_p3), %v218_v1  ;;  %v224_v3 = vld [vmem:[%s198_s9 + $0xe0] sm:$0xf] (%p4313_p3) }
  0x20   : > { %221 = vst [vmem:[%s195_s12 + $0xc] sm:$0xff] (%p4313_p3), %v220_v2   ;;  %225 = vst [vmem:[%s195_s12 + $0x14] sm:$0xf] (%p4313_p3), %v224_v3 }
  0x21 PF: > { %260 = sbr.rel (!%p4327_p6) target bundleno = 40 (0x28), region = 65  ;;  %s262_s6 = sand.u32 (%p4327_p6), 1, %s4211_s21  }
  0x22   : > { %s2785_s13 = smul.u32 (%p4327_p6), 12, %s4223_s24 }
  0x23   : > { %s3940_s14 = smul.u32 (%p4327_p6), 24, %s262_s6 }
  0x24   : > { %s2786_s7 = scalar_lea.vmem (%p4327_p6), %s5159_s1, %s2785_s13 }
  0x25   : > { %v2883_v4 = vld [vmem:[%s2786_s7 + $0xc] sm:$0xff] (%p4327_p6)   ;;  %v2885_v5 = vld [vmem:[%s2786_s7 + $0x14] sm:$0xf] (%p4327_p6)  ;;  %v2886_v6 = vld [vmem:[%s2786_s7 + $0xe4] sm:$0xff] (%p4327_p6)   ;;  %s264_s29 = scalar_lea.vmem (%p4327_p6), [#allocation3], %s3940_s14 }
  0x26   : > { %285 = vst [vmem:[%s264_s29] sm:$0xff] (%p4327_p6), %v2883_v4   ;;  %289 = vst [vmem:[%s264_s29 + $0x8] sm:$0xf] (%p4327_p6), %v2885_v5  ;;  %v2888_v7 = vld [vmem:[%s2786_s7 + $0xec] sm:$0xf] (%p4327_p6) }
  0x27   : > { %291 = vst [vmem:[%s264_s29 + $0xc] sm:$0xff] (%p4327_p6), %v2886_v6   ;;  %295 = vst [vmem:[%s264_s29 + $0x14] sm:$0xf] (%p4327_p6), %v2888_v7 }
  0x28 PF: > { %330 = sbr.rel (!%p4341_p10) target bundleno = 47 (0x2f), region = 106  ;;  %s332_s11 = sand.u32 (%p4341_p10), 1, %s4203_s19  }
  0x29   : > { %s2790_s8 = smul.u32 (%p4341_p10), 12, %s4223_s24 }
  0x2a   : > { %s3941_s9 = smul.u32 (%p4341_p10), 24, %s332_s11 }
  0x2b   : > { %s2791_s13 = scalar_lea.vmem (%p4341_p10), %s5160_s2, %s2790_s8 }
  0x2c   : > { %v2889_v8 = vld [vmem:[%s2791_s13 + $0x18] sm:$0xff] (%p4341_p10)   ;;  %v2891_v9 = vld [vmem:[%s2791_s13 + $0x20] sm:$0xf] (%p4341_p10)  ;;  %v2892_v10 = vld [vmem:[%s2791_s13 + $0xf0] sm:$0xff] (%p4341_p10)   ;;  %s334_s14 = scalar_lea.vmem (%p4341_p10), [#allocation4], %s3941_s9 }
  0x2d   : > { %355 = vst [vmem:[%s334_s14] sm:$0xff] (%p4341_p10), %v2889_v8   ;;  %359 = vst [vmem:[%s334_s14 + $0x8] sm:$0xf] (%p4341_p10), %v2891_v9  ;;  %v2894_v11 = vld [vmem:[%s2791_s13 + $0xf8] sm:$0xf] (%p4341_p10) }
  0x2e   : > { %361 = vst [vmem:[%s334_s14 + $0xc] sm:$0xff] (%p4341_p10), %v2892_v10   ;;  %365 = vst [vmem:[%s334_s14 + $0x14] sm:$0xf] (%p4341_p10), %v2894_v11 }
  0x2f PF: > { %p2895_p13 = scmp.ge.s32.totalorder %s4223_s24, 1  ;;  %p399_p0 = scmp.lt.s32.totalorder %s4223_s24, 17 }
  0x31   : > { %p400_p1 = pnand %p2895_p13, %p399_p0 }
  0x32   : > { %v4003_v12 = vld [vmem:[%s5161_s3 + $0x40] sm:$0xff] (!%p400_p1)   ;;  %v4225_v13 = vmov (!%p400_p1), 0.0   ;;  %v4005_v15 = vld [vmem:[%s5161_s3 + $0x48] sm:$0xff] (!%p400_p1)   ;;  %vm4226_vm0 = vmmov (!%p400_p1), 0   ;;  %v4007_v17 = vld [vmem:[%s5161_s3 + $0x50] sm:$0xff] (!%p400_p1)   ;;  %s406_s6 = sand.u32 (!%p400_p1), 1, %s4215_s22  }
  0x33   : > { %403 = sbr.rel (%p400_p1) target bundleno = 574 (0x23e), region = 147  ;;  %3514 = vmatprep.subr.bf16.mxu0 (!%p400_p1), %v4225_v13  ;;  %3694 = vmatprep.subr.bf16.mxu1 (!%p400_p1), %v4225_v13  ;;  %v4004_v14 = vld [vmem:[%s5161_s3 + $0x40] sm:$0xff] (!%p400_p1)   ;;  %v4006_v16 = vld [vmem:[%s5161_s3 + $0x48] sm:$0xff] (!%p400_p1)   ;;  %v4008_v18 = vld [vmem:[%s5161_s3 + $0x50] sm:$0xff] (!%p400_p1)   ;;  %vm509_vm1 = vsmask.f32 (!%p400_p1), 7424 }
  0x34   : > { %3515 = vmatpush3.bf16.msra.mxu0 (!%p400_p1), %v4003_v12  ;;  %3530 = vmatprep.mubr.msk.bf16.mxu0 (!%p400_p1), %vm4226_vm0, %v4225_v13  ;;  %s3942_s16 = smul.u32 (!%p400_p1), 24, %s406_s6  ;;  %v4009_v19 = vld [vmem:[%s5161_s3 + $0x58] sm:$0xff] (!%p400_p1)   ;;  %v4011_v21 = vld [vmem:[%s5161_s3 + $0x60] sm:$0xff] (!%p400_p1)   ;;  %v4013_v25 = vld [vmem:[%s5161_s3 + $0x68] sm:$0xff] (!%p400_p1)   ;;  %vm723_vm2 = vcmask (!%p400_p1), 1046528   ;;  %s413_s9 = sand.u32 (!%p400_p1), 1, %s4207_s20  }
  0x35   : > { %3695 = vmatpush3.bf16.msra.mxu1 (!%p400_p1), %v4004_v14  ;;  %3516 = vmatprep.subr.bf16.mxu0 (!%p400_p1), %v4225_v13  ;;  %v4010_v20 = vld [vmem:[%s5161_s3 + $0x58] sm:$0xff] (!%p400_p1)   ;;  %v4012_v22 = vld [vmem:[%s5161_s3 + $0x60] sm:$0xff] (!%p400_p1)   ;;  %v4014_v29 = vld [vmem:[%s5161_s3 + $0x68] sm:$0xff] (!%p400_p1)   ;;  %s3943_s28 = smul.u32 (!%p400_p1), 24, %s413_s9  ;;  %s420_s24 = sand.u32 (!%p400_p1), 1, %s4199_s18   ;;  %vm1558_vm3 = vcmask (!%p400_p1), 523264  }
  0x36   : > { %3696 = vmatprep.subr.bf16.mxu1 (!%p400_p1), %v4225_v13  ;;  %3710 = vmatprep.mubr.msk.bf16.mxu1 (!%p400_p1), %vm4226_vm0, %v4225_v13  ;;  %s4423_s12 = scalar_lea.vmem (!%p400_p1), [#allocation2], %s3942_s16  ;;  %v4015_v32 = vld [vmem:[%s5161_s3 + $0x70] sm:$0xff] (!%p400_p1)   ;;  %v4017_v43 = vld [vmem:[%s5161_s3 + $0x78] sm:$0xff] (!%p400_p1)   ;;  %v4021_v50 = vld [vmem:[%s5161_s3] sm:$0xff] (!%p400_p1)   ;;  %s3944_s13 = smul.u32 (!%p400_p1), 24, %s420_s24  ;;  %vm1555_vm4 = vcmask (!%p400_p1), 519168  }
  0x37   : > { %v465_v23 = vld [vmem:[%s4423_s12] sm:$0xf] (!%p400_p1)  ;;  %v4427_v24 = vld [vmem:[%s4423_s12 + $0x4] sm:$0xf] (!%p400_p1)  ;;  %v3111_v28 = vld [vmem:[%s4423_s12 + $0xc] sm:$0xf] (!%p400_p1) }
  0x38   : > { %3517 = vmatpush3.bf16.msra.mxu0 (!%p400_p1), %v4005_v15  ;;  %v4433_v26 = vcombine.low (!%p400_p1), %v465_v23, %v4427_v24  ;;  %v4436_v27 = vld [vmem:[%s4423_s12 + $0x8] ss:$0 sps:$4 sm:$0x11] (!%p400_p1)   ;;  %v4445_v31 = vld [vmem:[%s4423_s12 + $0x10] sm:$0xf] (!%p400_p1)  ;;  %v4018_v46 = vld [vmem:[%s5161_s3 + $0x78] sm:$0xff] (!%p400_p1)  }
  0x39   : > { %3697 = vmatpush3.bf16.msra.mxu1 (!%p400_p1), %v4006_v16  ;;  %3518 = vmatprep.subr.bf16.mxu0 (!%p400_p1), %v4225_v13  ;;  %v4452_v33 = vcombine.low (!%p400_p1), %v3111_v28, %v4445_v31  ;;  %v4455_v34 = vld [vmem:[%s4423_s12 + $0x14] ss:$0 sps:$4 sm:$0x11] (!%p400_p1)   ;;  %v518_v37 = vshll.u32 (!%p400_p1), %v4436_v27, 16  ;;  %v4024_v52 = vld [vmem:[%s5161_s3] sm:$0xff] (!%p400_p1)   ;;  %v4029_v57 = vld [vmem:[%s5161_s3 + $0x18] sm:$0xff] (!%p400_p1)  }
  0x3a   : > { %3698 = vmatprep.subr.bf16.mxu1 %v4225_v13  ;;  %v513_v30 = vshll.u32 %v4433_v26, 16  ;;  %v4016_v35 = vld [vmem:[%s5161_s3 + $0x70] sm:$0xff]   ;;  %v511_v36 = vshrl.u32 %v4433_v26, 16  ;;  %v1633_v41 = vshll.u32 %v4455_v34, 16  ;;  %v4025_v53 = vld [vmem:[%s5161_s3 + $0x8] sm:$0xff]   ;;  %v4030_v58 = vld [vmem:[%s5161_s3 + $0x18] sm:$0xff]  }
  0x3b   : > { %v1626_v39 = vshrl.u32 %v4452_v33, 16  ;;  %v1628_v40 = vshll.u32 %v4452_v33, 16  ;;  %v520_v45 = vrot.slane %v518_v37, 1  ;;  %v4026_v54 = vld [vmem:[%s5161_s3 + $0x8] sm:$0xff]   ;;  %v4027_v55 = vld [vmem:[%s5161_s3 + $0x10] sm:$0xff]   ;;  %v4031_v59 = vld [vmem:[%s5161_s3 + $0x20] sm:$0xff]  }
  0x3c   : > { %3519 = vmatpush3.bf16.msra.mxu0 %v4007_v17  ;;  %v515_v38 = vrot.slane %v513_v30, 1  ;;  %v1635_v48 = vrot.slane %v1633_v41, 1  ;;  %v4028_v56 = vld [vmem:[%s5161_s3 + $0x10] sm:$0xff]   ;;  %v4032_v60 = vld [vmem:[%s5161_s3 + $0x20] sm:$0xff]   ;;  %v4033_v61 = vld [vmem:[%s5161_s3 + $0x28] sm:$0xff]   ;;  %v725_v1 = vrot.slane %v4436_v27, 1 }
  0x3d   : > { %3699 = vmatpush3.bf16.msra.mxu1 %v4008_v18  ;;  %3520 = vmatprep.subr.bf16.mxu0 %v4225_v13  ;;  %v1630_v42 = vrot.slane %v1628_v40, 1  ;;  %v4034_v62 = vld [vmem:[%s5161_s3 + $0x28] sm:$0xff]   ;;  %v702_v63 = vld [vmem:[%s4423_s12] sm:$0xe]  ;;  %v4035_v3 = vld [vmem:[%s5161_s3 + $0x30] sm:$0xff]   ;;  %v1838_v5 = vrot.slane %v4455_v34, 1 }
  0x3e   : > { %3700 = vmatprep.subr.bf16.mxu1 %v4225_v13  ;;  %v516_v44 = vor.u32 %v515_v38, %v511_v36  ;;  %v2948_v0 = vcombine.low %v702_v63, %v4427_v24  ;;  %v3148_v2 = vld [vmem:[%s4423_s12 + $0xc] sm:$0xe]  ;;  %v4036_v6 = vld [vmem:[%s5161_s3 + $0x30] sm:$0xff]   ;;  %v4037_v10 = vld [vmem:[%s5161_s3 + $0x38] sm:$0xff]   ;;  %s4580_s11 = scalar_lea.vmem [#allocation3], %s3943_s28  ;;  %s4700_s7 = scalar_lea.vmem [#allocation4], %s3944_s13 }
  0x3f   : > { %v1631_v47 = vor.u32 %v1630_v42, %v1626_v39  ;;  %v3165_v4 = vcombine.low %v3148_v2, %v4445_v31  ;;  %v4038_v12 = vld [vmem:[%s5161_s3 + $0x38] sm:$0xff]   ;;  %v4039_v14 = vld [vmem:[%s5161_s3 + $0x80] sm:$0xff]   ;;  %v4041_v16 = vld [vmem:[%s5161_s3 + $0x88] sm:$0xff]   ;;  %s2896_s16 = sshll.u32 %s406_s6, 4  ;;  %p460_p2 = scmp.lt.s32.totalorder %s4293_s25, 15  ;;  %vm2689_vm5 = vcmask 516096  }
  0x40   : > { %3521 = vmatpush3.bf16.msra.mxu0 %v4009_v19  ;;  %v521_v49 = vsel %vm509_vm1, %v516_v44, %v520_v45  ;;  %v724_v7 = vrot.slane %v2948_v0, 1  ;;  %v4040_v15 = vld [vmem:[%s5161_s3 + $0x80] sm:$0xff]   ;;  %v4042_v17 = vld [vmem:[%s5161_s3 + $0x88] sm:$0xff]   ;;  %v4043_v18 = vld [vmem:[%s5161_s3 + $0x90] sm:$0xff]   ;;  %s5106_s18 = scalar_lea.vmem [#allocation5], %s2896_s16 }
  0x41   : > { %3701 = vmatpush3.bf16.msra.mxu1 %v4010_v20  ;;  %3522 = vmatprep.subr.bf16.mxu0 %v4225_v13  ;;  %v1636_v51 = vsel %vm509_vm1, %v1631_v47, %v1635_v48  ;;  %v1837_v8 = vrot.slane %v3165_v4, 1  ;;  %v4044_v19 = vld [vmem:[%s5161_s3 + $0x90] sm:$0xff]   ;;  %v4045_v20 = vld [vmem:[%s5161_s3 + $0x98] sm:$0xff]   ;;  %v4048_v23 = vld [vmem:[%s5161_s3 + $0xa0] sm:$0xff]   ;;  %s461_s22 = scalar_select %p460_p2, %s4293_s25, 15 }
  0x42   : > { %3702 = vmatprep.subr.bf16.mxu1 %v4225_v13  ;;  %v4544_v9 = vsel %vm723_vm2, %v724_v7, %v725_v1  ;;  %v4049_v24 = vld [vmem:[%s5161_s3 + $0xa8] sm:$0xff]   ;;  %v4052_v27 = vld [vmem:[%s5161_s3 + $0xb0] sm:$0xff]   ;;  %v4053_v28 = vld [vmem:[%s5161_s3 + $0xb8] sm:$0xff]  }
  0x43   : > { %v4550_v11 = vsel %vm723_vm2, %v1837_v8, %v1838_v5  ;;  %v4056_v30 = vld [vmem:[%s5161_s3 + $0xc0] sm:$0xff]   ;;  %v4061_v34 = vld [vmem:[%s5161_s3 + $0xd0] sm:$0xff]   ;;  %v4063_v36 = vld [vmem:[%s5161_s3 + $0xd8] sm:$0xff]   ;;  %s2897_s6 = sshll.u32 %s461_s22, 1 }
  0x44   : > { %3523 = vmatpush3.bf16.msra.mxu0 %v4011_v21  ;;  %v4046_v21 = vld [vmem:[%s5161_s3 + $0x98] sm:$0xff]   ;;  %v4058_v31 = vld [vmem:[%s5161_s3 + $0xc0] sm:$0xff]   ;;  %v4067_v40 = vld [vmem:[%s5161_s3 + $0xe8] sm:$0xff]   ;;  %s463_s20 = scalar_lea.vmem %s5163_s5, %s2897_s6 }
  0x45   : > { %3703 = vmatpush3.bf16.msra.mxu1 %v4012_v22  ;;  %3524 = vmatprep.subr.bf16.mxu0 %v4225_v13  ;;  %v4047_v22 = vld [vmem:[%s5161_s3 + $0xa0] sm:$0xff]   ;;  %v4064_v37 = vld [vmem:[%s5161_s3 + $0xd8] sm:$0xff]   ;;  %v4068_v41 = vld [vmem:[%s5161_s3 + $0xe8] sm:$0xff]  }
  0x46   : > { %3704 = vmatprep.subr.bf16.mxu1 %v4225_v13  ;;  %v4065_v38 = vld [vmem:[%s5161_s3 + $0xe0] sm:$0xff]   ;;  %v4069_v42 = vld [vmem:[%s5161_s3 + $0xf0] sm:$0xff]   ;;  %v4071_v44 = vld [vmem:[%s5161_s3 + $0xf8] sm:$0xff]  }
  0x47   : > { %v4066_v39 = vld [vmem:[%s5161_s3 + $0xe0] sm:$0xff]   ;;  %v4072_v45 = vld [vmem:[%s5161_s3 + $0xf8] sm:$0xff]   ;;  %v4085_v0 = vld [vmem:[%s5161_s3 + $0x128] sm:$0xff]  }
  0x48   : > { %3525 = vmatpush3.bf16.msra.mxu0 %v4013_v25  ;;  %v4050_v25 = vld [vmem:[%s5161_s3 + $0xa8] sm:$0xff]   ;;  %v4074_v47 = vld [vmem:[%s5161_s3 + $0x100] sm:$0xff]   ;;  %v4763_v1 = vld [vmem:[%s4580_s11 + $0x8] ss:$0 sps:$4 sm:$0x11]  }
  0x49   : > { %3705 = vmatpush3.bf16.msra.mxu1 %v4014_v29  ;;  %3526 = vmatprep.subr.bf16.mxu0 %v4225_v13  ;;  %v4054_v29 = vld [vmem:[%s5161_s3 + $0xb8] sm:$0xff]   ;;  %v4086_v2 = vld [vmem:[%s5161_s3 + $0x128] sm:$0xff]   ;;  %v4088_v7 = vld [vmem:[%s5161_s3 + $0x130] sm:$0xff]  }
  0x4a   : > { %3706 = vmatprep.subr.bf16.mxu1 %v4225_v13  ;;  %v4075_v48 = vld [vmem:[%s4580_s11 + $0xc] sm:$0xff]   ;;  %v4770_v4 = vld [vmem:[%s4580_s11 + $0x14] ss:$0 sps:$4 sm:$0x11]  }
  0x4c   : > { %3527 = vmatpush3.bf16.msra.mxu0 %v4015_v32  ;;  %v4059_v32 = vld [vmem:[%s5161_s3 + $0xc8] sm:$0xff]  }
  0x4d   : > { %3707 = vmatpush3.bf16.msra.mxu1 %v4016_v35  ;;  %3528 = vmatprep.subr.bf16.mxu0 %v4225_v13  ;;  %v4062_v35 = vld [vmem:[%s5161_s3 + $0xd0] sm:$0xff]  }
  0x4e   : > { %3708 = vmatprep.subr.bf16.mxu1 %v4225_v13 }
  0x50   : > { %3529 = vmatpush3.bf16.msra.mxu0 %v4017_v43  ;;  %v4070_v43 = vld [vmem:[%s5161_s3 + $0xf0] sm:$0xff]  }
  0x51   : > { %3709 = vmatpush3.bf16.msra.mxu1 %v4018_v46  ;;  %3534 = vmatprep.subr.bf16.mxu0 %v4225_v13  ;;  %v4073_v46 = vld [vmem:[%s4580_s11] sm:$0xff]  }
  0x52   : > { %3714 = vmatprep.subr.bf16.mxu1 %v4225_v13 }
  0x53   : > { %3531 = vmatmul.mubr.bf16.vlgmr.msra.gmra.mrb[0].mxu0 %v521_v49  ;;  %v4076_v49 = vld [vmem:[%s5161_s3 + $0x100] sm:$0xff]  }
  0x54   : > { %3535 = vmatpush3.bf16.msra.mxu0 %v4021_v50  ;;  %3711 = vmatmul.mubr.bf16.vlgmr.msra.gmra.mrb[0].mxu1 %v1636_v51  ;;  %v4077_v50 = vld [vmem:[%s5161_s3 + $0x108] sm:$0xff]  }
  0x55   : > { %3715 = vmatpush3.bf16.msra.mxu1 %v4024_v52  ;;  %3536 = vmatprep.subr.bf16.mxu0 %v4225_v13  ;;  %v4078_v51 = vld [vmem:[%s5161_s3 + $0x108] sm:$0xff]   ;;  %v4079_v52 = vld [vmem:[%s5161_s3 + $0x110] sm:$0xff]  }
  0x56   : > { %3716 = vmatprep.subr.bf16.mxu1 %v4225_v13  ;;  %3550 = vmatprep.mubr.msk.bf16.mxu0 %vm4226_vm0, %v4225_v13 }
  0x57   : > { %3730 = vmatprep.mubr.msk.bf16.mxu1 %vm4226_vm0, %v4225_v13 }
  0x58   : > { %3537 = vmatpush3.bf16.msra.mxu0 %v4025_v53  ;;  %v4080_v53 = vld [vmem:[%s5161_s3 + $0x110] sm:$0xff]  }
  0x59   : > { %3717 = vmatpush3.bf16.msra.mxu1 %v4026_v54  ;;  %3538 = vmatprep.subr.bf16.mxu0 %v4225_v13  ;;  %v4081_v54 = vld [vmem:[%s5161_s3 + $0x118] sm:$0xff]  }
  0x5a   : > { %3718 = vmatprep.subr.bf16.mxu1 %v4225_v13 }
  0x5c   : > { %3539 = vmatpush3.bf16.msra.mxu0 %v4027_v55  ;;  %v4082_v55 = vld [vmem:[%s5161_s3 + $0x118] sm:$0xff]  }
  0x5d   : > { %3719 = vmatpush3.bf16.msra.mxu1 %v4028_v56  ;;  %3540 = vmatprep.subr.bf16.mxu0 %v4225_v13  ;;  %v935_v56 = vld [vmem:[%s4580_s11] sm:$0xf] }
  0x5e   : > { %3720 = vmatprep.subr.bf16.mxu1 %v4225_v13 }
  0x60   : > { %3541 = vmatpush3.bf16.msra.mxu0 %v4029_v57  ;;  %v4741_v57 = vld [vmem:[%s4580_s11 + $0x4] sm:$0xf] }
  0x61   : > { %3721 = vmatpush3.bf16.msra.mxu1 %v4030_v58  ;;  %3542 = vmatprep.subr.bf16.mxu0 %v4225_v13  ;;  %v3201_v58 = vld [vmem:[%s4580_s11 + $0xc] sm:$0xf] }
  0x62   : > { %3722 = vmatprep.subr.bf16.mxu1 %v4225_v13 }
  0x64   : > { %3543 = vmatpush3.bf16.msra.mxu0 %v4031_v59  ;;  %v4747_v59 = vld [vmem:[%s4580_s11 + $0x10] sm:$0xf] }
  0x65   : > { %3723 = vmatpush3.bf16.msra.mxu1 %v4032_v60  ;;  %3544 = vmatprep.subr.bf16.mxu0 %v4225_v13  ;;  %v4083_v60 = vld [vmem:[%s5161_s3 + $0x120] sm:$0xff]   ;;  %v3220_v63 = vcombine.low %v3201_v58, %v4747_v59 }
  0x66   : > { %3724 = vmatprep.subr.bf16.mxu1 %v4225_v13  ;;  %v4122_v58 = vld [vmem:[%s5161_s3 + $0x1a0] sm:$0xff]  }
  0x67   : > { %v2078_v5 = vshll.u32 %v3220_v63, 16 }
  0x68   : > { %3545 = vmatpush3.bf16.msra.mxu0 %v4033_v61  ;;  %v2998_v61 = vcombine.low %v935_v56, %v4741_v57  ;;  %v4120_v56 = vld [vmem:[%s5161_s3 + $0x198] sm:$0xff]  }
  0x69   : > { %3725 = vmatpush3.bf16.msra.mxu1 %v4034_v62  ;;  %3546 = vmatprep.subr.bf16.mxu0 %v4225_v13  ;;  %v4084_v62 = vld [vmem:[%s5161_s3 + $0x120] sm:$0xff]  }
  0x6a   : > { %3726 = vmatprep.subr.bf16.mxu1 %v4225_v13  ;;  %v964_v8 = vshrl.u32 %v2998_v61, 16 }
  0x6c   : > { %3547 = vmatpush3.bf16.msra.mxu0 %v4035_v3  ;;  %v966_v3 = vshll.u32 %v2998_v61, 16  ;;  %v4125_v61 = vld [vmem:[%s5161_s3 + $0x1b0] sm:$0xff]  }
  0x6d   : > { %3727 = vmatpush3.bf16.msra.mxu1 %v4036_v6  ;;  %3548 = vmatprep.subr.bf16.mxu0 %v4225_v13  ;;  %v4087_v6 = vld [vmem:[%s5161_s3 + $0x130] sm:$0xff]  }
  0x6e   : > { %3728 = vmatprep.subr.bf16.mxu1 %v4225_v13 }
  0x70   : > { %3549 = vmatpush3.bf16.msra.mxu0 %v4037_v10  ;;  %v968_v10 = vrot.slane %v966_v3, 1  ;;  %v4131_v3 = vld [vmem:[%s4700_s7 + $0xc] sm:$0xff]  }
  0x71   : > { %3729 = vmatpush3.bf16.msra.mxu1 %v4038_v12  ;;  %3554 = vmatprep.subr.bf16.mxu0 %v4225_v13  ;;  %v2080_v12 = vrot.slane %v2078_v5, 1  ;;  %v4133_v5 = vld [vmem:[%s5161_s3 + $0x1c8] sm:$0xff]  }
  0x72   : > { %3734 = vmatprep.subr.bf16.mxu1 %v4225_v13 }
  0x73   : > { %3551 = vmatmul.mubr.bf16.vlgmr.msra.gmra.mrb[0].mxu0 %v4433_v26  ;;  %v4051_v26 = vld [vmem:[%s5161_s3 + $0xb0] sm:$0xff]  }
  0x74   : > { %3555 = vmatpush3.bf16.msra.mxu0 %v4039_v14  ;;  %3731 = vmatmul.mubr.bf16.vlgmr.msra.gmra.mrb[0].mxu1 %v4452_v33  ;;  %v4060_v33 = vld [vmem:[%s5161_s3 + $0xc8] sm:$0xff]   ;;  %v2083_v14 = vshll.u32 %v4770_v4, 16 }
  0x75   : > { %3735 = vmatpush3.bf16.msra.mxu1 %v4040_v15  ;;  %3556 = vmatprep.subr.bf16.mxu0 %v4225_v13  ;;  %v4089_v15 = vld [vmem:[%s5161_s3 + $0x138] sm:$0xff]  }
  0x76   : > { %3736 = vmatprep.subr.bf16.mxu1 %v4225_v13  ;;  %3570 = vmatprep.mubr.msk.bf16.mxu0 %vm4226_vm0, %v4225_v13 }
  0x77   : > { %3750 = vmatprep.mubr.msk.bf16.mxu1 %vm4226_vm0, %v4225_v13 }
  0x78   : > { %3557 = vmatpush3.bf16.msra.mxu0 %v4041_v16  ;;  %v969_v16 = vor.u32 %v968_v10, %v964_v8  ;;  %v4136_v8 = vld [vmem:[%s5161_s3 + $0x1d0] sm:$0xff]   ;;  %v4138_v10 = vld [vmem:[%s5161_s3 + $0x1d8] sm:$0xff]  }
  0x79   : > { %3737 = vmatpush3.bf16.msra.mxu1 %v4042_v17  ;;  %3558 = vmatprep.subr.bf16.mxu0 %v4225_v13 }
  0x7a   : > { %3738 = vmatprep.subr.bf16.mxu1 %v4225_v13 }
  0x7c   : > { %3559 = vmatpush3.bf16.msra.mxu0 %v4043_v18  ;;  %v4090_v18 = vld [vmem:[%s5161_s3 + $0x138] sm:$0xff]  }
  0x7d   : > { %3739 = vmatpush3.bf16.msra.mxu1 %v4044_v19  ;;  %3560 = vmatprep.subr.bf16.mxu0 %v4225_v13 }
  0x7e   : > { %3740 = vmatprep.subr.bf16.mxu1 %v4225_v13 }
  0x80   : > { %3561 = vmatpush3.bf16.msra.mxu0 %v4045_v20  ;;  %v2085_v20 = vrot.slane %v2083_v14, 1  ;;  %v3283_v14 = vld [vmem:[%s4700_s7 + $0xc] sm:$0xf] }
  0x81   : > { %3741 = vmatpush3.bf16.msra.mxu1 %v4046_v21  ;;  %3562 = vmatprep.subr.bf16.mxu0 %v4225_v13 }
  0x82   : > { %3742 = vmatprep.subr.bf16.mxu1 %v4225_v13 }
  0x84   : > { %3563 = vmatpush3.bf16.msra.mxu0 %v4047_v22  ;;  %v4093_v22 = vld [vmem:[%s5161_s3 + $0x140] sm:$0xff]  }
  0x85   : > { %3743 = vmatpush3.bf16.msra.mxu1 %v4048_v23  ;;  %3564 = vmatprep.subr.bf16.mxu0 %v4225_v13 }
  0x86   : > { %3744 = vmatprep.subr.bf16.mxu1 %v4225_v13 }
  0x88   : > { %3565 = vmatpush3.bf16.msra.mxu0 %v4049_v24  ;;  %v4096_v24 = vld [vmem:[%s5161_s3 + $0x140] sm:$0xff]  }
  0x89   : > { %3745 = vmatpush3.bf16.msra.mxu1 %v4050_v25  ;;  %3566 = vmatprep.subr.bf16.mxu0 %v4225_v13  ;;  %v4097_v25 = vld [vmem:[%s5161_s3 + $0x148] sm:$0xff]  }
  0x8a   : > { %3746 = vmatprep.subr.bf16.mxu1 %v4225_v13 }
  0x8c   : > { %3567 = vmatpush3.bf16.msra.mxu0 %v4051_v26  ;;  %v4098_v26 = vld [vmem:[%s5161_s3 + $0x148] sm:$0xff]  }
  0x8d   : > { %3747 = vmatpush3.bf16.msra.mxu1 %v4052_v27  ;;  %3568 = vmatprep.subr.bf16.mxu0 %v4225_v13  ;;  %v4099_v27 = vld [vmem:[%s5161_s3 + $0x150] sm:$0xff]  }
  0x8e   : > { %3748 = vmatprep.subr.bf16.mxu1 %v4225_v13 }
  0x90   : > { %3569 = vmatpush3.bf16.msra.mxu0 %v4053_v28  ;;  %v4100_v28 = vld [vmem:[%s5161_s3 + $0x150] sm:$0xff]  }
  0x91   : > { %3749 = vmatpush3.bf16.msra.mxu1 %v4054_v29  ;;  %3574 = vmatprep.subr.bf16.mxu0 %v4225_v13  ;;  %v4101_v29 = vld [vmem:[%s5161_s3 + $0x158] sm:$0xff]  }
  0x92   : > { %3754 = vmatprep.subr.bf16.mxu1 %v4225_v13 }
  0x93   : > { %3571 = vmatmul.mubr.bf16.vlgmr.msra.gmra.mrb[0].mxu0 %v4544_v9  ;;  %v971_v9 = vshll.u32 %v4763_v1, 16 }
  0x94   : > { %3575 = vmatpush3.bf16.msra.mxu0 %v4056_v30  ;;  %3751 = vmatmul.mubr.bf16.vlgmr.msra.gmra.mrb[0].mxu1 %v4550_v11  ;;  %v2076_v11 = vshrl.u32 %v3220_v63, 16  ;;  %v4102_v30 = vld [vmem:[%s5161_s3 + $0x158] sm:$0xff]  }
  0x95   : > { %3755 = vmatpush3.bf16.msra.mxu1 %v4058_v31  ;;  %3576 = vmatprep.subr.bf16.mxu0 %v4225_v13  ;;  %v973_v17 = vrot.slane %v971_v9, 1  ;;  %v4103_v31 = vld [vmem:[%s5161_s3 + $0x160] sm:$0xff]   ;;  %v4127_v63 = vld [vmem:[%s5161_s3 + $0x1b8] sm:$0xff]  }
  0x96   : > { %3756 = vmatprep.subr.bf16.mxu1 %v4225_v13  ;;  %3590 = vmatprep.mubr.msk.bf16.mxu0 %vm4226_vm0, %v4225_v13  ;;  %v2081_v19 = vor.u32 %v2080_v12, %v2076_v11  ;;  %v4137_v9 = vld [vmem:[%s5161_s3 + $0x1d8] sm:$0xff]  }
  0x97   : > { %3770 = vmatprep.mubr.msk.bf16.mxu1 %vm4226_vm0, %v4225_v13  ;;  %v974_v21 = vsel %vm509_vm1, %v969_v16, %v973_v17  ;;  %v1299_v11 = vld [vmem:[%s4700_s7] sm:$0xf]  ;;  %v4976_v12 = vld [vmem:[%s4700_s7 + $0x4] sm:$0xf] }
  0x98   : > { %3577 = vmatpush3.bf16.msra.mxu0 %v4059_v32  ;;  %v2086_v23 = vsel %vm509_vm1, %v2081_v19, %v2085_v20  ;;  %v4104_v32 = vld [vmem:[%s5161_s3 + $0x160] sm:$0xff]   ;;  %v3074_v17 = vcombine.low %v1299_v11, %v4976_v12  ;;  %v4141_v20 = vld [vmem:[%s5161_s3 + $0x1e8] sm:$0xff]  }
  0x99   : > { %3757 = vmatpush3.bf16.msra.mxu1 %v4060_v33  ;;  %3578 = vmatprep.subr.bf16.mxu0 %v4225_v13  ;;  %v4105_v33 = vld [vmem:[%s5161_s3 + $0x168] sm:$0xff]   ;;  %v4139_v16 = vld [vmem:[%s5161_s3 + $0x1e0] sm:$0xff]  }
  0x9a   : > { %3758 = vmatprep.subr.bf16.mxu1 %v4225_v13 }
  0x9c   : > { %3579 = vmatpush3.bf16.msra.mxu0 %v4061_v34  ;;  %v4106_v34 = vld [vmem:[%s5161_s3 + $0x168] sm:$0xff]  }
  0x9d   : > { %3759 = vmatpush3.bf16.msra.mxu1 %v4062_v35  ;;  %3580 = vmatprep.subr.bf16.mxu0 %v4225_v13  ;;  %v1067_v35 = vld [vmem:[%s4580_s11] sm:$0xe] }
  0x9e   : > { %3760 = vmatprep.subr.bf16.mxu1 %v4225_v13 }
  0xa0   : > { %3581 = vmatpush3.bf16.msra.mxu0 %v4063_v36  ;;  %v3230_v36 = vld [vmem:[%s4580_s11 + $0xc] sm:$0xe]  ;;  %s3351_s11 = sshll.u32 (%p4348_p11), %s4293_s25, 3 }
  0xa1   : > { %3761 = vmatpush3.bf16.msra.mxu1 %v4064_v37  ;;  %3582 = vmatprep.subr.bf16.mxu0 %v4225_v13  ;;  %v4107_v37 = vld [vmem:[%s5161_s3 + $0x170] sm:$0xff]   ;;  %s2705_s24 = scalar_lea.vmem (%p4348_p11), %s5162_s4, %s3351_s11 }
  0xa2   : > { %3762 = vmatprep.subr.bf16.mxu1 %v4225_v13 }
  0xa4   : > { %3583 = vmatpush3.bf16.msra.mxu0 %v4065_v38  ;;  %v3024_v38 = vcombine.low %v1067_v35, %v4741_v57  ;;  %v4121_v57 = vld [vmem:[%s5161_s3 + $0x1a0] sm:$0xff]  }
  0xa5   : > { %3763 = vmatpush3.bf16.msra.mxu1 %v4066_v39  ;;  %3584 = vmatprep.subr.bf16.mxu0 %v4225_v13  ;;  %v4108_v39 = vld [vmem:[%s5161_s3 + $0x170] sm:$0xff]  }
  0xa6   : > { %3764 = vmatprep.subr.bf16.mxu1 %v4225_v13 }
  0xa8   : > { %3585 = vmatpush3.bf16.msra.mxu0 %v4067_v40  ;;  %v3247_v40 = vcombine.low %v3230_v36, %v4747_v59  ;;  %v4123_v59 = vld [vmem:[%s5161_s3 + $0x1a8] sm:$0xff]  }
  0xa9   : > { %3765 = vmatpush3.bf16.msra.mxu1 %v4068_v41  ;;  %3586 = vmatprep.subr.bf16.mxu0 %v4225_v13  ;;  %v4109_v41 = vld [vmem:[%s5161_s3 + $0x178] sm:$0xff]  }
  0xaa   : > { %3766 = vmatprep.subr.bf16.mxu1 %v4225_v13 }
  0xac   : > { %3587 = vmatpush3.bf16.msra.mxu0 %v4069_v42  ;;  %v1088_v42 = vrot.slane %v3024_v38, 1 }
  0xad   : > { %3767 = vmatpush3.bf16.msra.mxu1 %v4070_v43  ;;  %3588 = vmatprep.subr.bf16.mxu0 %v4225_v13  ;;  %v1089_v43 = vrot.slane %v4763_v1, 1  ;;  %v4129_v1 = vld [vmem:[%s4700_s7] sm:$0xff]  }
  0xae   : > { %3768 = vmatprep.subr.bf16.mxu1 %v4225_v13 }
  0xb0   : > { %3589 = vmatpush3.bf16.msra.mxu0 %v4071_v44  ;;  %v4110_v44 = vld [vmem:[%s5161_s3 + $0x178] sm:$0xff]  }
  0xb1   : > { %3769 = vmatpush3.bf16.msra.mxu1 %v4072_v45  ;;  %3594 = vmatprep.subr.bf16.mxu0 %v4225_v13  ;;  %v2199_v45 = vrot.slane %v3247_v40, 1 }
  0xb2   : > { %3774 = vmatprep.subr.bf16.mxu1 %v4225_v13 }
  0xb3   : > { %3591 = vmatmul.mubr.bf16.vlgmr.msra.gmra.mrb[0].mxu0 %v4073_v46  ;;  %v2200_v46 = vrot.slane %v4770_v4, 1  ;;  %v4132_v4 = vld [vmem:[%s5161_s3 + $0x1c0] sm:$0xff]  }
  0xb4   : > { %3595 = vmatpush3.bf16.msra.mxu0 %v4074_v47  ;;  %3771 = vmatmul.mubr.bf16.vlgmr.msra.gmra.mrb[0].mxu1 %v4075_v48  ;;  %v1090_v47 = vsel %vm723_vm2, %v1088_v42, %v1089_v43  ;;  %v4112_v48 = vld [vmem:[%s5161_s3 + $0x180] sm:$0xff]  }
  0xb5   : > { %3775 = vmatpush3.bf16.msra.mxu1 %v4076_v49  ;;  %3596 = vmatprep.subr.bf16.mxu0 %v4225_v13  ;;  %v2201_v49 = vsel %vm723_vm2, %v2199_v45, %v2200_v46  ;;  %v4152_v43 = vld [vmem:[%s5161_s3 + $0x200] sm:$0xff]   ;;  %v4154_v45 = vld [vmem:[%s5161_s3 + $0x208] sm:$0xff]   ;;  %v4155_v46 = vld [vmem:[%s5161_s3 + $0x210] sm:$0xff]  }
  0xb6   : > { %3776 = vmatprep.subr.bf16.mxu1 %v4225_v13  ;;  %3610 = vmatprep.mubr.msk.bf16.mxu0 %vm4226_vm0, %v4225_v13 }
  0xb7   : > { %3790 = vmatprep.mubr.msk.bf16.mxu1 %vm4226_vm0, %v4225_v13 }
  0xb8   : > { %3597 = vmatpush3.bf16.msra.mxu0 %v4077_v50  ;;  %v4114_v50 = vld [vmem:[%s5161_s3 + $0x180] sm:$0xff]  }
  0xb9   : > { %3777 = vmatpush3.bf16.msra.mxu1 %v4078_v51  ;;  %3598 = vmatprep.subr.bf16.mxu0 %v4225_v13  ;;  %v4115_v51 = vld [vmem:[%s5161_s3 + $0x188] sm:$0xff]  }
  0xba   : > { %3778 = vmatprep.subr.bf16.mxu1 %v4225_v13 }
  0xbc   : > { %3599 = vmatpush3.bf16.msra.mxu0 %v4079_v52  ;;  %v4116_v52 = vld [vmem:[%s5161_s3 + $0x188] sm:$0xff]  }
  0xbd   : > { %3779 = vmatpush3.bf16.msra.mxu1 %v4080_v53  ;;  %3600 = vmatprep.subr.bf16.mxu0 %v4225_v13  ;;  %v4117_v53 = vld [vmem:[%s5161_s3 + $0x190] sm:$0xff]  }
  0xbe   : > { %3780 = vmatprep.subr.bf16.mxu1 %v4225_v13 }
  0xc0   : > { %3601 = vmatpush3.bf16.msra.mxu0 %v4081_v54  ;;  %v4118_v54 = vld [vmem:[%s5161_s3 + $0x190] sm:$0xff]  }
  0xc1   : > { %3781 = vmatpush3.bf16.msra.mxu1 %v4082_v55  ;;  %3602 = vmatprep.subr.bf16.mxu0 %v4225_v13  ;;  %v4119_v55 = vld [vmem:[%s5161_s3 + $0x198] sm:$0xff]  }
  0xc2   : > { %3782 = vmatprep.subr.bf16.mxu1 %v4225_v13 }
  0xc4   : > { %3603 = vmatpush3.bf16.msra.mxu0 %v4083_v60  ;;  %v4124_v60 = vld [vmem:[%s5161_s3 + $0x1a8] sm:$0xff]  }
  0xc5   : > { %3783 = vmatpush3.bf16.msra.mxu1 %v4084_v62  ;;  %3604 = vmatprep.subr.bf16.mxu0 %v4225_v13  ;;  %v4126_v62 = vld [vmem:[%s5161_s3 + $0x1b0] sm:$0xff]  }
  0xc6   : > { %3784 = vmatprep.subr.bf16.mxu1 %v4225_v13 }
  0xc8   : > { %3605 = vmatpush3.bf16.msra.mxu0 %v4085_v0  ;;  %v4128_v0 = vld [vmem:[%s5161_s3 + $0x1b8] sm:$0xff]  }
  0xc9   : > { %3785 = vmatpush3.bf16.msra.mxu1 %v4086_v2  ;;  %3606 = vmatprep.subr.bf16.mxu0 %v4225_v13  ;;  %v4130_v2 = vld [vmem:[%s5161_s3 + $0x1c0] sm:$0xff]  }
  0xca   : > { %3786 = vmatprep.subr.bf16.mxu1 %v4225_v13 }
  0xcc   : > { %3607 = vmatpush3.bf16.msra.mxu0 %v4087_v6  ;;  %v4134_v6 = vld [vmem:[%s5161_s3 + $0x1c8] sm:$0xff]  }
  0xcd   : > { %3787 = vmatpush3.bf16.msra.mxu1 %v4088_v7  ;;  %3608 = vmatprep.subr.bf16.mxu0 %v4225_v13  ;;  %v4135_v7 = vld [vmem:[%s5161_s3 + $0x1d0] sm:$0xff]  }
  0xce   : > { %3788 = vmatprep.subr.bf16.mxu1 %v4225_v13 }
  0xd0   : > { %3609 = vmatpush3.bf16.msra.mxu0 %v4089_v15  ;;  %v4981_v15 = vld [vmem:[%s4700_s7 + $0x10] sm:$0xf] }
  0xd1   : > { %3789 = vmatpush3.bf16.msra.mxu1 %v4090_v18  ;;  %3614 = vmatprep.subr.bf16.mxu0 %v4225_v13  ;;  %v4140_v18 = vld [vmem:[%s5161_s3 + $0x1e0] sm:$0xff]   ;;  %v3302_v19 = vcombine.low %v3283_v14, %v4981_v15 }
  0xd2   : > { %3794 = vmatprep.subr.bf16.mxu1 %v4225_v13 }
  0xd3   : > { %3611 = vmatmul.mubr.bf16.vlgmr.msra.gmra.mrb[0].mxu0 %v974_v21  ;;  %v4997_v21 = vld [vmem:[%s4700_s7 + $0x8] ss:$0 sps:$4 sm:$0x11]  }
  0xd4   : > { %3615 = vmatpush3.bf16.msra.mxu0 %v4093_v22  ;;  %3791 = vmatmul.mubr.bf16.vlgmr.msra.gmra.mrb[0].mxu1 %v2086_v23  ;;  %v1330_v22 = vshll.u32 %v3074_v17, 16  ;;  %v4142_v23 = vld [vmem:[%s5161_s3 + $0x1e8] sm:$0xff]  }
  0xd5   : > { %3795 = vmatpush3.bf16.msra.mxu1 %v4096_v24  ;;  %3616 = vmatprep.subr.bf16.mxu0 %v4225_v13  ;;  %v5004_v24 = vld [vmem:[%s4700_s7 + $0x14] ss:$0 sps:$4 sm:$0x11]  }
  0xd6   : > { %3796 = vmatprep.subr.bf16.mxu1 %v4225_v13  ;;  %3630 = vmatprep.mubr.msk.bf16.mxu0 %vm4226_vm0, %v4225_v13 }
  0xd7   : > { %3810 = vmatprep.mubr.msk.bf16.mxu1 %vm4226_vm0, %v4225_v13 }
  0xd8   : > { %3617 = vmatpush3.bf16.msra.mxu0 %v4097_v25  ;;  %v2440_v25 = vshll.u32 %v3302_v19, 16 }
  0xd9   : > { %3797 = vmatpush3.bf16.msra.mxu1 %v4098_v26  ;;  %3618 = vmatprep.subr.bf16.mxu0 %v4225_v13  ;;  %v4143_v26 = vld [vmem:[%s5161_s3 + $0x1f0] sm:$0xff]  }
  0xda   : > { %3798 = vmatprep.subr.bf16.mxu1 %v4225_v13 }
  0xdc   : > { %3619 = vmatpush3.bf16.msra.mxu0 %v4099_v27  ;;  %v1328_v27 = vshrl.u32 %v3074_v17, 16 }
  0xdd   : > { %3799 = vmatpush3.bf16.msra.mxu1 %v4100_v28  ;;  %3620 = vmatprep.subr.bf16.mxu0 %v4225_v13  ;;  %v1332_v28 = vrot.slane %v1330_v22, 1 }
  0xde   : > { %3800 = vmatprep.subr.bf16.mxu1 %v4225_v13 }
  0xdf   : > { %v1333_v35 = vor.u32 %v1332_v28, %v1328_v27 }
  0xe0   : > { %3621 = vmatpush3.bf16.msra.mxu0 %v4101_v29  ;;  %v1335_v29 = vshll.u32 %v4997_v21, 16 }
  0xe1   : > { %3801 = vmatpush3.bf16.msra.mxu1 %v4102_v30  ;;  %3622 = vmatprep.subr.bf16.mxu0 %v4225_v13  ;;  %v4144_v30 = vld [vmem:[%s5161_s3 + $0x1f0] sm:$0xff]  }
  0xe2   : > { %3802 = vmatprep.subr.bf16.mxu1 %v4225_v13  ;;  %v1337_v36 = vrot.slane %v1335_v29, 1 }
  0xe4   : > { %3623 = vmatpush3.bf16.msra.mxu0 %v4103_v31  ;;  %v2438_v31 = vshrl.u32 %v3302_v19, 16  ;;  %v1338_v40 = vsel %vm509_vm1, %v1333_v35, %v1337_v36 }
  0xe5   : > { %3803 = vmatpush3.bf16.msra.mxu1 %v4104_v32  ;;  %3624 = vmatprep.subr.bf16.mxu0 %v4225_v13  ;;  %v2442_v32 = vrot.slane %v2440_v25, 1 }
  0xe6   : > { %3804 = vmatprep.subr.bf16.mxu1 %v4225_v13 }
  0xe7   : > { %v2443_v38 = vor.u32 %v2442_v32, %v2438_v31 }
  0xe8   : > { %3625 = vmatpush3.bf16.msra.mxu0 %v4105_v33  ;;  %v2445_v33 = vshll.u32 %v5004_v24, 16 }
  0xe9   : > { %3805 = vmatpush3.bf16.msra.mxu1 %v4106_v34  ;;  %3626 = vmatprep.subr.bf16.mxu0 %v4225_v13  ;;  %v4145_v34 = vld [vmem:[%s5161_s3 + $0x1f8] sm:$0xff]  }
  0xea   : > { %3806 = vmatprep.subr.bf16.mxu1 %v4225_v13 }
  0xec   : > { %3627 = vmatpush3.bf16.msra.mxu0 %v4107_v37  ;;  %v4146_v37 = vld [vmem:[%s5161_s3 + $0x1f8] sm:$0xff]  }
  0xed   : > { %3807 = vmatpush3.bf16.msra.mxu1 %v4108_v39  ;;  %3628 = vmatprep.subr.bf16.mxu0 %v4225_v13  ;;  %v2447_v39 = vrot.slane %v2445_v33, 1 }
  0xee   : > { %3808 = vmatprep.subr.bf16.mxu1 %v4225_v13 }
  0xef   : > { %v2448_v42 = vsel %vm509_vm1, %v2443_v38, %v2447_v39 }
  0xf0   : > { %3629 = vmatpush3.bf16.msra.mxu0 %v4109_v41  ;;  %v4149_v41 = vld [vmem:[%s5161_s3 + $0x200] sm:$0xff]  }
  0xf1   : > { %3809 = vmatpush3.bf16.msra.mxu1 %v4110_v44  ;;  %3634 = vmatprep.subr.bf16.mxu0 %v4225_v13  ;;  %v4153_v44 = vld [vmem:[%s5161_s3 + $0x208] sm:$0xff]  }
  0xf2   : > { %3814 = vmatprep.subr.bf16.mxu1 %v4225_v13 }
  0xf3   : > { %3631 = vmatmul.mubr.bf16.vlgmr.msra.gmra.mrb[0].mxu0 %v1090_v47  ;;  %v4156_v47 = vld [vmem:[%s5161_s3 + $0x210] sm:$0xff]  }
  0xf4   : > { %3635 = vmatpush3.bf16.msra.mxu0 %v4112_v48  ;;  %3811 = vmatmul.mubr.bf16.vlgmr.msra.gmra.mrb[0].mxu1 %v2201_v49  ;;  %v4157_v48 = vld [vmem:[%s5161_s3 + $0x218] sm:$0xff]  }
  0xf5   : > { %3815 = vmatpush3.bf16.msra.mxu1 %v4114_v50  ;;  %3636 = vmatprep.subr.bf16.mxu0 %v4225_v13  ;;  %v4158_v49 = vld [vmem:[%s5161_s3 + $0x218] sm:$0xff]   ;;  %v4159_v50 = vld [vmem:[%s5161_s3 + $0x220] sm:$0xff]  }
  0xf6   : > { %3816 = vmatprep.subr.bf16.mxu1 %v4225_v13  ;;  %3650 = vmatprep.mubr.msk.bf16.mxu0 %vm4226_vm0, %v4225_v13 }
  0xf7   : > { %3830 = vmatprep.mubr.msk.bf16.mxu1 %vm4226_vm0, %v4225_v13 }
  0xf8   : > { %3637 = vmatpush3.bf16.msra.mxu0 %v4115_v51  ;;  %v4160_v51 = vld [vmem:[%s5161_s3 + $0x220] sm:$0xff]  }
  0xf9   : > { %3817 = vmatpush3.bf16.msra.mxu1 %v4116_v52  ;;  %3638 = vmatprep.subr.bf16.mxu0 %v4225_v13  ;;  %v4161_v52 = vld [vmem:[%s5161_s3 + $0x228] sm:$0xff]  }
  0xfa   : > { %3818 = vmatprep.subr.bf16.mxu1 %v4225_v13 }
  0xfc   : > { %3639 = vmatpush3.bf16.msra.mxu0 %v4117_v53  ;;  %v4162_v53 = vld [vmem:[%s5161_s3 + $0x228] sm:$0xff]  }
  0xfd   : > { %3819 = vmatpush3.bf16.msra.mxu1 %v4118_v54  ;;  %3640 = vmatprep.subr.bf16.mxu0 %v4225_v13  ;;  %v1431_v54 = vld [vmem:[%s4700_s7] sm:$0xe] }
  0xfe   : > { %3820 = vmatprep.subr.bf16.mxu1 %v4225_v13 }
 0x100   : > { %3641 = vmatpush3.bf16.msra.mxu0 %v4119_v55  ;;  %v3312_v55 = vld [vmem:[%s4700_s7 + $0xc] sm:$0xe] }
 0x101   : > { %3821 = vmatpush3.bf16.msra.mxu1 %v4120_v56  ;;  %3642 = vmatprep.subr.bf16.mxu0 %v4225_v13  ;;  %v4163_v56 = vld [vmem:[%s5161_s3 + $0x230] sm:$0xff]  }
 0x102   : > { %3822 = vmatprep.subr.bf16.mxu1 %v4225_v13 }
 0x104   : > { %3643 = vmatpush3.bf16.msra.mxu0 %v4121_v57  ;;  %v3100_v57 = vcombine.low %v1431_v54, %v4976_v12 }
 0x105   : > { %3823 = vmatpush3.bf16.msra.mxu1 %v4122_v58  ;;  %3644 = vmatprep.subr.bf16.mxu0 %v4225_v13  ;;  %v4164_v58 = vld [vmem:[%s5161_s3 + $0x230] sm:$0xff]  }
 0x106   : > { %3824 = vmatprep.subr.bf16.mxu1 %v4225_v13 }
 0x108   : > { %3645 = vmatpush3.bf16.msra.mxu0 %v4123_v59  ;;  %v3329_v59 = vcombine.low %v3312_v55, %v4981_v15 }
 0x109   : > { %3825 = vmatpush3.bf16.msra.mxu1 %v4124_v60  ;;  %3646 = vmatprep.subr.bf16.mxu0 %v4225_v13  ;;  %v4165_v60 = vld [vmem:[%s5161_s3 + $0x238] sm:$0xff]  }
 0x10a   : > { %3826 = vmatprep.subr.bf16.mxu1 %v4225_v13 }
 0x10c   : > { %3647 = vmatpush3.bf16.msra.mxu0 %v4125_v61  ;;  %v1452_v61 = vrot.slane %v3100_v57, 1 }
 0x10d   : > { %3827 = vmatpush3.bf16.msra.mxu1 %v4126_v62  ;;  %3648 = vmatprep.subr.bf16.mxu0 %v4225_v13  ;;  %v1453_v62 = vrot.slane %v4997_v21, 1 }
 0x10e   : > { %3828 = vmatprep.subr.bf16.mxu1 %v4225_v13 }
 0x110   : > { %3649 = vmatpush3.bf16.msra.mxu0 %v4127_v63  ;;  %v4166_v63 = vld [vmem:[%s5161_s3 + $0x238] sm:$0xff]  }
 0x111   : > { %3829 = vmatpush3.bf16.msra.mxu1 %v4128_v0  ;;  %3654 = vmatprep.subr.bf16.mxu0 %v4225_v13  ;;  %v2561_v0 = vrot.slane %v3329_v59, 1 }
 0x112   : > { %3834 = vmatprep.subr.bf16.mxu1 %v4225_v13 }
 0x113   : > { %3651 = vmatmul.mubr.bf16.vlgmr.msra.gmra.mrb[0].mxu0 %v4129_v1  ;;  %v2562_v1 = vrot.slane %v5004_v24, 1 }
 0x114   : > { %3655 = vmatpush3.bf16.msra.mxu0 %v4130_v2  ;;  %3831 = vmatmul.mubr.bf16.vlgmr.msra.gmra.mrb[0].mxu1 %v4131_v3  ;;  %v1454_v2 = vsel %vm723_vm2, %v1452_v61, %v1453_v62 }
 0x115   : > { %3835 = vmatpush3.bf16.msra.mxu1 %v4132_v4  ;;  %3656 = vmatprep.subr.bf16.mxu0 %v4225_v13  ;;  %v2563_v3 = vsel %vm723_vm2, %v2561_v0, %v2562_v1 }
 0x116   : > { %3836 = vmatprep.subr.bf16.mxu1 %v4225_v13  ;;  %3670 = vmatprep.mubr.msk.bf16.mxu0 %vm4226_vm0, %v4225_v13 }
 0x117   : > { %3850 = vmatprep.mubr.msk.bf16.mxu1 %vm4226_vm0, %v4225_v13 }
 0x118   : > { %3657 = vmatpush3.bf16.msra.mxu0 %v4133_v5 }
 0x119   : > { %3837 = vmatpush3.bf16.msra.mxu1 %v4134_v6  ;;  %3658 = vmatprep.subr.bf16.mxu0 %v4225_v13 }
 0x11a   : > { %3838 = vmatprep.subr.bf16.mxu1 %v4225_v13 }
 0x11c   : > { %3659 = vmatpush3.bf16.msra.mxu0 %v4135_v7 }
 0x11d   : > { %3839 = vmatpush3.bf16.msra.mxu1 %v4136_v8  ;;  %3660 = vmatprep.subr.bf16.mxu0 %v4225_v13 }
 0x11e   : > { %3840 = vmatprep.subr.bf16.mxu1 %v4225_v13 }
 0x120   : > { %3661 = vmatpush3.bf16.msra.mxu0 %v4137_v9 }
 0x121   : > { %3841 = vmatpush3.bf16.msra.mxu1 %v4138_v10  ;;  %3662 = vmatprep.subr.bf16.mxu0 %v4225_v13 }
 0x122   : > { %3842 = vmatprep.subr.bf16.mxu1 %v4225_v13 }
 0x124   : > { %3663 = vmatpush3.bf16.msra.mxu0 %v4139_v16 }
 0x125   : > { %3843 = vmatpush3.bf16.msra.mxu1 %v4140_v18  ;;  %3664 = vmatprep.subr.bf16.mxu0 %v4225_v13 }
 0x126   : > { %3844 = vmatprep.subr.bf16.mxu1 %v4225_v13 }
 0x128   : > { %3665 = vmatpush3.bf16.msra.mxu0 %v4141_v20 }
 0x129   : > { %3845 = vmatpush3.bf16.msra.mxu1 %v4142_v23  ;;  %3666 = vmatprep.subr.bf16.mxu0 %v4225_v13 }
 0x12a   : > { %3846 = vmatprep.subr.bf16.mxu1 %v4225_v13 }
 0x12c   : > { %3667 = vmatpush3.bf16.msra.mxu0 %v4143_v26 }
 0x12d   : > { %3847 = vmatpush3.bf16.msra.mxu1 %v4144_v30  ;;  %3668 = vmatprep.subr.bf16.mxu0 %v4225_v13 }
 0x12e   : > { %3848 = vmatprep.subr.bf16.mxu1 %v4225_v13 }
 0x130   : > { %3669 = vmatpush3.bf16.msra.mxu0 %v4145_v34 }
 0x131   : > { %3849 = vmatpush3.bf16.msra.mxu1 %v4146_v37  ;;  %3674 = vmatprep.subr.bf16.mxu0 %v4225_v13 }
 0x132   : > { %3854 = vmatprep.subr.bf16.mxu1 %v4225_v13 }
 0x133   : > { %3671 = vmatmul.mubr.bf16.vlgmr.msra.gmra.mrb[0].mxu0 %v1338_v40 }
 0x134   : > { %3675 = vmatpush3.bf16.msra.mxu0 %v4149_v41  ;;  %3851 = vmatmul.mubr.bf16.vlgmr.msra.gmra.mrb[0].mxu1 %v2448_v42 }
 0x135   : > { %3855 = vmatpush3.bf16.msra.mxu1 %v4152_v43  ;;  %3676 = vmatprep.subr.bf16.mxu0 %v4225_v13 }
 0x136   : > { %3856 = vmatprep.subr.bf16.mxu1 %v4225_v13  ;;  %3690 = vmatprep.mubr.msk.bf16.mxu0 %vm4226_vm0, %v4225_v13 }
 0x137   : > { %3870 = vmatprep.mubr.msk.bf16.mxu1 %vm4226_vm0, %v4225_v13 }
 0x138   : > { %3677 = vmatpush3.bf16.msra.mxu0 %v4153_v44 }
 0x139   : > { %3857 = vmatpush3.bf16.msra.mxu1 %v4154_v45  ;;  %3678 = vmatprep.subr.bf16.mxu0 %v4225_v13 }
 0x13a   : > { %3858 = vmatprep.subr.bf16.mxu1 %v4225_v13 }
 0x13c   : > { %3679 = vmatpush3.bf16.msra.mxu0 %v4155_v46 }
 0x13d   : > { %3859 = vmatpush3.bf16.msra.mxu1 %v4156_v47  ;;  %3680 = vmatprep.subr.bf16.mxu0 %v4225_v13 }
 0x13e   : > { %3860 = vmatprep.subr.bf16.mxu1 %v4225_v13 }
 0x140   : > { %3681 = vmatpush3.bf16.msra.mxu0 %v4157_v48 }
 0x141   : > { %3861 = vmatpush3.bf16.msra.mxu1 %v4158_v49  ;;  %3682 = vmatprep.subr.bf16.mxu0 %v4225_v13 }
 0x142   : > { %3862 = vmatprep.subr.bf16.mxu1 %v4225_v13 }
 0x144   : > { %3683 = vmatpush3.bf16.msra.mxu0 %v4159_v50 }
 0x145   : > { %3863 = vmatpush3.bf16.msra.mxu1 %v4160_v51  ;;  %3684 = vmatprep.subr.bf16.mxu0 %v4225_v13 }
 0x146   : > { %3864 = vmatprep.subr.bf16.mxu1 %v4225_v13 }
 0x148   : > { %3685 = vmatpush3.bf16.msra.mxu0 %v4161_v52 }
 0x149   : > { %3865 = vmatpush3.bf16.msra.mxu1 %v4162_v53  ;;  %3686 = vmatprep.subr.bf16.mxu0 %v4225_v13 }
 0x14a   : > { %3866 = vmatprep.subr.bf16.mxu1 %v4225_v13 }
 0x14c   : > { %3687 = vmatpush3.bf16.msra.mxu0 %v4163_v56 }
 0x14d   : > { %3867 = vmatpush3.bf16.msra.mxu1 %v4164_v58  ;;  %3688 = vmatprep.subr.bf16.mxu0 %v4225_v13 }
 0x14e   : > { %3868 = vmatprep.subr.bf16.mxu1 %v4225_v13 }
 0x150   : > { %3689 = vmatpush3.bf16.msra.mxu0 %v4165_v60 }
 0x151   : > { %3869 = vmatpush3.bf16.msra.mxu1 %v4166_v63 }
 0x153   : > { %3691 = vmatmul.mubr.bf16.vlgmr.msra.gmra.mrb[0].mxu0 %v1454_v2 }
 0x154   : > { %3871 = vmatmul.mubr.bf16.vlgmr.msra.gmra.mrb[0].mxu1 %v2563_v3 }
 0x226   : > { %v1538_v4 = vpop.f32.mrb[0].mxu0 }
 0x227   : > { %v3347_v5 = vpack.c.bf16 %v1538_v4, %v1538_v4  ;;  %v1569_v6 = vmul.f32 %v1538_v4, %v1538_v4  ;;  %v2647_v7 = vpop.f32.mrb[0].mxu1  ;;  %v3692_v8 = vpop.f32.mrb[1].mxu0  ;;  %v1559_v9 = vsel %vm1558_vm3, %v1538_v4, 0.0 }
 0x228   : > { %v3349_v13 = vpack.c.bf16 %v2647_v7, %v2647_v7  ;;  %v3872_v10 = vpop.f32.mrb[1].mxu1  ;;  %v1541_v11 = vpop.f32.mrb[2].mxu0  ;;  %v2677_v12 = vmul.f32 %v2647_v7, %v2647_v7  ;;  %v2667_v19 = vsel %vm1558_vm3, %v2647_v7, 0.0 }
 0x229   : > { %1556 = vst.msk [vmem:[%s5106_s18] sm:$0xf] %vm1555_vm4, %v3347_v5  ;;  %v3348_v14 = vpack.c.bf16 %v1541_v11, %v1541_v11  ;;  %v1560_v15 = vsel %vm1558_vm3, %v1541_v11, 0.0  ;;  %v1570_v16 = vmul.f32 %v1541_v11, %v1541_v11  ;;  %v2650_v17 = vpop.f32.mrb[2].mxu1  ;;  %v3693_v18 = vpop.f32.mrb[3].mxu0  ;;  %v1571_v24 = vsel %vm1558_vm3, %v1569_v6, 0.0 }
 0x22a   : > { %3340 = vst.msk [vmem:[%s5106_s18 + $0x8] sm:$0xf] %vm1555_vm4, %v3349_v13  ;;  %v1561_v20 = vadd.f32 %v1560_v15, %v1559_v9  ;;  %v3350_v21 = vpack.c.bf16 %v2650_v17, %v2650_v17  ;;  %v2668_v22 = vsel %vm1558_vm3, %v2650_v17, 0.0  ;;  %v3873_v23 = vpop.f32.mrb[3].mxu1  ;;  %v2678_v27 = vmul.f32 %v2650_v17, %v2650_v17 }
 0x22b   : > { %1557 = vst.msk [vmem:[%s5106_s18 + $0x4] sm:$0xf] %vm1555_vm4, %v3348_v14  ;;  %v1572_v25 = vsel %vm1558_vm3, %v1570_v16, 0.0  ;;  %v2669_v26 = vadd.f32 %v2668_v22, %v2667_v19  ;;  %v2679_v30 = vsel %vm1558_vm3, %v2677_v12, 0.0 }
 0x22c   : > { %v1562_v28 = vrot.slane %v1561_v20, 4  ;;  %v1573_v29 = vadd.f32 %v1572_v25, %v1571_v24  ;;  %3341 = vst.msk [vmem:[%s5106_s18 + $0xc] sm:$0xf] %vm1555_vm4, %v3350_v21  ;;  %v2680_v32 = vsel %vm1558_vm3, %v2678_v27, 0.0 }
 0x22d   : > { %v2670_v31 = vrot.slane %v2669_v26, 4  ;;  %v2681_v35 = vadd.f32 %v2680_v32, %v2679_v30 }
 0x22e   : > { %v1563_v33 = vadd.f32 %v1562_v28, %v1561_v20  ;;  %v1574_v34 = vrot.slane %v1573_v29, 4 }
 0x22f   : > { %v2671_v36 = vadd.f32 %v2670_v31, %v2669_v26  ;;  %v2682_v39 = vrot.slane %v2681_v35, 4 }
 0x230   : > { %v1564_v37 = vrot.slane %v1563_v33, 2  ;;  %v1575_v38 = vadd.f32 %v1574_v34, %v1573_v29 }
 0x231   : > { %v2672_v40 = vrot.slane %v2671_v36, 2  ;;  %v2683_v43 = vadd.f32 %v2682_v39, %v2681_v35 }
 0x232   : > { %v1565_v41 = vadd.f32 %v1564_v37, %v1563_v33  ;;  %v1576_v42 = vrot.slane %v1575_v38, 2  ;;  %v2721_v58 = vld [vmem:[%s5106_s18] sm:$0xff] (%p4348_p11)  }
 0x233   : > { %v2673_v44 = vadd.f32 %v2672_v40, %v2671_v36  ;;  %v2684_v47 = vrot.slane %v2683_v43, 2  ;;  %v2725_v59 = vld [vmem:[%s5106_s18 + $0x8] sm:$0xff] (%p4348_p11)   ;;  %2722 = vst [vmem:[%s2705_s24] sm:$0xff] (%p4348_p11), %v2721_v58  }
 0x234   : > { %v1566_v45 = vrot.slane %v1565_v41, 1  ;;  %v1577_v46 = vadd.f32 %v1576_v42, %v1575_v38  ;;  %2726 = vst [vmem:[%s2705_s24 + $0x80] sm:$0xff] (%p4348_p11), %v2725_v59  }
 0x235   : > { %v2674_v48 = vrot.slane %v2673_v44, 1  ;;  %v2685_v51 = vadd.f32 %v2684_v47, %v2683_v43 }
 0x236   : > { %v1567_v49 = vadd.f32 %v1566_v45, %v1565_v41  ;;  %v1578_v50 = vrot.slane %v1577_v46, 1 }
 0x237   : > { %v2675_v52 = vadd.f32 %v2674_v48, %v2673_v44  ;;  %v2686_v54 = vrot.slane %v2685_v51, 1  ;;  %2702 = sbr.rel (!%p4348_p11) target bundleno = 574 (0x23e), region = 163 }
 0x238   : > { %v1579_v53 = vadd.f32 %v1578_v50, %v1577_v46 }
 0x239   : > { %v2676_v55 = vadd.f32 %v2675_v52, %v1567_v49  ;;  %v2687_v56 = vadd.f32 %v2686_v54, %v2685_v51 }
 0x23b   : > { %2690 = vst.msk [vmem:[%s463_s20] sm:$0x1] %vm2689_vm5, %v2676_v55  ;;  %v2688_v57 = vadd.f32 %v2687_v56, %v1579_v53 }
 0x23d   : > { %2691 = vst.msk [vmem:[%s463_s20 + $0x1] sm:$0x1] %vm2689_vm5, %v2688_v57 }
 0x23e PF: > { %p13_p3 = scmp.ge.s32.totalorder %s4296_s26, 18   ;;  %s5168_s18 = smov %s4203_s19 }
 0x23f   : > { %s5169_s19 = smov %s4337_s15  ;;  %s5170_s20 = smov %s4211_s21 }
 0x240   : > { %s5171_s21 = smov %s4323_s10  ;;  %s5172_s22 = smov %s4219_s23 }
 0x241   : > { %s5173_s23 = smov %s4306_s30  ;;  %s5174_s24 = smov %s4296_s26 }
 0x242   :  { %15 = sbr.rel (!%p13_p3) target bundleno = 4 (0x4), region = 275 }

// kernel: decoding_conv_block_elu.5
= control target key start
LH: loop header
LB: loop body
LE: loop exit
PB: predicated region body
PF: predicated region fallthrough
CT: control target
= control target key end

     0   :  { %s3213_s18 = smov 0   ;;  %s3215_s19 = smov 0   ;;  %s3832_s0 = inlined_call_operand.vmem [shape: bf16[2,18,18,64], index: 0, kind: input, shape index: {}, may-alias: {0,1,2}]   ;;  %s3833_s1 = inlined_call_operand.vmem [shape: bf16[2,18,18,64], index: 1, kind: input, shape index: {}, may-alias: {0,1,2}]   ;;  %s3834_s2 = inlined_call_operand.vmem [shape: bf16[2,18,18,64], index: 2, kind: input, shape index: {}, may-alias: {0,1,2}]   ;;  %s3835_s3 = inlined_call_operand.vmem [shape: bf16[3,3,64,64], index: 3, kind: input, shape index: {}]   ;;  %s3836_s4 = inlined_call_operand.vmem [shape: f32[2,16,16,64], index: 4, kind: output, shape index: {0}]   ;;  %s3837_s5 = inlined_call_operand.vmem [shape: f32[16,2,64], index: 5, kind: output, shape index: {1}]  }
   0x1   :  { %s3217_s20 = smov 0   ;;  %s3219_s21 = smov 0  }
   0x2   :  { %s3221_s22 = smov 0   ;;  %s3223_s23 = smov 0  }
   0x3   :  { %s3225_s24 = smov 0  }
   0x4 LB: > { %s3249_s25 = sadd.s32 4294967295, %s3179_s24   ;;  %s3252_s26 = sadd.s32 1, %s3179_s24   ;;  %s3179_s24 = sphi %s3225_s24, %s3848_s24   ;;  %s3175_s23 = sphi %s3223_s23, %s3847_s23   ;;  %s3171_s22 = sphi %s3221_s22, %s3846_s22   ;;  %s3167_s21 = sphi %s3219_s21, %s3845_s21   ;;  %s3163_s20 = sphi %s3217_s20, %s3844_s20   ;;  %s3159_s19 = sphi %s3215_s19, %s3843_s19   ;;  %s3155_s18 = sphi %s3213_s18, %s3842_s18  }
   0x5   : > { %s20_s27 = ssub.s32 %s3179_s24, %s3252_s26  ;;  %s23_s28 = sadd.s32 1, %s3175_s23 }
   0x6   : > { %p21_p0 = scmp.eq.s32.totalorder %s20_s27, 0  ;;  %p30_p1 = scmp.ne.s32.totalorder %s3175_s23, %s3171_s22 }
   0x7   : > { %p31_p2 = scmp.eq.s32.totalorder %s3179_s24, 0  ;;  %s47_s29 = sadd.s32 1, %s3252_s26 }
   0x8   : > { %s3262_s30 = scalar_select %p21_p0, %s3175_s23, %s23_s28  }
   0x9   : > { %p3269_p3 = por %p31_p2, %p30_p1  ;;  %s48_s7 = ssub.s32 %s3252_s26, %s47_s29 }
   0xa   : > { %p49_p4 = scmp.eq.s32.totalorder %s48_s7, 0  ;;  %s51_s8 = sadd.s32 1, %s3167_s21 }
   0xb   : > { %p58_p5 = scmp.ne.s32.totalorder %s3167_s21, %s3163_s20  ;;  %s74_s9 = sadd.s32 2, %s3179_s24 }
   0xc   : > { %s3279_s10 = scalar_select %p49_p4, %s3167_s21, %s51_s8  }
   0xd   : > { %p3283_p6 = por %p58_p5, %p31_p2  ;;  %s75_s12 = sadd.s32 2, %s3252_s26 }
   0xe   : > { %s76_s13 = ssub.s32 %s74_s9, %s75_s12  ;;  %s79_s14 = sadd.s32 1, %s3159_s19 }
   0xf   : > { %p77_p7 = scmp.eq.s32.totalorder %s76_s13, 0  ;;  %p86_p8 = scmp.ne.s32.totalorder %s3159_s19, %s3155_s18 }
  0x10   : > { %p137_p9 = scmp.eq.s32.totalorder %s3249_s25, 15  ;;  %p2315_p12 = scmp.ge.s32.totalorder %s3179_s24, 16 }
  0x11   : > { %s3293_s15 = scalar_select %p77_p7, %s3159_s19, %s79_s14  }
  0x12   : > { %p3297_p10 = por %p86_p8, %p31_p2  ;;  %p3304_p11 = por %p137_p9, %p30_p1 }
  0x13   : > { %188 = sbr.rel (%p2315_p12) target bundleno = 47 (0x2f), region = 20 }
  0x1a   : > { %191 = sbr.rel (!%p3269_p3) target bundleno = 33 (0x21), region = 24  ;;  %s193_s27 = sand.u32 (%p3269_p3), 1, %s3175_s23  }
  0x1b   : > { %s2967_s28 = smul.u32 (%p3269_p3), 12, %s3179_s24 }
  0x1c   : > { %s2966_s29 = smul.u32 (%p3269_p3), 24, %s193_s27 }
  0x1d   : > { %s198_s9 = scalar_lea.vmem (%p3269_p3), %s3832_s0, %s2967_s28 }
  0x1e   : > { %v214_v0 = vld [vmem:[%s198_s9] sm:$0xff] (%p3269_p3)   ;;  %v218_v1 = vld [vmem:[%s198_s9 + $0x8] sm:$0xf] (%p3269_p3)  ;;  %v220_v2 = vld [vmem:[%s198_s9 + $0xd8] sm:$0xff] (%p3269_p3)   ;;  %s195_s12 = scalar_lea.vmem (%p3269_p3), [#allocation2], %s2966_s29 }
  0x1f   : > { %215 = vst [vmem:[%s195_s12] sm:$0xff] (%p3269_p3), %v214_v0   ;;  %219 = vst [vmem:[%s195_s12 + $0x8] sm:$0xf] (%p3269_p3), %v218_v1  ;;  %v224_v3 = vld [vmem:[%s198_s9 + $0xe0] sm:$0xf] (%p3269_p3) }
  0x20   : > { %221 = vst [vmem:[%s195_s12 + $0xc] sm:$0xff] (%p3269_p3), %v220_v2   ;;  %225 = vst [vmem:[%s195_s12 + $0x14] sm:$0xf] (%p3269_p3), %v224_v3 }
  0x21 PF: > { %260 = sbr.rel (!%p3283_p6) target bundleno = 40 (0x28), region = 65  ;;  %s262_s6 = sand.u32 (%p3283_p6), 1, %s3167_s21  }
  0x22   : > { %s2219_s13 = smul.u32 (%p3283_p6), 12, %s3179_s24 }
  0x23   : > { %s2968_s14 = smul.u32 (%p3283_p6), 24, %s262_s6 }
  0x24   : > { %s2220_s7 = scalar_lea.vmem (%p3283_p6), %s3833_s1, %s2219_s13 }
  0x25   : > { %v2317_v4 = vld [vmem:[%s2220_s7 + $0xc] sm:$0xff] (%p3283_p6)   ;;  %v2319_v5 = vld [vmem:[%s2220_s7 + $0x14] sm:$0xf] (%p3283_p6)  ;;  %v2320_v6 = vld [vmem:[%s2220_s7 + $0xe4] sm:$0xff] (%p3283_p6)   ;;  %s264_s29 = scalar_lea.vmem (%p3283_p6), [#allocation3], %s2968_s14 }
  0x26   : > { %285 = vst [vmem:[%s264_s29] sm:$0xff] (%p3283_p6), %v2317_v4   ;;  %289 = vst [vmem:[%s264_s29 + $0x8] sm:$0xf] (%p3283_p6), %v2319_v5  ;;  %v2322_v7 = vld [vmem:[%s2220_s7 + $0xec] sm:$0xf] (%p3283_p6) }
  0x27   : > { %291 = vst [vmem:[%s264_s29 + $0xc] sm:$0xff] (%p3283_p6), %v2320_v6   ;;  %295 = vst [vmem:[%s264_s29 + $0x14] sm:$0xf] (%p3283_p6), %v2322_v7 }
  0x28 PF: > { %330 = sbr.rel (!%p3297_p10) target bundleno = 47 (0x2f), region = 106  ;;  %s332_s11 = sand.u32 (%p3297_p10), 1, %s3159_s19  }
  0x29   : > { %s2224_s8 = smul.u32 (%p3297_p10), 12, %s3179_s24 }
  0x2a   : > { %s2969_s9 = smul.u32 (%p3297_p10), 24, %s332_s11 }
  0x2b   : > { %s2225_s13 = scalar_lea.vmem (%p3297_p10), %s3834_s2, %s2224_s8 }
  0x2c   : > { %v2323_v8 = vld [vmem:[%s2225_s13 + $0x18] sm:$0xff] (%p3297_p10)   ;;  %v2325_v9 = vld [vmem:[%s2225_s13 + $0x20] sm:$0xf] (%p3297_p10)  ;;  %v2326_v10 = vld [vmem:[%s2225_s13 + $0xf0] sm:$0xff] (%p3297_p10)   ;;  %s334_s14 = scalar_lea.vmem (%p3297_p10), [#allocation4], %s2969_s9 }
  0x2d   : > { %355 = vst [vmem:[%s334_s14] sm:$0xff] (%p3297_p10), %v2323_v8   ;;  %359 = vst [vmem:[%s334_s14 + $0x8] sm:$0xf] (%p3297_p10), %v2325_v9  ;;  %v2328_v11 = vld [vmem:[%s2225_s13 + $0xf8] sm:$0xf] (%p3297_p10) }
  0x2e   : > { %361 = vst [vmem:[%s334_s14 + $0xc] sm:$0xff] (%p3297_p10), %v2326_v10   ;;  %365 = vst [vmem:[%s334_s14 + $0x14] sm:$0xf] (%p3297_p10), %v2328_v11 }
  0x2f PF: > { %p2329_p13 = scmp.ge.s32.totalorder %s3179_s24, 1  ;;  %p399_p0 = scmp.lt.s32.totalorder %s3179_s24, 17 }
  0x31   : > { %p400_p1 = pnand %p2329_p13, %p399_p0 }
  0x32   : > { %v3031_v12 = vld [vmem:[%s3835_s3 + $0x20] sm:$0xff] (!%p400_p1)   ;;  %v3181_v13 = vmov (!%p400_p1), 0.0   ;;  %v3033_v15 = vld [vmem:[%s3835_s3 + $0x28] sm:$0xff] (!%p400_p1)   ;;  %vm3182_vm0 = vmmov (!%p400_p1), 0   ;;  %s406_s11 = sand.u32 (!%p400_p1), 1, %s3171_s22   ;;  %v3035_v17 = vld [vmem:[%s3835_s3 + $0x30] sm:$0xff] (!%p400_p1)  }
  0x33   : > { %403 = sbr.rel (%p400_p1) target bundleno = 431 (0x1af), region = 147  ;;  %2686 = vmatprep.subr.bf16.mxu0 (!%p400_p1), %v3181_v13  ;;  %2794 = vmatprep.subr.bf16.mxu1 (!%p400_p1), %v3181_v13  ;;  %v3032_v14 = vld [vmem:[%s3835_s3 + $0x20] sm:$0xff] (!%p400_p1)   ;;  %v3034_v16 = vld [vmem:[%s3835_s3 + $0x28] sm:$0xff] (!%p400_p1)   ;;  %v3036_v18 = vld [vmem:[%s3835_s3 + $0x30] sm:$0xff] (!%p400_p1)   ;;  %vm493_vm1 = vsmask.f32 (!%p400_p1), 7424 }
  0x34   : > { %2687 = vmatpush3.bf16.msra.mxu0 (!%p400_p1), %v3031_v12  ;;  %2694 = vmatprep.mubr.msk.bf16.mxu0 (!%p400_p1), %vm3182_vm0, %v3181_v13  ;;  %s2970_s12 = smul.u32 (!%p400_p1), 24, %s406_s11  ;;  %v3037_v21 = vld [vmem:[%s3835_s3 + $0x38] sm:$0xff] (!%p400_p1)   ;;  %vm530_vm2 = vcmask (!%p400_p1), 523264   ;;  %v3041_v34 = vld [vmem:[%s3835_s3] sm:$0xff] (!%p400_p1)   ;;  %v3045_v44 = vld [vmem:[%s3835_s3 + $0x8] sm:$0xff] (!%p400_p1)   ;;  %s413_s6 = sand.u32 (!%p400_p1), 1, %s3163_s20  }
  0x35   : > { %2795 = vmatpush3.bf16.msra.mxu1 (!%p400_p1), %v3032_v14  ;;  %2688 = vmatprep.subr.bf16.mxu0 (!%p400_p1), %v3181_v13  ;;  %v3038_v25 = vld [vmem:[%s3835_s3 + $0x38] sm:$0xff] (!%p400_p1)   ;;  %v3044_v43 = vld [vmem:[%s3835_s3] sm:$0xff] (!%p400_p1)   ;;  %v3046_v46 = vld [vmem:[%s3835_s3 + $0x8] sm:$0xff] (!%p400_p1)   ;;  %s2971_s7 = smul.u32 (!%p400_p1), 24, %s413_s6  ;;  %vm655_vm3 = vcmask (!%p400_p1), 1046528   ;;  %s420_s9 = sand.u32 (!%p400_p1), 1, %s3155_s18  }
  0x36   : > { %2796 = vmatprep.subr.bf16.mxu1 (!%p400_p1), %v3181_v13  ;;  %2802 = vmatprep.mubr.msk.bf16.mxu1 (!%p400_p1), %vm3182_vm0, %v3181_v13  ;;  %s3363_s27 = scalar_lea.vmem (!%p400_p1), [#allocation2], %s2970_s12  ;;  %v3047_v47 = vld [vmem:[%s3835_s3 + $0x10] sm:$0xff] (!%p400_p1)   ;;  %v3049_v49 = vld [vmem:[%s3835_s3 + $0x18] sm:$0xff] (!%p400_p1)   ;;  %v3051_v51 = vld [vmem:[%s3835_s3 + $0x40] sm:$0xff] (!%p400_p1)   ;;  %s2972_s18 = smul.u32 (!%p400_p1), 24, %s420_s9  ;;  %vm2130_vm4 = vcmask (!%p400_p1), 516096  }
  0x37   : > { %v465_v19 = vld [vmem:[%s3363_s27] sm:$0xf] (!%p400_p1)  ;;  %v3367_v20 = vld [vmem:[%s3363_s27 + $0x4] sm:$0xf] (!%p400_p1)  ;;  %v2452_v24 = vld [vmem:[%s3363_s27 + $0xc] sm:$0xf] (!%p400_p1) }
  0x38   : > { %2689 = vmatpush3.bf16.msra.mxu0 (!%p400_p1), %v3033_v15  ;;  %v2340_v22 = vcombine.low (!%p400_p1), %v465_v19, %v3367_v20  ;;  %v3374_v23 = vld [vmem:[%s3363_s27 + $0x8] ss:$0 sps:$4 sm:$0x11] (!%p400_p1)   ;;  %v3383_v29 = vld [vmem:[%s3363_s27 + $0x10] sm:$0xf] (!%p400_p1)  ;;  %v3050_v50 = vld [vmem:[%s3835_s3 + $0x18] sm:$0xff] (!%p400_p1)  }
  0x39   : > { %2797 = vmatpush3.bf16.msra.mxu1 (!%p400_p1), %v3034_v16  ;;  %2690 = vmatprep.subr.bf16.mxu0 (!%p400_p1), %v3181_v13  ;;  %v502_v28 = vshll.u32 (!%p400_p1), %v3374_v23, 16  ;;  %v2463_v30 = vcombine.low (!%p400_p1), %v2452_v24, %v3383_v29  ;;  %v3388_v31 = vld [vmem:[%s3363_s27 + $0x14] ss:$0 sps:$4 sm:$0x11] (!%p400_p1)   ;;  %v3052_v52 = vld [vmem:[%s3835_s3 + $0x40] sm:$0xff] (!%p400_p1)   ;;  %s3452_s6 = scalar_lea.vmem (!%p400_p1), [#allocation3], %s2971_s7 }
  0x3a   : > { %2798 = vmatprep.subr.bf16.mxu1 %v3181_v13  ;;  %v495_v26 = vshrl.u32 %v2340_v22, 16  ;;  %v497_v27 = vshll.u32 %v2340_v22, 16  ;;  %v1337_v37 = vshll.u32 %v3388_v31, 16  ;;  %v3048_v48 = vld [vmem:[%s3835_s3 + $0x10] sm:$0xff]   ;;  %v3053_v53 = vld [vmem:[%s3835_s3 + $0x48] sm:$0xff]   ;;  %v657_v60 = vrot.slane %v3374_v23, 1 }
  0x3b   : > { %v504_v33 = vrot.slane %v502_v28, 1  ;;  %v1330_v35 = vshrl.u32 %v2463_v30, 16  ;;  %v1332_v36 = vshll.u32 %v2463_v30, 16  ;;  %v642_v54 = vld [vmem:[%s3363_s27] sm:$0xe]  ;;  %v3054_v55 = vld [vmem:[%s3835_s3 + $0x48] sm:$0xff]  }
  0x3c   : > { %2691 = vmatpush3.bf16.msra.mxu0 %v3035_v17  ;;  %v499_v32 = vrot.slane %v497_v27, 1  ;;  %v1339_v40 = vrot.slane %v1337_v37, 1  ;;  %v3055_v56 = vld [vmem:[%s3835_s3 + $0x50] sm:$0xff]   ;;  %v2360_v57 = vcombine.low %v642_v54, %v3367_v20  ;;  %v2475_v58 = vld [vmem:[%s3363_s27 + $0xc] sm:$0xe]  ;;  %v3057_v62 = vld [vmem:[%s3835_s3 + $0x58] sm:$0xff]  }
  0x3d   : > { %2799 = vmatpush3.bf16.msra.mxu1 %v3036_v18  ;;  %2692 = vmatprep.subr.bf16.mxu0 %v3181_v13  ;;  %v1334_v39 = vrot.slane %v1332_v36, 1  ;;  %v3056_v59 = vld [vmem:[%s3835_s3 + $0x50] sm:$0xff]   ;;  %v2484_v61 = vcombine.low %v2475_v58, %v3383_v29  ;;  %v1489_v0 = vrot.slane %v3388_v31, 1  ;;  %v3058_v1 = vld [vmem:[%s3835_s3 + $0x58] sm:$0xff]   ;;  %v3060_v4 = vld [vmem:[%s3835_s3 + $0x60] sm:$0xff]   ;;  %s3546_s29 = scalar_lea.vmem [#allocation4], %s2972_s18 }
  0x3e   : > { %2800 = vmatprep.subr.bf16.mxu1 %v3181_v13  ;;  %v500_v38 = vor.u32 %v499_v32, %v495_v26  ;;  %v656_v63 = vrot.slane %v2360_v57, 1  ;;  %v3062_v6 = vld [vmem:[%s3835_s3 + $0x60] sm:$0xff]   ;;  %v3063_v7 = vld [vmem:[%s3835_s3 + $0x68] sm:$0xff]   ;;  %v3065_v9 = vld [vmem:[%s3835_s3 + $0x70] sm:$0xff]   ;;  %p460_p2 = scmp.lt.s32.totalorder %s3249_s25, 15  ;;  %s2595_s27 = sshll.u32 (%p3304_p11), %s3249_s25, 4 }
  0x3f   : > { %v1335_v42 = vor.u32 %v1334_v39, %v1330_v35  ;;  %v1488_v2 = vrot.slane %v2484_v61, 1  ;;  %v3064_v8 = vld [vmem:[%s3835_s3 + $0x68] sm:$0xff]   ;;  %v3066_v10 = vld [vmem:[%s3835_s3 + $0x70] sm:$0xff]   ;;  %v3067_v11 = vld [vmem:[%s3835_s3 + $0x78] sm:$0xff]   ;;  %s2146_s9 = scalar_lea.vmem (%p3304_p11), %s3836_s4, %s2595_s27 }
  0x40   : > { %2693 = vmatpush3.bf16.msra.mxu0 %v3037_v21  ;;  %v505_v41 = vsel %vm493_vm1, %v500_v38, %v504_v33  ;;  %v658_v3 = vsel %vm655_vm3, %v656_v63, %v657_v60  ;;  %v815_v12 = vld [vmem:[%s3452_s6] sm:$0xf]  ;;  %v3068_v14 = vld [vmem:[%s3835_s3 + $0x78] sm:$0xff]   ;;  %v3521_v16 = vld [vmem:[%s3452_s6 + $0x4] sm:$0xf]  ;;  %s461_s22 = scalar_select %p460_p2, %s3249_s25, 15 }
  0x41   : > { %2801 = vmatpush3.bf16.msra.mxu1 %v3038_v25  ;;  %2698 = vmatprep.subr.bf16.mxu0 %v3181_v13  ;;  %v1340_v45 = vsel %vm493_vm1, %v1335_v42, %v1339_v40  ;;  %v1490_v5 = vsel %vm655_vm3, %v1488_v2, %v1489_v0  ;;  %v3069_v15 = vld [vmem:[%s3452_s6] sm:$0xff]   ;;  %v3070_v17 = vld [vmem:[%s3835_s3 + $0x80] sm:$0xff]   ;;  %v2506_v18 = vld [vmem:[%s3452_s6 + $0xc] sm:$0xf]  ;;  %v2388_v19 = vcombine.low %v815_v12, %v3521_v16 }
  0x42   : > { %2806 = vmatprep.subr.bf16.mxu1 %v3181_v13  ;;  %v3530_v20 = vld [vmem:[%s3452_s6 + $0x10] sm:$0xf]  ;;  %v3073_v25 = vld [vmem:[%s3835_s3 + $0x88] sm:$0xff]   ;;  %v3555_v28 = vld [vmem:[%s3452_s6 + $0x14] ss:$0 sps:$4 sm:$0x11]  }
  0x43   : > { %2695 = vmatmul.mubr.msk.bf16.vlgmr.msra.gmra.mrb[0].mxu0 %vm530_vm2, %v505_v41  ;;  %v3071_v21 = vld [vmem:[%s3452_s6 + $0xc] sm:$0xff]   ;;  %v2517_v24 = vcombine.low %v2506_v18, %v3530_v20  ;;  %v838_v26 = vshll.u32 %v2388_v19, 16  ;;  %v3074_v27 = vld [vmem:[%s3835_s3 + $0x88] sm:$0xff]   ;;  %v1674_v37 = vshll.u32 %v3555_v28, 16 }
  0x44   : > { %2699 = vmatpush3.bf16.msra.mxu0 %v3041_v34  ;;  %2706 = vmatprep.mubr.msk.bf16.mxu0 %vm3182_vm0, %v3181_v13  ;;  %v3072_v23 = vld [vmem:[%s3835_s3 + $0x80] sm:$0xff]   ;;  %v3075_v29 = vld [vmem:[%s3835_s3 + $0x90] sm:$0xff]   ;;  %v3077_v38 = vld [vmem:[%s3835_s3 + $0x98] sm:$0xff]  }
  0x45   : > { %2700 = vmatprep.subr.bf16.mxu0 %v3181_v13  ;;  %2803 = vmatmul.mubr.msk.bf16.vlgmr.msra.gmra.mrb[0].mxu1 %vm530_vm2, %v1340_v45  ;;  %v1669_v31 = vshll.u32 %v2517_v24, 16  ;;  %v840_v32 = vrot.slane %v838_v26, 1  ;;  %v3076_v34 = vld [vmem:[%s3835_s3 + $0x90] sm:$0xff]   ;;  %v1667_v35 = vshrl.u32 %v2517_v24, 16  ;;  %v3078_v41 = vld [vmem:[%s3835_s3 + $0x98] sm:$0xff]   ;;  %v3081_v45 = vld [vmem:[%s3835_s3 + $0xa0] sm:$0xff]  }
  0x46   : > { %2807 = vmatpush3.bf16.msra.mxu1 %v3044_v43  ;;  %2814 = vmatprep.mubr.msk.bf16.mxu1 %vm3182_vm0, %v3181_v13  ;;  %v1676_v43 = vrot.slane %v1674_v37, 1  ;;  %v3087_v54 = vld [vmem:[%s3835_s3 + $0xb0] sm:$0xff]   ;;  %v2573_v60 = vld [vmem:[%s3546_s29 + $0xc] sm:$0xe]  ;;  %v3089_v2 = vld [vmem:[%s3835_s3 + $0xb8] sm:$0xff]  }
  0x47   : > { %2808 = vmatprep.subr.bf16.mxu1 %v3181_v13  ;;  %v1671_v36 = vrot.slane %v1669_v31, 1  ;;  %v3619_v58 = vld [vmem:[%s3546_s29 + $0x10] sm:$0xf]  ;;  %v3101_v24 = vld [vmem:[%s3546_s29] sm:$0xff]  }
  0x48   : > { %2701 = vmatpush3.bf16.msra.mxu0 %v3045_v44  ;;  %v3088_v61 = vld [vmem:[%s3835_s3 + $0xb0] sm:$0xff]   ;;  %v2582_v0 = vcombine.low %v2573_v60, %v3619_v58  ;;  %v3096_v18 = vld [vmem:[%s3835_s3 + $0xc8] sm:$0xff]  }
  0x49   : > { %2702 = vmatprep.subr.bf16.mxu0 %v3181_v13  ;;  %v1672_v42 = vor.u32 %v1671_v36, %v1667_v35  ;;  %v3105_v31 = vld [vmem:[%s3835_s3 + $0xe8] sm:$0xff]   ;;  %v3107_v35 = vld [vmem:[%s3835_s3 + $0xf0] sm:$0xff]  }
  0x4a   : > { %2809 = vmatpush3.bf16.msra.mxu1 %v3046_v46 }
  0x4b   : > { %2810 = vmatprep.subr.bf16.mxu1 %v3181_v13  ;;  %v1677_v46 = vsel %vm493_vm1, %v1672_v42, %v1676_v43  ;;  %v3109_v43 = vld [vmem:[%s3835_s3 + $0xf8] sm:$0xff]  }
  0x4c   : > { %2703 = vmatpush3.bf16.msra.mxu0 %v3047_v47  ;;  %v3084_v47 = vld [vmem:[%s3835_s3 + $0xa0] sm:$0xff]  }
  0x4d   : > { %2704 = vmatprep.subr.bf16.mxu0 %v3181_v13 }
  0x4e   : > { %2811 = vmatpush3.bf16.msra.mxu1 %v3048_v48  ;;  %v3085_v48 = vld [vmem:[%s3835_s3 + $0xa8] sm:$0xff]  }
  0x4f   : > { %2812 = vmatprep.subr.bf16.mxu1 %v3181_v13 }
  0x50   : > { %2705 = vmatpush3.bf16.msra.mxu0 %v3049_v49  ;;  %v917_v49 = vld [vmem:[%s3452_s6] sm:$0xe] }
  0x51   : > { %2710 = vmatprep.subr.bf16.mxu0 %v3181_v13 }
  0x52   : > { %2813 = vmatpush3.bf16.msra.mxu1 %v3050_v50  ;;  %v3086_v50 = vld [vmem:[%s3835_s3 + $0xa8] sm:$0xff]  }
  0x53   : > { %2707 = vmatmul.mubr.msk.bf16.vlgmr.msra.gmra.mrb[0].mxu0 %vm530_vm2, %v2340_v22  ;;  %2818 = vmatprep.subr.bf16.mxu1 %v3181_v13  ;;  %v3535_v22 = vld [vmem:[%s3452_s6 + $0x8] ss:$0 sps:$4 sm:$0x11]  }
  0x54   : > { %2711 = vmatpush3.bf16.msra.mxu0 %v3051_v51  ;;  %2718 = vmatprep.mubr.msk.bf16.mxu0 %vm3182_vm0, %v3181_v13  ;;  %v843_v33 = vshll.u32 %v3535_v22, 16  ;;  %v2524_v51 = vld [vmem:[%s3452_s6 + $0xc] sm:$0xe]  ;;  %s2330_s6 = sshll.u32 %s406_s11, 5  ;;  %s2331_s11 = sshll.u32 %s461_s22, 1 }
  0x55   : > { %2712 = vmatprep.subr.bf16.mxu0 %v3181_v13  ;;  %2815 = vmatmul.mubr.msk.bf16.vlgmr.msra.gmra.mrb[0].mxu1 %vm530_vm2, %v2463_v30  ;;  %v836_v30 = vshrl.u32 %v2388_v19, 16  ;;  %v2533_v57 = vcombine.low %v2524_v51, %v3530_v20  ;;  %v3097_v19 = vld [vmem:[%s3835_s3 + $0xd0] sm:$0xff]   ;;  %s3777_s28 = scalar_lea.vmem [#allocation5], %s2330_s6  ;;  %s463_s20 = scalar_lea.vmem %s3837_s5, %s2331_s11 }
  0x56   : > { %2819 = vmatpush3.bf16.msra.mxu1 %v3052_v52  ;;  %2826 = vmatprep.mubr.msk.bf16.mxu1 %vm3182_vm0, %v3181_v13  ;;  %v845_v40 = vrot.slane %v843_v33, 1  ;;  %v3605_v52 = vld [vmem:[%s3546_s29 + $0x8] ss:$0 sps:$4 sm:$0x11]   ;;  %v3098_v20 = vld [vmem:[%s3835_s3 + $0xd0] sm:$0xff]  }
  0x57   : > { %2820 = vmatprep.subr.bf16.mxu1 %v3181_v13  ;;  %v841_v39 = vor.u32 %v840_v32, %v836_v30  ;;  %v1205_v63 = vrot.slane %v3605_v52, 1  ;;  %v3106_v33 = vld [vmem:[%s3835_s3 + $0xe8] sm:$0xff]  }
  0x58   : > { %2713 = vmatpush3.bf16.msra.mxu0 %v3053_v53  ;;  %v3608_v53 = vld [vmem:[%s3546_s29 + $0x14] ss:$0 sps:$4 sm:$0x11]  }
  0x59   : > { %2714 = vmatprep.subr.bf16.mxu0 %v3181_v13  ;;  %v846_v44 = vsel %vm493_vm1, %v841_v39, %v845_v40  ;;  %v3108_v39 = vld [vmem:[%s3835_s3 + $0xf0] sm:$0xff]   ;;  %v1946_v42 = vshll.u32 %v3608_v53, 16 }
  0x5a   : > { %2821 = vmatpush3.bf16.msra.mxu1 %v3054_v55  ;;  %v2403_v55 = vcombine.low %v917_v49, %v3521_v16  ;;  %v3094_v16 = vld [vmem:[%s3835_s3 + $0xc0] sm:$0xff]  }
  0x5b   : > { %2822 = vmatprep.subr.bf16.mxu1 %v3181_v13 }
  0x5c   : > { %2715 = vmatpush3.bf16.msra.mxu0 %v3055_v56  ;;  %v1090_v56 = vld [vmem:[%s3546_s29 + $0x4] sm:$0xf] }
  0x5d   : > { %2716 = vmatprep.subr.bf16.mxu0 %v3181_v13 }
  0x5e   : > { %2823 = vmatpush3.bf16.msra.mxu1 %v3056_v59  ;;  %v1191_v59 = vld [vmem:[%s3546_s29] sm:$0xe] }
  0x5f   : > { %2824 = vmatprep.subr.bf16.mxu1 %v3181_v13 }
  0x60   : > { %2717 = vmatpush3.bf16.msra.mxu0 %v3057_v62  ;;  %v2446_v62 = vcombine.low %v1191_v59, %v1090_v56 }
  0x61   : > { %2722 = vmatprep.subr.bf16.mxu0 %v3181_v13 }
  0x62   : > { %2825 = vmatpush3.bf16.msra.mxu1 %v3058_v1  ;;  %v2033_v1 = vrot.slane %v3608_v53, 1  ;;  %v3117_v53 = vld [vmem:[%s3835_s3 + $0x108] sm:$0xff]  }
  0x63   : > { %2719 = vmatmul.mubr.msk.bf16.vlgmr.msra.gmra.mrb[0].mxu0 %vm530_vm2, %v658_v3  ;;  %2830 = vmatprep.subr.bf16.mxu1 %v3181_v13  ;;  %v930_v3 = vrot.slane %v2403_v55, 1  ;;  %v3119_v55 = vld [vmem:[%s3835_s3 + $0x110] sm:$0xff]  }
  0x64   : > { %2723 = vmatpush3.bf16.msra.mxu0 %v3060_v4  ;;  %2730 = vmatprep.mubr.msk.bf16.mxu0 %vm3182_vm0, %v3181_v13  ;;  %v931_v4 = vrot.slane %v3535_v22, 1  ;;  %v1089_v22 = vld [vmem:[%s3546_s29] sm:$0xf] }
  0x65   : > { %2724 = vmatprep.subr.bf16.mxu0 %v3181_v13  ;;  %2827 = vmatmul.mubr.msk.bf16.vlgmr.msra.gmra.mrb[0].mxu1 %vm530_vm2, %v1490_v5  ;;  %v1204_v5 = vrot.slane %v2446_v62, 1  ;;  %v2431_v26 = vcombine.low %v1089_v22, %v1090_v56  ;;  %v3120_v56 = vld [vmem:[%s3835_s3 + $0x110] sm:$0xff]  }
  0x66   : > { %2831 = vmatpush3.bf16.msra.mxu1 %v3062_v6  ;;  %2838 = vmatprep.mubr.msk.bf16.mxu1 %vm3182_vm0, %v3181_v13  ;;  %v2032_v6 = vrot.slane %v2582_v0, 1  ;;  %v932_v12 = vsel %vm655_vm3, %v930_v3, %v931_v4 }
  0x67   : > { %2832 = vmatprep.subr.bf16.mxu1 %v3181_v13  ;;  %v1112_v32 = vshll.u32 %v2431_v26, 16  ;;  %v1110_v36 = vshrl.u32 %v2431_v26, 16 }
  0x68   : > { %2725 = vmatpush3.bf16.msra.mxu0 %v3063_v7  ;;  %v3090_v7 = vld [vmem:[%s3835_s3 + $0xb8] sm:$0xff]  }
  0x69   : > { %2726 = vmatprep.subr.bf16.mxu0 %v3181_v13  ;;  %v1114_v37 = vrot.slane %v1112_v32, 1 }
  0x6a   : > { %2833 = vmatpush3.bf16.msra.mxu1 %v3064_v8  ;;  %v1760_v8 = vrot.slane %v2533_v57, 1  ;;  %v3121_v57 = vld [vmem:[%s3835_s3 + $0x118] sm:$0xff]  }
  0x6b   : > { %2834 = vmatprep.subr.bf16.mxu1 %v3181_v13 }
  0x6c   : > { %2727 = vmatpush3.bf16.msra.mxu0 %v3065_v9  ;;  %v1761_v9 = vrot.slane %v3555_v28, 1  ;;  %v3103_v28 = vld [vmem:[%s3546_s29 + $0xc] sm:$0xff]  }
  0x6d   : > { %2728 = vmatprep.subr.bf16.mxu0 %v3181_v13 }
  0x6e   : > { %2835 = vmatpush3.bf16.msra.mxu1 %v3066_v10  ;;  %v3640_v10 = vsel %vm655_vm3, %v1204_v5, %v1205_v63 }
  0x6f   : > { %2836 = vmatprep.subr.bf16.mxu1 %v3181_v13 }
  0x70   : > { %2729 = vmatpush3.bf16.msra.mxu0 %v3067_v11  ;;  %v3643_v11 = vsel %vm655_vm3, %v2032_v6, %v2033_v1 }
  0x71   : > { %2734 = vmatprep.subr.bf16.mxu0 %v3181_v13 }
  0x72   : > { %2837 = vmatpush3.bf16.msra.mxu1 %v3068_v14  ;;  %v3092_v14 = vld [vmem:[%s3835_s3 + $0xc0] sm:$0xff]  }
  0x73   : > { %2731 = vmatmul.mubr.msk.bf16.vlgmr.msra.gmra.mrb[0].mxu0 %vm530_vm2, %v3069_v15  ;;  %2842 = vmatprep.subr.bf16.mxu1 %v3181_v13  ;;  %v1762_v15 = vsel %vm655_vm3, %v1760_v8, %v1761_v9 }
  0x74   : > { %2735 = vmatpush3.bf16.msra.mxu0 %v3070_v17  ;;  %2742 = vmatprep.mubr.msk.bf16.mxu0 %vm3182_vm0, %v3181_v13  ;;  %v3095_v17 = vld [vmem:[%s3835_s3 + $0xc8] sm:$0xff]  }
  0x75   : > { %2736 = vmatprep.subr.bf16.mxu0 %v3181_v13  ;;  %2839 = vmatmul.mubr.msk.bf16.vlgmr.msra.gmra.mrb[0].mxu1 %vm530_vm2, %v3071_v21  ;;  %v3099_v21 = vld [vmem:[%s3835_s3 + $0xd8] sm:$0xff]  }
  0x76   : > { %2843 = vmatpush3.bf16.msra.mxu1 %v3072_v23  ;;  %2850 = vmatprep.mubr.msk.bf16.mxu1 %vm3182_vm0, %v3181_v13  ;;  %v3100_v23 = vld [vmem:[%s3835_s3 + $0xd8] sm:$0xff]  }
  0x77   : > { %2844 = vmatprep.subr.bf16.mxu1 %v3181_v13 }
  0x78   : > { %2737 = vmatpush3.bf16.msra.mxu0 %v3073_v25  ;;  %v3102_v25 = vld [vmem:[%s3835_s3 + $0xe0] sm:$0xff]  }
  0x79   : > { %2738 = vmatprep.subr.bf16.mxu0 %v3181_v13 }
  0x7a   : > { %2845 = vmatpush3.bf16.msra.mxu1 %v3074_v27  ;;  %v2555_v27 = vld [vmem:[%s3546_s29 + $0xc] sm:$0xf] }
  0x7b   : > { %2846 = vmatprep.subr.bf16.mxu1 %v3181_v13  ;;  %v2566_v30 = vcombine.low %v2555_v27, %v3619_v58  ;;  %v3122_v58 = vld [vmem:[%s3835_s3 + $0x118] sm:$0xff]  }
  0x7c   : > { %2739 = vmatpush3.bf16.msra.mxu0 %v3075_v29  ;;  %v3104_v29 = vld [vmem:[%s3835_s3 + $0xe0] sm:$0xff]  }
  0x7d   : > { %2740 = vmatprep.subr.bf16.mxu0 %v3181_v13  ;;  %v1939_v40 = vshrl.u32 %v2566_v30, 16 }
  0x7e   : > { %2847 = vmatpush3.bf16.msra.mxu1 %v3076_v34  ;;  %v1941_v34 = vshll.u32 %v2566_v30, 16 }
  0x7f   : > { %2848 = vmatprep.subr.bf16.mxu1 %v3181_v13 }
  0x80   : > { %2741 = vmatpush3.bf16.msra.mxu0 %v3077_v38  ;;  %v1117_v38 = vshll.u32 %v3605_v52, 16  ;;  %v3116_v52 = vld [vmem:[%s3835_s3 + $0x100] sm:$0xff]  }
  0x81   : > { %2746 = vmatprep.subr.bf16.mxu0 %v3181_v13 }
  0x82   : > { %2849 = vmatpush3.bf16.msra.mxu1 %v3078_v41  ;;  %v1943_v41 = vrot.slane %v1941_v34, 1 }
  0x83   : > { %2743 = vmatmul.mubr.msk.bf16.vlgmr.msra.gmra.mrb[0].mxu0 %vm530_vm2, %v846_v44  ;;  %2854 = vmatprep.subr.bf16.mxu1 %v3181_v13  ;;  %v1115_v44 = vor.u32 %v1114_v37, %v1110_v36 }
  0x84   : > { %2747 = vmatpush3.bf16.msra.mxu0 %v3081_v45  ;;  %2754 = vmatprep.mubr.msk.bf16.mxu0 %vm3182_vm0, %v3181_v13  ;;  %v1119_v45 = vrot.slane %v1117_v38, 1 }
  0x85   : > { %2748 = vmatprep.subr.bf16.mxu0 %v3181_v13  ;;  %2851 = vmatmul.mubr.msk.bf16.vlgmr.msra.gmra.mrb[0].mxu1 %vm530_vm2, %v1677_v46  ;;  %v3110_v46 = vld [vmem:[%s3835_s3 + $0xf8] sm:$0xff]  }
  0x86   : > { %2855 = vmatpush3.bf16.msra.mxu1 %v3084_v47  ;;  %2862 = vmatprep.mubr.msk.bf16.mxu1 %vm3182_vm0, %v3181_v13  ;;  %v1944_v47 = vor.u32 %v1943_v41, %v1939_v40  ;;  %v1120_v49 = vsel %vm493_vm1, %v1115_v44, %v1119_v45 }
  0x87   : > { %2856 = vmatprep.subr.bf16.mxu1 %v3181_v13 }
  0x88   : > { %2749 = vmatpush3.bf16.msra.mxu0 %v3085_v48  ;;  %v1948_v48 = vrot.slane %v1946_v42, 1 }
  0x89   : > { %2750 = vmatprep.subr.bf16.mxu0 %v3181_v13 }
  0x8a   : > { %2857 = vmatpush3.bf16.msra.mxu1 %v3086_v50  ;;  %v3113_v50 = vld [vmem:[%s3835_s3 + $0x100] sm:$0xff]   ;;  %v1949_v51 = vsel %vm493_vm1, %v1944_v47, %v1948_v48 }
  0x8b   : > { %2858 = vmatprep.subr.bf16.mxu1 %v3181_v13 }
  0x8c   : > { %2751 = vmatpush3.bf16.msra.mxu0 %v3087_v54  ;;  %v3118_v54 = vld [vmem:[%s3835_s3 + $0x108] sm:$0xff]  }
  0x8d   : > { %2752 = vmatprep.subr.bf16.mxu0 %v3181_v13 }
  0x8e   : > { %2859 = vmatpush3.bf16.msra.mxu1 %v3088_v61 }
  0x8f   : > { %2860 = vmatprep.subr.bf16.mxu1 %v3181_v13 }
  0x90   : > { %2753 = vmatpush3.bf16.msra.mxu0 %v3089_v2 }
  0x91   : > { %2758 = vmatprep.subr.bf16.mxu0 %v3181_v13 }
  0x92   : > { %2861 = vmatpush3.bf16.msra.mxu1 %v3090_v7 }
  0x93   : > { %2755 = vmatmul.mubr.msk.bf16.vlgmr.msra.gmra.mrb[0].mxu0 %vm530_vm2, %v932_v12  ;;  %2866 = vmatprep.subr.bf16.mxu1 %v3181_v13 }
  0x94   : > { %2759 = vmatpush3.bf16.msra.mxu0 %v3092_v14  ;;  %2766 = vmatprep.mubr.msk.bf16.mxu0 %vm3182_vm0, %v3181_v13 }
  0x95   : > { %2760 = vmatprep.subr.bf16.mxu0 %v3181_v13  ;;  %2863 = vmatmul.mubr.msk.bf16.vlgmr.msra.gmra.mrb[0].mxu1 %vm530_vm2, %v1762_v15 }
  0x96   : > { %2867 = vmatpush3.bf16.msra.mxu1 %v3094_v16  ;;  %2874 = vmatprep.mubr.msk.bf16.mxu1 %vm3182_vm0, %v3181_v13 }
  0x97   : > { %2868 = vmatprep.subr.bf16.mxu1 %v3181_v13 }
  0x98   : > { %2761 = vmatpush3.bf16.msra.mxu0 %v3095_v17 }
  0x99   : > { %2762 = vmatprep.subr.bf16.mxu0 %v3181_v13 }
  0x9a   : > { %2869 = vmatpush3.bf16.msra.mxu1 %v3096_v18 }
  0x9b   : > { %2870 = vmatprep.subr.bf16.mxu1 %v3181_v13 }
  0x9c   : > { %2763 = vmatpush3.bf16.msra.mxu0 %v3097_v19 }
  0x9d   : > { %2764 = vmatprep.subr.bf16.mxu0 %v3181_v13 }
  0x9e   : > { %2871 = vmatpush3.bf16.msra.mxu1 %v3098_v20 }
  0x9f   : > { %2872 = vmatprep.subr.bf16.mxu1 %v3181_v13 }
  0xa0   : > { %2765 = vmatpush3.bf16.msra.mxu0 %v3099_v21 }
  0xa1   : > { %2770 = vmatprep.subr.bf16.mxu0 %v3181_v13 }
  0xa2   : > { %2873 = vmatpush3.bf16.msra.mxu1 %v3100_v23 }
  0xa3   : > { %2767 = vmatmul.mubr.msk.bf16.vlgmr.msra.gmra.mrb[0].mxu0 %vm530_vm2, %v3101_v24  ;;  %2878 = vmatprep.subr.bf16.mxu1 %v3181_v13 }
  0xa4   : > { %2771 = vmatpush3.bf16.msra.mxu0 %v3102_v25  ;;  %2778 = vmatprep.mubr.msk.bf16.mxu0 %vm3182_vm0, %v3181_v13 }
  0xa5   : > { %2772 = vmatprep.subr.bf16.mxu0 %v3181_v13  ;;  %2875 = vmatmul.mubr.msk.bf16.vlgmr.msra.gmra.mrb[0].mxu1 %vm530_vm2, %v3103_v28 }
  0xa6   : > { %2879 = vmatpush3.bf16.msra.mxu1 %v3104_v29  ;;  %2886 = vmatprep.mubr.msk.bf16.mxu1 %vm3182_vm0, %v3181_v13 }
  0xa7   : > { %2880 = vmatprep.subr.bf16.mxu1 %v3181_v13 }
  0xa8   : > { %2773 = vmatpush3.bf16.msra.mxu0 %v3105_v31 }
  0xa9   : > { %2774 = vmatprep.subr.bf16.mxu0 %v3181_v13 }
  0xaa   : > { %2881 = vmatpush3.bf16.msra.mxu1 %v3106_v33 }
  0xab   : > { %2882 = vmatprep.subr.bf16.mxu1 %v3181_v13 }
  0xac   : > { %2775 = vmatpush3.bf16.msra.mxu0 %v3107_v35 }
  0xad   : > { %2776 = vmatprep.subr.bf16.mxu0 %v3181_v13 }
  0xae   : > { %2883 = vmatpush3.bf16.msra.mxu1 %v3108_v39 }
  0xaf   : > { %2884 = vmatprep.subr.bf16.mxu1 %v3181_v13 }
  0xb0   : > { %2777 = vmatpush3.bf16.msra.mxu0 %v3109_v43 }
  0xb1   : > { %2782 = vmatprep.subr.bf16.mxu0 %v3181_v13 }
  0xb2   : > { %2885 = vmatpush3.bf16.msra.mxu1 %v3110_v46 }
  0xb3   : > { %2779 = vmatmul.mubr.msk.bf16.vlgmr.msra.gmra.mrb[0].mxu0 %vm530_vm2, %v1120_v49  ;;  %2890 = vmatprep.subr.bf16.mxu1 %v3181_v13 }
  0xb4   : > { %2783 = vmatpush3.bf16.msra.mxu0 %v3113_v50  ;;  %2790 = vmatprep.mubr.msk.bf16.mxu0 %vm3182_vm0, %v3181_v13 }
  0xb5   : > { %2784 = vmatprep.subr.bf16.mxu0 %v3181_v13  ;;  %2887 = vmatmul.mubr.msk.bf16.vlgmr.msra.gmra.mrb[0].mxu1 %vm530_vm2, %v1949_v51 }
  0xb6   : > { %2891 = vmatpush3.bf16.msra.mxu1 %v3116_v52  ;;  %2898 = vmatprep.mubr.msk.bf16.mxu1 %vm3182_vm0, %v3181_v13 }
  0xb7   : > { %2892 = vmatprep.subr.bf16.mxu1 %v3181_v13 }
  0xb8   : > { %2785 = vmatpush3.bf16.msra.mxu0 %v3117_v53 }
  0xb9   : > { %2786 = vmatprep.subr.bf16.mxu0 %v3181_v13 }
  0xba   : > { %2893 = vmatpush3.bf16.msra.mxu1 %v3118_v54 }
  0xbb   : > { %2894 = vmatprep.subr.bf16.mxu1 %v3181_v13 }
  0xbc   : > { %2787 = vmatpush3.bf16.msra.mxu0 %v3119_v55 }
  0xbd   : > { %2788 = vmatprep.subr.bf16.mxu0 %v3181_v13 }
  0xbe   : > { %2895 = vmatpush3.bf16.msra.mxu1 %v3120_v56 }
  0xbf   : > { %2896 = vmatprep.subr.bf16.mxu1 %v3181_v13 }
  0xc0   : > { %2789 = vmatpush3.bf16.msra.mxu0 %v3121_v57 }
  0xc2   : > { %2897 = vmatpush3.bf16.msra.mxu1 %v3122_v58 }
  0xc3   : > { %2791 = vmatmul.mubr.msk.bf16.vlgmr.msra.gmra.mrb[0].mxu0 %vm530_vm2, %v3640_v10 }
  0xc5   : > { %2899 = vmatmul.mubr.msk.bf16.vlgmr.msra.gmra.mrb[0].mxu1 %vm530_vm2, %v3643_v11 }
 0x196   : > { %v1268_v59 = vpop.f32.mrb[0].mxu0 }
 0x197   : > { %1277 = vst.msk [vmem:[%s3777_s28] sm:$0xff] %vm530_vm2, %v1268_v59  ;;  %v1289_v60 = vmul.f32 %v1268_v59, %v1268_v59  ;;  %v2792_v13 = vpop.f32.mrb[1].mxu0  ;;  %v1279_v62 = vsel %vm530_vm2, %v1268_v59, 0.0 }
 0x198   : > { %v1271_v61 = vpop.f32.mrb[2].mxu0  ;;  %v2096_v63 = vpop.f32.mrb[0].mxu1 }
 0x199   : > { %1278 = vst.msk [vmem:[%s3777_s28 + $0x8] sm:$0xff] %vm530_vm2, %v1271_v61  ;;  %v1280_v0 = vsel %vm530_vm2, %v1271_v61, 0.0  ;;  %v1290_v1 = vmul.f32 %v1271_v61, %v1271_v61  ;;  %v2793_v2 = vpop.f32.mrb[3].mxu0  ;;  %2588 = vst.msk [vmem:[%s3777_s28 + $0x10] sm:$0xff] %vm530_vm2, %v2096_v63  ;;  %v2900_v3 = vpop.f32.mrb[1].mxu1  ;;  %v1291_v5 = vsel %vm530_vm2, %v1289_v60, 0.0  ;;  %v2118_v6 = vmul.f32 %v2096_v63, %v2096_v63 }
 0x19a   : > { %v1281_v4 = vadd.f32 %v1280_v0, %v1279_v62  ;;  %v2099_v8 = vpop.f32.mrb[2].mxu1  ;;  %v2108_v9 = vsel %vm530_vm2, %v2096_v63, 0.0 }
 0x19b   : > { %v1292_v7 = vsel %vm530_vm2, %v1290_v1, 0.0  ;;  %2589 = vst.msk [vmem:[%s3777_s28 + $0x18] sm:$0xff] %vm530_vm2, %v2099_v8  ;;  %v2109_v12 = vsel %vm530_vm2, %v2099_v8, 0.0  ;;  %v2901_v14 = vpop.f32.mrb[3].mxu1  ;;  %v2119_v16 = vmul.f32 %v2099_v8, %v2099_v8  ;;  %v2120_v19 = vsel %vm530_vm2, %v2118_v6, 0.0 }
 0x19c   : > { %v1282_v10 = vrot.slane %v1281_v4, 4  ;;  %v1293_v11 = vadd.f32 %v1292_v7, %v1291_v5  ;;  %v2110_v15 = vadd.f32 %v2109_v12, %v2108_v9 }
 0x19d   : > { %v2121_v21 = vsel %vm530_vm2, %v2119_v16, 0.0 }
 0x19e   : > { %v1283_v17 = vadd.f32 %v1282_v10, %v1281_v4  ;;  %v1294_v18 = vrot.slane %v1293_v11, 4  ;;  %v2111_v20 = vrot.slane %v2110_v15, 4  ;;  %v2122_v24 = vadd.f32 %v2121_v21, %v2120_v19  ;;  %v2180_v45 = vld [vmem:[%s3777_s28] sm:$0xff] (%p3304_p11) }
 0x19f   : > { %2181 = vst [vmem:[%s2146_s9] sm:$0xff] (%p3304_p11), %v2180_v45 }
 0x1a0   : > { %v1284_v22 = vrot.slane %v1283_v17, 2  ;;  %v1295_v23 = vadd.f32 %v1294_v18, %v1293_v11  ;;  %v2112_v25 = vadd.f32 %v2111_v20, %v2110_v15  ;;  %v2123_v28 = vrot.slane %v2122_v24, 4  ;;  %v2182_v46 = vld [vmem:[%s3777_s28 + $0x8] sm:$0xff] (%p3304_p11)  ;;  %v2184_v47 = vld [vmem:[%s3777_s28 + $0x10] sm:$0xff] (%p3304_p11) }
 0x1a1   : > { %2183 = vst [vmem:[%s2146_s9 + $0x8] sm:$0xff] (%p3304_p11), %v2182_v46  ;;  %2185 = vst [vmem:[%s2146_s9 + $0x100] sm:$0xff] (%p3304_p11), %v2184_v47 }
 0x1a2   : > { %v1285_v26 = vadd.f32 %v1284_v22, %v1283_v17  ;;  %v1296_v27 = vrot.slane %v1295_v23, 2  ;;  %v2113_v29 = vrot.slane %v2112_v25, 2  ;;  %v2124_v32 = vadd.f32 %v2123_v28, %v2122_v24  ;;  %v2186_v48 = vld [vmem:[%s3777_s28 + $0x18] sm:$0xff] (%p3304_p11) }
 0x1a3   : > { %2187 = vst [vmem:[%s2146_s9 + $0x108] sm:$0xff] (%p3304_p11), %v2186_v48 }
 0x1a4   : > { %v1286_v30 = vrot.slane %v1285_v26, 1  ;;  %v1297_v31 = vadd.f32 %v1296_v27, %v1295_v23  ;;  %v2114_v33 = vadd.f32 %v2113_v29, %v2112_v25  ;;  %v2125_v35 = vrot.slane %v2124_v32, 2 }
 0x1a6   : > { %v1298_v34 = vrot.slane %v1297_v31, 1  ;;  %v1287_v36 = vadd.f32 %v1286_v30, %v1285_v26  ;;  %v2115_v37 = vrot.slane %v2114_v33, 1  ;;  %v2126_v38 = vadd.f32 %v2125_v35, %v2124_v32 }
 0x1a8   : > { %v2116_v39 = vadd.f32 %v2115_v37, %v2114_v33  ;;  %v1299_v40 = vadd.f32 %v1298_v34, %v1297_v31  ;;  %v2127_v41 = vrot.slane %v2126_v38, 1  ;;  %2143 = sbr.rel (!%p3304_p11) target bundleno = 431 (0x1af), region = 163 }
 0x1aa   : > { %v2117_v42 = vadd.f32 %v2116_v39, %v1287_v36  ;;  %v2128_v43 = vadd.f32 %v2127_v41, %v2126_v38 }
 0x1ac   : > { %2131 = vst.msk [vmem:[%s463_s20] sm:$0x1] %vm2130_vm4, %v2117_v42  ;;  %v2129_v44 = vadd.f32 %v2128_v43, %v1299_v40 }
 0x1ae   : > { %2132 = vst.msk [vmem:[%s463_s20 + $0x1] sm:$0x1] %vm2130_vm4, %v2129_v44 }
 0x1af PF: > { %p13_p3 = scmp.ge.s32.totalorder %s3252_s26, 18   ;;  %s3842_s18 = smov %s3159_s19 }
 0x1b0   : > { %s3843_s19 = smov %s3293_s15  ;;  %s3844_s20 = smov %s3167_s21 }
 0x1b1   : > { %s3845_s21 = smov %s3279_s10  ;;  %s3846_s22 = smov %s3175_s23 }
 0x1b2   : > { %s3847_s23 = smov %s3262_s30  ;;  %s3848_s24 = smov %s3252_s26 }
 0x1b3   :  { %15 = sbr.rel (!%p13_p3) target bundleno = 4 (0x4), region = 272 }

</bundles_post_ra>
